<compile_context>
chip_gen: v7x
topology: tpu7x:2x2x1
jax: 0.10.0
libtpu: 0.0.40
codegen_flags: <defaults>
</compile_context>

<pallas_src>
from functools import partial

import jax
import jax.numpy as jnp
from jax import lax
from jax.experimental import pallas as pl
from jax.experimental.pallas import tpu as pltpu

C_IN = 64
C_MID = 64
C_OUT = 128
KH = KW = 3
NEG_SLOPE = 0.01  # nn.LeakyReLU() default


def _integration_cell_kernel(x_ref, w1_ref, b1_ref, w2_ref, b2_ref, o_ref,
                             xp1_ref, xp2_ref, *, chunk_imgs):
    # x_ref:   (NBLK, H, W, 64)      bf16   NBLK time-step images, channels-last
    # w1_ref:  (9, 64, 64)           bf16   conv1 taps, [ky*3+kx, Cin, Cout]
    # b1_ref:  (1, 64)               f32
    # w2_ref:  (9, 64, 128)          bf16
    # b2_ref:  (1, 128)              f32
    # o_ref:   (NBLK, H, W, 128)     f32
    # xp1/2:   (NBLK, H+2, W+2, C)   bf16 scratch (zero halo + interior)
    nblk, H, W, _ = x_ref.shape
    n_chunks = nblk // chunk_imgs
    m = chunk_imgs * H * W  # M rows per MXU matmul (~256)

    def clear_halo(xp, c):
        # Only the 1-pixel border needs zeroing; interiors are fully overwritten below.
        # Re-cleared every grid step: a pid==0-only clear is unsafe when the "parallel"
        # axis is sharded across TensorCores (v7x megacore).
        zrow = jnp.zeros((nblk, 1, W + 2, c), jnp.bfloat16)
        zcol = jnp.zeros((nblk, H + 2, 1, c), jnp.bfloat16)
        xp[:, 0:1, :, :] = zrow
        xp[:, H + 1:H + 2, :, :] = zrow
        xp[:, :, 0:1, :] = zcol
        xp[:, :, W + 1:W + 2, :] = zcol

    def conv3x3_chunk(xp, c0, w_ref, b_ref, c_in, c_out):
        # Accumulator starts at the broadcast bias (saves the separate bias add).
        acc = jnp.broadcast_to(b_ref[0], (m, c_out)).astype(jnp.float32)
        for ky in range(KH):
            # ky-slab hoist: one VMEM load per ky; kx taps slice the in-register slab.
            slab = xp[c0:c0 + chunk_imgs, ky:ky + H, :, :]
            for kx in range(KW):
                patch = slab[:, :, kx:kx + W, :].reshape(m, c_in)
                # bf16 x bf16 MXU matmul, f32 accumulation (MRB in-place accumulate on v7x).
                acc = acc + jnp.dot(patch, w_ref[ky * KW + kx],
                                    preferred_element_type=jnp.float32)
        # LeakyReLU(0.01) == max(x, 0.01*x) for 0 < slope < 1 (2 VALU ops, no select).
        return jnp.maximum(acc, NEG_SLOPE * acc)

    clear_halo(xp1_ref, C_IN)
    clear_halo(xp2_ref, C_MID)

    # ---- conv1 + LeakyReLU (per M-chunk), result staged into xp2 interior ----
    xp1_ref[:, 1:H + 1, 1:W + 1, :] = x_ref[...]
    for c in range(n_chunks):
        c0 = c * chunk_imgs
        h1 = conv3x3_chunk(xp1_ref, c0, w1_ref, b1_ref, C_IN, C_MID)
        xp2_ref[c0:c0 + chunk_imgs, 1:H + 1, 1:W + 1, :] = (
            h1.astype(jnp.bfloat16).reshape(chunk_imgs, H, W, C_MID))

    # ---- conv2 + LeakyReLU (per M-chunk) ----
    for c in range(n_chunks):
        c0 = c * chunk_imgs
        h2 = conv3x3_chunk(xp2_ref, c0, w2_ref, b2_ref, C_MID, C_OUT)
        o_ref[c0:c0 + chunk_imgs, :, :, :] = (
            h2.reshape(chunk_imgs, H, W, C_OUT).astype(o_ref.dtype))


def _choose_tiling(N, H, W):
    """Pick images-per-grid-step (nblk) and images-per-MXU-chunk (chunk)."""
    imgs_per_chunk = max(1, 256 // (H * W))          # M = chunk*H*W ~ 256 rows
    # Large blocks amortize the ~0.35us/step overhead; keep >= 4 grid steps when N
    # allows so v7x's 2 TensorCores each get >= 2 steps of pipelining.
    nblk = min(64, max(1, N // 4))
    # VMEM budget (v7x: 64 MiB physical / 32 MiB default scoped): double-buffered
    # bf16 input + f32 output blocks plus the two padded bf16 scratches per image.
    per_img = (2 * H * W * C_IN * 2 + 2 * H * W * C_OUT * 4
               + (H + 2) * (W + 2) * (C_IN + C_MID) * 2)
    nblk = min(nblk, max(1, (24 * 1024 * 1024) // per_img))
    if nblk >= imgs_per_chunk:
        nblk = (nblk // imgs_per_chunk) * imgs_per_chunk
        chunk = imgs_per_chunk
    else:
        chunk = nblk
    return nblk, chunk


@jax.jit
def integration_cell_forward_nhwc(x_nhwc, w1, b1, w2, b2):
    """Channels-last entry (no layout round-trips).

    x_nhwc: (B, T, H, W, 64) float.  Returns (B, T, H, W, 128) float32.
    """
    B, T, H, W, C = x_nhwc.shape
    assert C == C_IN
    N = B * T
    nblk, chunk = _choose_tiling(N, H, W)
    n_pad = (-N) % nblk
    n_total = N + n_pad
    # TODO(synk): for large H, W (>~64) switch to row-strip tiling (strip + 2-row halo)
    # so scratches fit v7x's scoped VMEM and the f32 accumulator stays <= 256 rows.

    xb = x_nhwc.reshape(N, H, W, C).astype(jnp.bfloat16)
    if n_pad:
        xb = jnp.concatenate([xb, jnp.zeros((n_pad, H, W, C), jnp.bfloat16)], axis=0)

    # PyTorch weight (Cout, Cin, kh, kw) -> (kh*kw, Cin, Cout), bf16 for the MXU.
    w1_k = jnp.transpose(w1, (2, 3, 1, 0)).reshape(KH * KW, C_IN, C_MID).astype(jnp.bfloat16)
    w2_k = jnp.transpose(w2, (2, 3, 1, 0)).reshape(KH * KW, C_MID, C_OUT).astype(jnp.bfloat16)
    b1_r = b1.reshape(1, C_MID).astype(jnp.float32)
    b2_r = b2.reshape(1, C_OUT).astype(jnp.float32)

    out = pl.pallas_call(
        partial(_integration_cell_kernel, chunk_imgs=chunk),
        out_shape=jax.ShapeDtypeStruct((n_total, H, W, C_OUT), jnp.float32),
        grid_spec=pltpu.PrefetchScalarGridSpec(
            num_scalar_prefetch=0,
            grid=(n_total // nblk,),
            in_specs=[
                pl.BlockSpec((nblk, H, W, C_IN), lambda n: (n, 0, 0, 0)),
                pl.BlockSpec((KH * KW, C_IN, C_MID), lambda n: (0, 0, 0)),
                pl.BlockSpec((1, C_MID), lambda n: (0, 0)),
                pl.BlockSpec((KH * KW, C_MID, C_OUT), lambda n: (0, 0, 0)),
                pl.BlockSpec((1, C_OUT), lambda n: (0, 0)),
            ],
            out_specs=pl.BlockSpec((nblk, H, W, C_OUT), lambda n: (n, 0, 0, 0)),
            scratch_shapes=[
                pltpu.VMEM((nblk, H + 2, W + 2, C_IN), jnp.bfloat16),
                pltpu.VMEM((nblk, H + 2, W + 2, C_MID), jnp.bfloat16),
            ],
        ),
        compiler_params=pltpu.CompilerParams(
            dimension_semantics=("parallel",),
            vmem_limit_bytes=32 * 1024 * 1024),
    )(xb, w1_k, b1_r, w2_k, b2_r)

    return out[:N].reshape(B, T, H, W, C_OUT)


@jax.jit
def integration_cell_forward(x, w1, b1, w2, b2):
    """PyTorch-layout entry: x (B, T, 64, H, W) f32 -> (B, T, 128, H, W) f32.

    The two transposes here are pure interface cost (full HBM round-trips); a
    channels-last pipeline should call integration_cell_forward_nhwc directly.
    """
    x_nhwc = jnp.transpose(x, (0, 1, 3, 4, 2))
    out_nhwc = integration_cell_forward_nhwc(x_nhwc, w1, b1, w2, b2)
    return jnp.transpose(out_nhwc, (0, 1, 4, 2, 3))


# ----------------------------- pure-JAX references -----------------------------

def _conv3x3_ref(inp, wk, b, cast_bf16):
    n, h, w, _ = inp.shape
    cout = wk.shape[-1]
    if cast_bf16:  # mimic the kernel's bf16 MXU operands (f32 accumulation)
        inp = inp.astype(jnp.bfloat16).astype(jnp.float32)
        wk = wk.astype(jnp.bfloat16).astype(jnp.float32)
    pad = jnp.pad(inp, ((0, 0), (1, 1), (1, 1), (0, 0)))
    acc = jnp.zeros((n, h, w, cout), jnp.float32)
    for ky in range(3):
        for kx in range(3):
            patch = pad[:, ky:ky + h, kx:kx + w, :]
            acc = acc + jnp.einsum('nhwc,cd->nhwd', patch, wk[ky, kx],
                                   precision=lax.Precision.HIGHEST)
    return acc + b


def reference_forward(x, w1, b1, w2, b2, *, bf16_inputs):
    B, T, C, H, W = x.shape
    N = B * T
    xh = jnp.transpose(x.reshape(N, C, H, W), (0, 2, 3, 1))
    w1_k = jnp.transpose(w1, (2, 3, 1, 0))
    w2_k = jnp.transpose(w2, (2, 3, 1, 0))
    h1 = _conv3x3_ref(xh, w1_k, b1, bf16_inputs)
    h1 = jnp.where(h1 > 0, h1, NEG_SLOPE * h1)
    h2 = _conv3x3_ref(h1, w2_k, b2, bf16_inputs)
    h2 = jnp.where(h2 > 0, h2, NEG_SLOPE * h2)
    return jnp.transpose(h2, (0, 3, 1, 2)).reshape(B, T, C_OUT, H, W)


if __name__ == "__main__":
    key = jax.random.PRNGKey(0)
    k_x, k_w1, k_b1, k_w2, k_b2 = jax.random.split(key, 5)

    B, T, H, W = 2, 4, 8, 8
    x = jax.random.normal(k_x, (B, T, C_IN, H, W), jnp.float32)

    # Deterministic synthetic parameters (same shapes as the nn.Conv2d layers).
    w1 = 0.05 * jax.random.normal(k_w1, (C_MID, C_IN, KH, KW), jnp.float32)
    b1 = 0.05 * jax.random.normal(k_b1, (C_MID,), jnp.float32)
    w2 = 0.05 * jax.random.normal(k_w2, (C_OUT, C_MID, KH, KW), jnp.float32)
    b2 = 0.05 * jax.random.normal(k_b2, (C_OUT,), jnp.float32)

    out = jax.block_until_ready(integration_cell_forward(x, w1, b1, w2, b2))
    assert out.shape == (B, T, C_OUT, H, W), out.shape

    # Primary check: same math as the kernel (bf16 operands, f32 accumulation).
    ref_bf16 = jax.block_until_ready(
        reference_forward(x, w1, b1, w2, b2, bf16_inputs=True))
    err = float(jnp.max(jnp.abs(out - ref_bf16)))
    assert jnp.allclose(out, ref_bf16, rtol=1e-3, atol=1e-3), err

    # Sanity check vs full-f32 PyTorch math (only bf16 rounding of MXU operands differs).
    ref_f32 = jax.block_until_ready(
        reference_forward(x, w1, b1, w2, b2, bf16_inputs=False))
    err32 = float(jnp.max(jnp.abs(out - ref_f32)))
    assert jnp.allclose(out, ref_f32, rtol=5e-2, atol=5e-2), err32

    print("KERNEL_OK")
</pallas_src>

<mosaic_0001>
module attributes {stable_mosaic.version = 11 : i64} {
  func.func @_integration_cell_kernel(%arg0: i32, %arg1: memref<2x8x8x64xbf16, #tpu.memory_space<vmem>>, %arg2: memref<9x64x64xbf16, #tpu.memory_space<vmem>>, %arg3: memref<1x64xf32, #tpu.memory_space<vmem>>, %arg4: memref<9x64x128xbf16, #tpu.memory_space<vmem>>, %arg5: memref<1x128xf32, #tpu.memory_space<vmem>>, %arg6: memref<2x8x8x128xf32, #tpu.memory_space<vmem>>, %arg7: memref<2x10x10x64xbf16, #tpu.memory_space<vmem>>, %arg8: memref<2x10x10x64xbf16, #tpu.memory_space<vmem>>) attributes {dimension_semantics = [#tpu.dimension_semantics<parallel>], iteration_bounds = array<i64: 4>, scalar_prefetch = 0 : i64, scratch_operands = 2 : i64, tpu.core_type = #tpu.core_type<tc>, window_params = [{transform_indices = @transform_0, window_bounds = array<i64: 2, 8, 8, 64>}, {pipeline_mode = #tpu.pipeline_mode<synchronous>, transform_indices = @transform_1, window_bounds = array<i64: 9, 64, 64>}, {pipeline_mode = #tpu.pipeline_mode<synchronous>, transform_indices = @transform_2, window_bounds = array<i64: 1, 64>}, {pipeline_mode = #tpu.pipeline_mode<synchronous>, transform_indices = @transform_3, window_bounds = array<i64: 9, 64, 128>}, {pipeline_mode = #tpu.pipeline_mode<synchronous>, transform_indices = @transform_4, window_bounds = array<i64: 1, 128>}, {transform_indices = @transform_5, window_bounds = array<i64: 2, 8, 8, 128>}]} {
    %cst = arith.constant 0.000000e+00 : bf16
    %0 = vector.broadcast %cst : bf16 to vector<2x1x10x64xbf16>
    %cst_0 = arith.constant 0.000000e+00 : bf16
    %1 = vector.broadcast %cst_0 : bf16 to vector<2x10x1x64xbf16>
    %c0 = arith.constant 0 : index
    %c0_1 = arith.constant 0 : index
    %c0_2 = arith.constant 0 : index
    %c0_3 = arith.constant 0 : index
    %2 = vector.load %arg7[%c0, %c0_1, %c0_2, %c0_3] : memref<2x10x10x64xbf16, #tpu.memory_space<vmem>>, vector<2x1x10x64xbf16>
    tpu.vector_store %arg7[%c0, %c0_1, %c0_2, %c0_3], %0 {strides = array<i32>} : memref<2x10x10x64xbf16, #tpu.memory_space<vmem>>, vector<2x1x10x64xbf16>,
    %c0_4 = arith.constant 0 : index
    %c9 = arith.constant 9 : index
    %c0_5 = arith.constant 0 : index
    %c0_6 = arith.constant 0 : index
    %3 = vector.load %arg7[%c0_4, %c9, %c0_5, %c0_6] : memref<2x10x10x64xbf16, #tpu.memory_space<vmem>>, vector<2x1x10x64xbf16>
    tpu.vector_store %arg7[%c0_4, %c9, %c0_5, %c0_6], %0 {strides = array<i32>} : memref<2x10x10x64xbf16, #tpu.memory_space<vmem>>, vector<2x1x10x64xbf16>,
    %c0_7 = arith.constant 0 : index
    %c0_8 = arith.constant 0 : index
    %c0_9 = arith.constant 0 : index
    %c0_10 = arith.constant 0 : index
    %4 = vector.load %arg7[%c0_7, %c0_8, %c0_9, %c0_10] : memref<2x10x10x64xbf16, #tpu.memory_space<vmem>>, vector<2x10x1x64xbf16>
    tpu.vector_store %arg7[%c0_7, %c0_8, %c0_9, %c0_10], %1 {strides = array<i32>} : memref<2x10x10x64xbf16, #tpu.memory_space<vmem>>, vector<2x10x1x64xbf16>,
    %c0_11 = arith.constant 0 : index
    %c0_12 = arith.constant 0 : index
    %c9_13 = arith.constant 9 : index
    %c0_14 = arith.constant 0 : index
    %5 = vector.load %arg7[%c0_11, %c0_12, %c9_13, %c0_14] : memref<2x10x10x64xbf16, #tpu.memory_space<vmem>>, vector<2x10x1x64xbf16>
    tpu.vector_store %arg7[%c0_11, %c0_12, %c9_13, %c0_14], %1 {strides = array<i32>} : memref<2x10x10x64xbf16, #tpu.memory_space<vmem>>, vector<2x10x1x64xbf16>,
    %cst_15 = arith.constant 0.000000e+00 : bf16
    %6 = vector.broadcast %cst_15 : bf16 to vector<2x1x10x64xbf16>
    %cst_16 = arith.constant 0.000000e+00 : bf16
    %7 = vector.broadcast %cst_16 : bf16 to vector<2x10x1x64xbf16>
    %c0_17 = arith.constant 0 : index
    %c0_18 = arith.constant 0 : index
    %c0_19 = arith.constant 0 : index
    %c0_20 = arith.constant 0 : index
    %8 = vector.load %arg8[%c0_17, %c0_18, %c0_19, %c0_20] : memref<2x10x10x64xbf16, #tpu.memory_space<vmem>>, vector<2x1x10x64xbf16>
    tpu.vector_store %arg8[%c0_17, %c0_18, %c0_19, %c0_20], %6 {strides = array<i32>} : memref<2x10x10x64xbf16, #tpu.memory_space<vmem>>, vector<2x1x10x64xbf16>,
    %c0_21 = arith.constant 0 : index
    %c9_22 = arith.constant 9 : index
    %c0_23 = arith.constant 0 : index
    %c0_24 = arith.constant 0 : index
    %9 = vector.load %arg8[%c0_21, %c9_22, %c0_23, %c0_24] : memref<2x10x10x64xbf16, #tpu.memory_space<vmem>>, vector<2x1x10x64xbf16>
    tpu.vector_store %arg8[%c0_21, %c9_22, %c0_23, %c0_24], %6 {strides = array<i32>} : memref<2x10x10x64xbf16, #tpu.memory_space<vmem>>, vector<2x1x10x64xbf16>,
    %c0_25 = arith.constant 0 : index
    %c0_26 = arith.constant 0 : index
    %c0_27 = arith.constant 0 : index
    %c0_28 = arith.constant 0 : index
    %10 = vector.load %arg8[%c0_25, %c0_26, %c0_27, %c0_28] : memref<2x10x10x64xbf16, #tpu.memory_space<vmem>>, vector<2x10x1x64xbf16>
    tpu.vector_store %arg8[%c0_25, %c0_26, %c0_27, %c0_28], %7 {strides = array<i32>} : memref<2x10x10x64xbf16, #tpu.memory_space<vmem>>, vector<2x10x1x64xbf16>,
    %c0_29 = arith.constant 0 : index
    %c0_30 = arith.constant 0 : index
    %c9_31 = arith.constant 9 : index
    %c0_32 = arith.constant 0 : index
    %11 = vector.load %arg8[%c0_29, %c0_30, %c9_31, %c0_32] : memref<2x10x10x64xbf16, #tpu.memory_space<vmem>>, vector<2x10x1x64xbf16>
    tpu.vector_store %arg8[%c0_29, %c0_30, %c9_31, %c0_32], %7 {strides = array<i32>} : memref<2x10x10x64xbf16, #tpu.memory_space<vmem>>, vector<2x10x1x64xbf16>,
    %c0_33 = arith.constant 0 : index
    %c0_34 = arith.constant 0 : index
    %c0_35 = arith.constant 0 : index
    %c0_36 = arith.constant 0 : index
    %12 = vector.load %arg1[%c0_33, %c0_34, %c0_35, %c0_36] : memref<2x8x8x64xbf16, #tpu.memory_space<vmem>>, vector<2x8x8x64xbf16>
    %c0_37 = arith.constant 0 : index
    %c1 = arith.constant 1 : index
    %c1_38 = arith.constant 1 : index
    %c0_39 = arith.constant 0 : index
    %13 = vector.load %arg7[%c0_37, %c1, %c1_38, %c0_39] : memref<2x10x10x64xbf16, #tpu.memory_space<vmem>>, vector<2x8x8x64xbf16>
    tpu.vector_store %arg7[%c0_37, %c1, %c1_38, %c0_39], %12 {strides = array<i32>} : memref<2x10x10x64xbf16, #tpu.memory_space<vmem>>, vector<2x8x8x64xbf16>,
    %c0_40 = arith.constant 0 : index
    %c0_41 = arith.constant 0 : index
    %14 = vector.load %arg3[%c0_40, %c0_41] : memref<1x64xf32, #tpu.memory_space<vmem>>, vector<1x64xf32>
    %15 = vector.shape_cast %14 : vector<1x64xf32> to vector<64xf32>
    %16 = vector.shape_cast %15 : vector<64xf32> to vector<1x64xf32>
    %17 = vector.broadcast %16 : vector<1x64xf32> to vector<128x64xf32>
    %c0_42 = arith.constant 0 : index
    %c0_43 = arith.constant 0 : index
    %c0_44 = arith.constant 0 : index
    %c0_45 = arith.constant 0 : index
    %18 = vector.load %arg7[%c0_42, %c0_43, %c0_44, %c0_45] : memref<2x10x10x64xbf16, #tpu.memory_space<vmem>>, vector<2x8x10x64xbf16>
    %19 = vector.extract_strided_slice %18 {offsets = [0, 0, 0, 0], sizes = [2, 8, 8, 64], strides = [1, 1, 1, 1]} : vector<2x8x10x64xbf16> to vector<2x8x8x64xbf16>
    %20 = vector.shape_cast %19 : vector<2x8x8x64xbf16> to vector<128x64xbf16>
    %c0_46 = arith.constant 0 : index
    %c0_47 = arith.constant 0 : index
    %c0_48 = arith.constant 0 : index
    %21 = vector.load %arg2[%c0_46, %c0_47, %c0_48] : memref<9x64x64xbf16, #tpu.memory_space<vmem>>, vector<1x64x64xbf16>
    %22 = vector.shape_cast %21 : vector<1x64x64xbf16> to vector<64x64xbf16>
    %cst_49 = arith.constant dense<0.000000e+00> : vector<128x64xf32>
    %23 = tpu.matmul %20, %22, %cst_49 {dimension_numbers = #tpu.dot_dimension_numbers<[1], [0], [0], [1], [0, 0, 1, 1], [], []>} : vector<128x64xbf16>, vector<64x64xbf16>, vector<128x64xf32> -> vector<128x64xf32>
    %24 = arith.addf %17, %23 : vector<128x64xf32>
    %25 = vector.extract_strided_slice %18 {offsets = [0, 0, 1, 0], sizes = [2, 8, 8, 64], strides = [1, 1, 1, 1]} : vector<2x8x10x64xbf16> to vector<2x8x8x64xbf16>
    %26 = vector.shape_cast %25 : vector<2x8x8x64xbf16> to vector<128x64xbf16>
    %c1_50 = arith.constant 1 : index
    %c0_51 = arith.constant 0 : index
    %c0_52 = arith.constant 0 : index
    %27 = vector.load %arg2[%c1_50, %c0_51, %c0_52] : memref<9x64x64xbf16, #tpu.memory_space<vmem>>, vector<1x64x64xbf16>
    %28 = vector.shape_cast %27 : vector<1x64x64xbf16> to vector<64x64xbf16>
    %cst_53 = arith.constant dense<0.000000e+00> : vector<128x64xf32>
    %29 = tpu.matmul %26, %28, %cst_53 {dimension_numbers = #tpu.dot_dimension_numbers<[1], [0], [0], [1], [0, 0, 1, 1], [], []>} : vector<128x64xbf16>, vector<64x64xbf16>, vector<128x64xf32> -> vector<128x64xf32>
    %30 = arith.addf %24, %29 : vector<128x64xf32>
    %31 = vector.extract_strided_slice %18 {offsets = [0, 0, 2, 0], sizes = [2, 8, 8, 64], strides = [1, 1, 1, 1]} : vector<2x8x10x64xbf16> to vector<2x8x8x64xbf16>
    %32 = vector.shape_cast %31 : vector<2x8x8x64xbf16> to vector<128x64xbf16>
    %c2 = arith.constant 2 : index
    %c0_54 = arith.constant 0 : index
    %c0_55 = arith.constant 0 : index
    %33 = vector.load %arg2[%c2, %c0_54, %c0_55] : memref<9x64x64xbf16, #tpu.memory_space<vmem>>, vector<1x64x64xbf16>
    %34 = vector.shape_cast %33 : vector<1x64x64xbf16> to vector<64x64xbf16>
    %cst_56 = arith.constant dense<0.000000e+00> : vector<128x64xf32>
    %35 = tpu.matmul %32, %34, %cst_56 {dimension_numbers = #tpu.dot_dimension_numbers<[1], [0], [0], [1], [0, 0, 1, 1], [], []>} : vector<128x64xbf16>, vector<64x64xbf16>, vector<128x64xf32> -> vector<128x64xf32>
    %36 = arith.addf %30, %35 : vector<128x64xf32>
    %c0_57 = arith.constant 0 : index
    %c1_58 = arith.constant 1 : index
    %c0_59 = arith.constant 0 : index
    %c0_60 = arith.constant 0 : index
    %37 = vector.load %arg7[%c0_57, %c1_58, %c0_59, %c0_60] : memref<2x10x10x64xbf16, #tpu.memory_space<vmem>>, vector<2x8x10x64xbf16>
    %38 = vector.extract_strided_slice %37 {offsets = [0, 0, 0, 0], sizes = [2, 8, 8, 64], strides = [1, 1, 1, 1]} : vector<2x8x10x64xbf16> to vector<2x8x8x64xbf16>
    %39 = vector.shape_cast %38 : vector<2x8x8x64xbf16> to vector<128x64xbf16>
    %c3 = arith.constant 3 : index
    %c0_61 = arith.constant 0 : index
    %c0_62 = arith.constant 0 : index
    %40 = vector.load %arg2[%c3, %c0_61, %c0_62] : memref<9x64x64xbf16, #tpu.memory_space<vmem>>, vector<1x64x64xbf16>
    %41 = vector.shape_cast %40 : vector<1x64x64xbf16> to vector<64x64xbf16>
    %cst_63 = arith.constant dense<0.000000e+00> : vector<128x64xf32>
    %42 = tpu.matmul %39, %41, %cst_63 {dimension_numbers = #tpu.dot_dimension_numbers<[1], [0], [0], [1], [0, 0, 1, 1], [], []>} : vector<128x64xbf16>, vector<64x64xbf16>, vector<128x64xf32> -> vector<128x64xf32>
    %43 = arith.addf %36, %42 : vector<128x64xf32>
    %44 = vector.extract_strided_slice %37 {offsets = [0, 0, 1, 0], sizes = [2, 8, 8, 64], strides = [1, 1, 1, 1]} : vector<2x8x10x64xbf16> to vector<2x8x8x64xbf16>
    %45 = vector.shape_cast %44 : vector<2x8x8x64xbf16> to vector<128x64xbf16>
    %c4 = arith.constant 4 : index
    %c0_64 = arith.constant 0 : index
    %c0_65 = arith.constant 0 : index
    %46 = vector.load %arg2[%c4, %c0_64, %c0_65] : memref<9x64x64xbf16, #tpu.memory_space<vmem>>, vector<1x64x64xbf16>
    %47 = vector.shape_cast %46 : vector<1x64x64xbf16> to vector<64x64xbf16>
    %cst_66 = arith.constant dense<0.000000e+00> : vector<128x64xf32>
    %48 = tpu.matmul %45, %47, %cst_66 {dimension_numbers = #tpu.dot_dimension_numbers<[1], [0], [0], [1], [0, 0, 1, 1], [], []>} : vector<128x64xbf16>, vector<64x64xbf16>, vector<128x64xf32> -> vector<128x64xf32>
    %49 = arith.addf %43, %48 : vector<128x64xf32>
    %50 = vector.extract_strided_slice %37 {offsets = [0, 0, 2, 0], sizes = [2, 8, 8, 64], strides = [1, 1, 1, 1]} : vector<2x8x10x64xbf16> to vector<2x8x8x64xbf16>
    %51 = vector.shape_cast %50 : vector<2x8x8x64xbf16> to vector<128x64xbf16>
    %c5 = arith.constant 5 : index
    %c0_67 = arith.constant 0 : index
    %c0_68 = arith.constant 0 : index
    %52 = vector.load %arg2[%c5, %c0_67, %c0_68] : memref<9x64x64xbf16, #tpu.memory_space<vmem>>, vector<1x64x64xbf16>
    %53 = vector.shape_cast %52 : vector<1x64x64xbf16> to vector<64x64xbf16>
    %cst_69 = arith.constant dense<0.000000e+00> : vector<128x64xf32>
    %54 = tpu.matmul %51, %53, %cst_69 {dimension_numbers = #tpu.dot_dimension_numbers<[1], [0], [0], [1], [0, 0, 1, 1], [], []>} : vector<128x64xbf16>, vector<64x64xbf16>, vector<128x64xf32> -> vector<128x64xf32>
    %55 = arith.addf %49, %54 : vector<128x64xf32>
    %c0_70 = arith.constant 0 : index
    %c2_71 = arith.constant 2 : index
    %c0_72 = arith.constant 0 : index
    %c0_73 = arith.constant 0 : index
    %56 = vector.load %arg7[%c0_70, %c2_71, %c0_72, %c0_73] : memref<2x10x10x64xbf16, #tpu.memory_space<vmem>>, vector<2x8x10x64xbf16>
    %57 = vector.extract_strided_slice %56 {offsets = [0, 0, 0, 0], sizes = [2, 8, 8, 64], strides = [1, 1, 1, 1]} : vector<2x8x10x64xbf16> to vector<2x8x8x64xbf16>
    %58 = vector.shape_cast %57 : vector<2x8x8x64xbf16> to vector<128x64xbf16>
    %c6 = arith.constant 6 : index
    %c0_74 = arith.constant 0 : index
    %c0_75 = arith.constant 0 : index
    %59 = vector.load %arg2[%c6, %c0_74, %c0_75] : memref<9x64x64xbf16, #tpu.memory_space<vmem>>, vector<1x64x64xbf16>
    %60 = vector.shape_cast %59 : vector<1x64x64xbf16> to vector<64x64xbf16>
    %cst_76 = arith.constant dense<0.000000e+00> : vector<128x64xf32>
    %61 = tpu.matmul %58, %60, %cst_76 {dimension_numbers = #tpu.dot_dimension_numbers<[1], [0], [0], [1], [0, 0, 1, 1], [], []>} : vector<128x64xbf16>, vector<64x64xbf16>, vector<128x64xf32> -> vector<128x64xf32>
    %62 = arith.addf %55, %61 : vector<128x64xf32>
    %63 = vector.extract_strided_slice %56 {offsets = [0, 0, 1, 0], sizes = [2, 8, 8, 64], strides = [1, 1, 1, 1]} : vector<2x8x10x64xbf16> to vector<2x8x8x64xbf16>
    %64 = vector.shape_cast %63 : vector<2x8x8x64xbf16> to vector<128x64xbf16>
    %c7 = arith.constant 7 : index
    %c0_77 = arith.constant 0 : index
    %c0_78 = arith.constant 0 : index
    %65 = vector.load %arg2[%c7, %c0_77, %c0_78] : memref<9x64x64xbf16, #tpu.memory_space<vmem>>, vector<1x64x64xbf16>
    %66 = vector.shape_cast %65 : vector<1x64x64xbf16> to vector<64x64xbf16>
    %cst_79 = arith.constant dense<0.000000e+00> : vector<128x64xf32>
    %67 = tpu.matmul %64, %66, %cst_79 {dimension_numbers = #tpu.dot_dimension_numbers<[1], [0], [0], [1], [0, 0, 1, 1], [], []>} : vector<128x64xbf16>, vector<64x64xbf16>, vector<128x64xf32> -> vector<128x64xf32>
    %68 = arith.addf %62, %67 : vector<128x64xf32>
    %69 = vector.extract_strided_slice %56 {offsets = [0, 0, 2, 0], sizes = [2, 8, 8, 64], strides = [1, 1, 1, 1]} : vector<2x8x10x64xbf16> to vector<2x8x8x64xbf16>
    %70 = vector.shape_cast %69 : vector<2x8x8x64xbf16> to vector<128x64xbf16>
    %c8 = arith.constant 8 : index
    %c0_80 = arith.constant 0 : index
    %c0_81 = arith.constant 0 : index
    %71 = vector.load %arg2[%c8, %c0_80, %c0_81] : memref<9x64x64xbf16, #tpu.memory_space<vmem>>, vector<1x64x64xbf16>
    %72 = vector.shape_cast %71 : vector<1x64x64xbf16> to vector<64x64xbf16>
    %cst_82 = arith.constant dense<0.000000e+00> : vector<128x64xf32>
    %73 = tpu.matmul %70, %72, %cst_82 {dimension_numbers = #tpu.dot_dimension_numbers<[1], [0], [0], [1], [0, 0, 1, 1], [], []>} : vector<128x64xbf16>, vector<64x64xbf16>, vector<128x64xf32> -> vector<128x64xf32>
    %74 = arith.addf %68, %73 : vector<128x64xf32>
    %cst_83 = arith.constant 0.00999999977 : f32
    %75 = vector.broadcast %cst_83 : f32 to vector<128x64xf32>
    %76 = arith.mulf %75, %74 : vector<128x64xf32>
    %77 = arith.maximumf %74, %76 : vector<128x64xf32>
    %78 = arith.truncf %77 : vector<128x64xf32> to vector<128x64xbf16>
    %79 = vector.shape_cast %78 : vector<128x64xbf16> to vector<2x8x8x64xbf16>
    %c0_84 = arith.constant 0 : index
    %c1_85 = arith.constant 1 : index
    %c1_86 = arith.constant 1 : index
    %c0_87 = arith.constant 0 : index
    %80 = vector.load %arg8[%c0_84, %c1_85, %c1_86, %c0_87] : memref<2x10x10x64xbf16, #tpu.memory_space<vmem>>, vector<2x8x8x64xbf16>
    tpu.vector_store %arg8[%c0_84, %c1_85, %c1_86, %c0_87], %79 {strides = array<i32>} : memref<2x10x10x64xbf16, #tpu.memory_space<vmem>>, vector<2x8x8x64xbf16>,
    %c0_88 = arith.constant 0 : index
    %c0_89 = arith.constant 0 : index
    %81 = vector.load %arg5[%c0_88, %c0_89] : memref<1x128xf32, #tpu.memory_space<vmem>>, vector<1x128xf32>
    %82 = vector.shape_cast %81 : vector<1x128xf32> to vector<128xf32>
    %83 = vector.shape_cast %82 : vector<128xf32> to vector<1x128xf32>
    %84 = vector.broadcast %83 : vector<1x128xf32> to vector<128x128xf32>
    %c0_90 = arith.constant 0 : index
    %c0_91 = arith.constant 0 : index
    %c0_92 = arith.constant 0 : index
    %c0_93 = arith.constant 0 : index
    %85 = vector.load %arg8[%c0_90, %c0_91, %c0_92, %c0_93] : memref<2x10x10x64xbf16, #tpu.memory_space<vmem>>, vector<2x8x10x64xbf16>
    %86 = vector.extract_strided_slice %85 {offsets = [0, 0, 0, 0], sizes = [2, 8, 8, 64], strides = [1, 1, 1, 1]} : vector<2x8x10x64xbf16> to vector<2x8x8x64xbf16>
    %87 = vector.shape_cast %86 : vector<2x8x8x64xbf16> to vector<128x64xbf16>
    %c0_94 = arith.constant 0 : index
    %c0_95 = arith.constant 0 : index
    %c0_96 = arith.constant 0 : index
    %88 = vector.load %arg4[%c0_94, %c0_95, %c0_96] : memref<9x64x128xbf16, #tpu.memory_space<vmem>>, vector<1x64x128xbf16>
    %89 = vector.shape_cast %88 : vector<1x64x128xbf16> to vector<64x128xbf16>
    %cst_97 = arith.constant dense<0.000000e+00> : vector<128x128xf32>
    %90 = tpu.matmul %87, %89, %cst_97 {dimension_numbers = #tpu.dot_dimension_numbers<[1], [0], [0], [1], [0, 0, 1, 1], [], []>} : vector<128x64xbf16>, vector<64x128xbf16>, vector<128x128xf32> -> vector<128x128xf32>
    %91 = arith.addf %84, %90 : vector<128x128xf32>
    %92 = vector.extract_strided_slice %85 {offsets = [0, 0, 1, 0], sizes = [2, 8, 8, 64], strides = [1, 1, 1, 1]} : vector<2x8x10x64xbf16> to vector<2x8x8x64xbf16>
    %93 = vector.shape_cast %92 : vector<2x8x8x64xbf16> to vector<128x64xbf16>
    %c1_98 = arith.constant 1 : index
    %c0_99 = arith.constant 0 : index
    %c0_100 = arith.constant 0 : index
    %94 = vector.load %arg4[%c1_98, %c0_99, %c0_100] : memref<9x64x128xbf16, #tpu.memory_space<vmem>>, vector<1x64x128xbf16>
    %95 = vector.shape_cast %94 : vector<1x64x128xbf16> to vector<64x128xbf16>
    %cst_101 = arith.constant dense<0.000000e+00> : vector<128x128xf32>
    %96 = tpu.matmul %93, %95, %cst_101 {dimension_numbers = #tpu.dot_dimension_numbers<[1], [0], [0], [1], [0, 0, 1, 1], [], []>} : vector<128x64xbf16>, vector<64x128xbf16>, vector<128x128xf32> -> vector<128x128xf32>
    %97 = arith.addf %91, %96 : vector<128x128xf32>
    %98 = vector.extract_strided_slice %85 {offsets = [0, 0, 2, 0], sizes = [2, 8, 8, 64], strides = [1, 1, 1, 1]} : vector<2x8x10x64xbf16> to vector<2x8x8x64xbf16>
    %99 = vector.shape_cast %98 : vector<2x8x8x64xbf16> to vector<128x64xbf16>
    %c2_102 = arith.constant 2 : index
    %c0_103 = arith.constant 0 : index
    %c0_104 = arith.constant 0 : index
    %100 = vector.load %arg4[%c2_102, %c0_103, %c0_104] : memref<9x64x128xbf16, #tpu.memory_space<vmem>>, vector<1x64x128xbf16>
    %101 = vector.shape_cast %100 : vector<1x64x128xbf16> to vector<64x128xbf16>
    %cst_105 = arith.constant dense<0.000000e+00> : vector<128x128xf32>
    %102 = tpu.matmul %99, %101, %cst_105 {dimension_numbers = #tpu.dot_dimension_numbers<[1], [0], [0], [1], [0, 0, 1, 1], [], []>} : vector<128x64xbf16>, vector<64x128xbf16>, vector<128x128xf32> -> vector<128x128xf32>
    %103 = arith.addf %97, %102 : vector<128x128xf32>
    %c0_106 = arith.constant 0 : index
    %c1_107 = arith.constant 1 : index
    %c0_108 = arith.constant 0 : index
    %c0_109 = arith.constant 0 : index
    %104 = vector.load %arg8[%c0_106, %c1_107, %c0_108, %c0_109] : memref<2x10x10x64xbf16, #tpu.memory_space<vmem>>, vector<2x8x10x64xbf16>
    %105 = vector.extract_strided_slice %104 {offsets = [0, 0, 0, 0], sizes = [2, 8, 8, 64], strides = [1, 1, 1, 1]} : vector<2x8x10x64xbf16> to vector<2x8x8x64xbf16>
    %106 = vector.shape_cast %105 : vector<2x8x8x64xbf16> to vector<128x64xbf16>
    %c3_110 = arith.constant 3 : index
    %c0_111 = arith.constant 0 : index
    %c0_112 = arith.constant 0 : index
    %107 = vector.load %arg4[%c3_110, %c0_111, %c0_112] : memref<9x64x128xbf16, #tpu.memory_space<vmem>>, vector<1x64x128xbf16>
    %108 = vector.shape_cast %107 : vector<1x64x128xbf16> to vector<64x128xbf16>
    %cst_113 = arith.constant dense<0.000000e+00> : vector<128x128xf32>
    %109 = tpu.matmul %106, %108, %cst_113 {dimension_numbers = #tpu.dot_dimension_numbers<[1], [0], [0], [1], [0, 0, 1, 1], [], []>} : vector<128x64xbf16>, vector<64x128xbf16>, vector<128x128xf32> -> vector<128x128xf32>
    %110 = arith.addf %103, %109 : vector<128x128xf32>
    %111 = vector.extract_strided_slice %104 {offsets = [0, 0, 1, 0], sizes = [2, 8, 8, 64], strides = [1, 1, 1, 1]} : vector<2x8x10x64xbf16> to vector<2x8x8x64xbf16>
    %112 = vector.shape_cast %111 : vector<2x8x8x64xbf16> to vector<128x64xbf16>
    %c4_114 = arith.constant 4 : index
    %c0_115 = arith.constant 0 : index
    %c0_116 = arith.constant 0 : index
    %113 = vector.load %arg4[%c4_114, %c0_115, %c0_116] : memref<9x64x128xbf16, #tpu.memory_space<vmem>>, vector<1x64x128xbf16>
    %114 = vector.shape_cast %113 : vector<1x64x128xbf16> to vector<64x128xbf16>
    %cst_117 = arith.constant dense<0.000000e+00> : vector<128x128xf32>
    %115 = tpu.matmul %112, %114, %cst_117 {dimension_numbers = #tpu.dot_dimension_numbers<[1], [0], [0], [1], [0, 0, 1, 1], [], []>} : vector<128x64xbf16>, vector<64x128xbf16>, vector<128x128xf32> -> vector<128x128xf32>
    %116 = arith.addf %110, %115 : vector<128x128xf32>
    %117 = vector.extract_strided_slice %104 {offsets = [0, 0, 2, 0], sizes = [2, 8, 8, 64], strides = [1, 1, 1, 1]} : vector<2x8x10x64xbf16> to vector<2x8x8x64xbf16>
    %118 = vector.shape_cast %117 : vector<2x8x8x64xbf16> to vector<128x64xbf16>
    %c5_118 = arith.constant 5 : index
    %c0_119 = arith.constant 0 : index
    %c0_120 = arith.constant 0 : index
    %119 = vector.load %arg4[%c5_118, %c0_119, %c0_120] : memref<9x64x128xbf16, #tpu.memory_space<vmem>>, vector<1x64x128xbf16>
    %120 = vector.shape_cast %119 : vector<1x64x128xbf16> to vector<64x128xbf16>
    %cst_121 = arith.constant dense<0.000000e+00> : vector<128x128xf32>
    %121 = tpu.matmul %118, %120, %cst_121 {dimension_numbers = #tpu.dot_dimension_numbers<[1], [0], [0], [1], [0, 0, 1, 1], [], []>} : vector<128x64xbf16>, vector<64x128xbf16>, vector<128x128xf32> -> vector<128x128xf32>
    %122 = arith.addf %116, %121 : vector<128x128xf32>
    %c0_122 = arith.constant 0 : index
    %c2_123 = arith.constant 2 : index
    %c0_124 = arith.constant 0 : index
    %c0_125 = arith.constant 0 : index
    %123 = vector.load %arg8[%c0_122, %c2_123, %c0_124, %c0_125] : memref<2x10x10x64xbf16, #tpu.memory_space<vmem>>, vector<2x8x10x64xbf16>
    %124 = vector.extract_strided_slice %123 {offsets = [0, 0, 0, 0], sizes = [2, 8, 8, 64], strides = [1, 1, 1, 1]} : vector<2x8x10x64xbf16> to vector<2x8x8x64xbf16>
    %125 = vector.shape_cast %124 : vector<2x8x8x64xbf16> to vector<128x64xbf16>
    %c6_126 = arith.constant 6 : index
    %c0_127 = arith.constant 0 : index
    %c0_128 = arith.constant 0 : index
    %126 = vector.load %arg4[%c6_126, %c0_127, %c0_128] : memref<9x64x128xbf16, #tpu.memory_space<vmem>>, vector<1x64x128xbf16>
    %127 = vector.shape_cast %126 : vector<1x64x128xbf16> to vector<64x128xbf16>
    %cst_129 = arith.constant dense<0.000000e+00> : vector<128x128xf32>
    %128 = tpu.matmul %125, %127, %cst_129 {dimension_numbers = #tpu.dot_dimension_numbers<[1], [0], [0], [1], [0, 0, 1, 1], [], []>} : vector<128x64xbf16>, vector<64x128xbf16>, vector<128x128xf32> -> vector<128x128xf32>
    %129 = arith.addf %122, %128 : vector<128x128xf32>
    %130 = vector.extract_strided_slice %123 {offsets = [0, 0, 1, 0], sizes = [2, 8, 8, 64], strides = [1, 1, 1, 1]} : vector<2x8x10x64xbf16> to vector<2x8x8x64xbf16>
    %131 = vector.shape_cast %130 : vector<2x8x8x64xbf16> to vector<128x64xbf16>
    %c7_130 = arith.constant 7 : index
    %c0_131 = arith.constant 0 : index
    %c0_132 = arith.constant 0 : index
    %132 = vector.load %arg4[%c7_130, %c0_131, %c0_132] : memref<9x64x128xbf16, #tpu.memory_space<vmem>>, vector<1x64x128xbf16>
    %133 = vector.shape_cast %132 : vector<1x64x128xbf16> to vector<64x128xbf16>
    %cst_133 = arith.constant dense<0.000000e+00> : vector<128x128xf32>
    %134 = tpu.matmul %131, %133, %cst_133 {dimension_numbers = #tpu.dot_dimension_numbers<[1], [0], [0], [1], [0, 0, 1, 1], [], []>} : vector<128x64xbf16>, vector<64x128xbf16>, vector<128x128xf32> -> vector<128x128xf32>
    %135 = arith.addf %129, %134 : vector<128x128xf32>
    %136 = vector.extract_strided_slice %123 {offsets = [0, 0, 2, 0], sizes = [2, 8, 8, 64], strides = [1, 1, 1, 1]} : vector<2x8x10x64xbf16> to vector<2x8x8x64xbf16>
    %137 = vector.shape_cast %136 : vector<2x8x8x64xbf16> to vector<128x64xbf16>
    %c8_134 = arith.constant 8 : index
    %c0_135 = arith.constant 0 : index
    %c0_136 = arith.constant 0 : index
    %138 = vector.load %arg4[%c8_134, %c0_135, %c0_136] : memref<9x64x128xbf16, #tpu.memory_space<vmem>>, vector<1x64x128xbf16>
    %139 = vector.shape_cast %138 : vector<1x64x128xbf16> to vector<64x128xbf16>
    %cst_137 = arith.constant dense<0.000000e+00> : vector<128x128xf32>
    %140 = tpu.matmul %137, %139, %cst_137 {dimension_numbers = #tpu.dot_dimension_numbers<[1], [0], [0], [1], [0, 0, 1, 1], [], []>} : vector<128x64xbf16>, vector<64x128xbf16>, vector<128x128xf32> -> vector<128x128xf32>
    %141 = arith.addf %135, %140 : vector<128x128xf32>
    %cst_138 = arith.constant 0.00999999977 : f32
    %142 = vector.broadcast %cst_138 : f32 to vector<128x128xf32>
    %143 = arith.mulf %142, %141 : vector<128x128xf32>
    %144 = arith.maximumf %141, %143 : vector<128x128xf32>
    %145 = vector.shape_cast %144 : vector<128x128xf32> to vector<2x8x8x128xf32>
    %c0_139 = arith.constant 0 : index
    %c0_140 = arith.constant 0 : index
    %c0_141 = arith.constant 0 : index
    %c0_142 = arith.constant 0 : index
    %146 = vector.load %arg6[%c0_139, %c0_140, %c0_141, %c0_142] : memref<2x8x8x128xf32, #tpu.memory_space<vmem>>, vector<2x8x8x128xf32>
    tpu.vector_store %arg6[%c0_139, %c0_140, %c0_141, %c0_142], %145 {strides = array<i32>} : memref<2x8x8x128xf32, #tpu.memory_space<vmem>>, vector<2x8x8x128xf32>,
    return
  }
  func.func @transform_0(%arg0: i32) -> (i32, i32, i32, i32) {
    %c0_i32 = arith.constant 0 : i32
    %c0_i32_0 = arith.constant 0 : i32
    %c0_i32_1 = arith.constant 0 : i32
    %c0_i32_2 = arith.constant 0 : i32
    return %arg0, %c0_i32, %c0_i32_0, %c0_i32_1 : i32, i32, i32, i32
  }
  func.func @transform_1(%arg0: i32) -> (i32, i32, i32) {
    %c0_i32 = arith.constant 0 : i32
    %c0_i32_0 = arith.constant 0 : i32
    %c0_i32_1 = arith.constant 0 : i32
    %c0_i32_2 = arith.constant 0 : i32
    return %c0_i32, %c0_i32_0, %c0_i32_1 : i32, i32, i32
  }
  func.func @transform_2(%arg0: i32) -> (i32, i32) {
    %c0_i32 = arith.constant 0 : i32
    %c0_i32_0 = arith.constant 0 : i32
    %c0_i32_1 = arith.constant 0 : i32
    return %c0_i32, %c0_i32_0 : i32, i32
  }
  func.func @transform_3(%arg0: i32) -> (i32, i32, i32) {
    %c0_i32 = arith.constant 0 : i32
    %c0_i32_0 = arith.constant 0 : i32
    %c0_i32_1 = arith.constant 0 : i32
    %c0_i32_2 = arith.constant 0 : i32
    return %c0_i32, %c0_i32_0, %c0_i32_1 : i32, i32, i32
  }
  func.func @transform_4(%arg0: i32) -> (i32, i32) {
    %c0_i32 = arith.constant 0 : i32
    %c0_i32_0 = arith.constant 0 : i32
    %c0_i32_1 = arith.constant 0 : i32
    return %c0_i32, %c0_i32_0 : i32, i32
  }
  func.func @transform_5(%arg0: i32) -> (i32, i32, i32, i32) {
    %c0_i32 = arith.constant 0 : i32
    %c0_i32_0 = arith.constant 0 : i32
    %c0_i32_1 = arith.constant 0 : i32
    %c0_i32_2 = arith.constant 0 : i32
    return %arg0, %c0_i32, %c0_i32_0, %c0_i32_1 : i32, i32, i32, i32
  }
}

</mosaic_0001>

<bundles_post_ra>
// kernel: integration_cell_forward_nhwc.1
= control target key start
LH: loop header
LB: loop body
LE: loop exit
PB: predicated region body
PF: predicated region fallthrough
CT: control target
= control target key end

     0   :  { %10 = vsyncpa [#allocation5], 0  ;;  %s11251_s0 = inlined_call_operand.vmem [shape: bf16[8,8,8,64], index: 0, kind: input, shape index: {}]   ;;  %s11252_s1 = inlined_call_operand.vmem [shape: bf16[9,64,64], index: 1, kind: input, shape index: {}]   ;;  %s11253_s2 = inlined_call_operand.vmem [shape: f32[1,64], index: 2, kind: input, shape index: {}]   ;;  %s11254_s3 = inlined_call_operand.vmem [shape: bf16[9,64,128], index: 3, kind: input, shape index: {}]   ;;  %s11255_s4 = inlined_call_operand.vmem [shape: f32[1,128], index: 4, kind: input, shape index: {}]   ;;  %s11256_s5 = inlined_call_operand.hbm [shape: f32[8,8,8,128], index: 5, kind: output, shape index: {}]  }
   0x1   :  { %12 = vsyncpa [#allocation5 + $0x1], 0  ;;  %s8688_s18 = smov 0   ;;  %s8690_s19 = smov 0  }
   0x2   :  { %s8692_s20 = smov 0   ;;  %s8694_s21 = smov 0  }
   0x3 LB: > { %s8709_s22 = sadd.s32 4294967295, %s8652_s21   ;;  %s6857_s23 = sadd.s32 4294967294, %s8652_s21   ;;  %s8652_s21 = sphi %s8694_s21, %s11326_s21   ;;  %s8648_s20 = sphi %s8692_s20, %s11325_s20   ;;  %s8644_s19 = sphi %s8690_s19, %s11324_s19   ;;  %s8640_s18 = sphi %s8688_s18, %s11323_s18  }
   0x4   : > { %s8713_s24 = sadd.s32 1, %s8652_s21   ;;  %s135_s25 = sadd.s32 1, %s8648_s20 }
   0x5   : > { %s132_s26 = ssub.s32 %s8652_s21, %s8713_s24  ;;  %p145_p0 = scmp.ne.s32.totalorder %s8648_s20, %s8644_s19 }
   0x6   : > { %p133_p1 = scmp.eq.s32.totalorder %s132_s26, 0  ;;  %p146_p2 = scmp.eq.s32.totalorder %s8709_s22, 3 }
   0x7   : > { %p151_p3 = scmp.ne.s32.totalorder %s8644_s19, %s8640_s18  ;;  %p152_p4 = scmp.eq.s32.totalorder %s6857_s23, 3 }
   0x8   : > { %s8724_s27 = scalar_select %p133_p1, %s8648_s20, %s135_s25  }
   0x9   : > { %p8726_p5 = por %p146_p2, %p145_p0  ;;  %p8730_p6 = por %p152_p4, %p151_p3 }
   0xa   : > { %p6860_p7 = scmp.ge.s32.totalorder %s8652_s21, 1  ;;  %p192_p8 = scmp.lt.s32.totalorder %s8652_s21, 5 }
   0xc   : > { %p193_p9 = pnand %p6860_p7, %p192_p8 }
   0xe   : > { %196 = sbr.rel (%p193_p9) target bundleno = 1117 (0x45d), region = 40 }
  0x15   : > { %v8470_v0 = vld [vmem:[%s11252_s1] sm:$0xff]   ;;  %s6862_s7 = sshll.u32 %s8709_s22, 1  ;;  %v8471_v1 = vld [vmem:[%s11252_s1 + $0x8] sm:$0xff]   ;;  %vm230_vm0 = vcmask 519168   ;;  %v8472_v2 = vld [vmem:[%s11252_s1 + $0x10] sm:$0xff]   ;;  %vm232_vm1 = vcmask 516096  }
  0x16   : > { %p222_p10 = scmp.lt.s32.totalorder %s6862_s7, 7  ;;  %7708 = vmatprep.subr.bf16.mxu0 %v8470_v0  ;;  %vm242_vm2 = vsmask.f32 256  ;;  %v247_v3 = vld [vmem:[#allocation2 + $0x8] sm:$0x1]  ;;  %v8654_v4 = vmov 0  }
  0x17   : > { %7709 = vmatpush3.bf16.msra.mxu0 %v8470_v0  ;;  %231 = vst.msk [vmem:[#allocation2] sm:$0xf] %vm230_vm0, %v8654_v4  ;;  %vm8748_vm3 = vmand %vm232_vm1, %vm242_vm2  ;;  %v11268_v5 = vmov 0  ;;  %vm304_vm4 = vsmask.f32 7938  ;;  %v8473_v9 = vld [vmem:[%s11252_s1 + $0x18] sm:$0xff]  }
  0x18   : > { %s11328_s7 = smov (!%p222_p10, %s6862_s7), 7  ;;  %7710 = vmatprep.subr.bf16.mxu0 %v8471_v1  ;;  %v11269_v5 = vsel %vm8748_vm3, 4294967295, %v11268_v5  ;;  %233 = vst.msk [vmem:[#allocation2 + $0x4] sm:$0x1] %vm232_vm1, %v8654_v4  ;;  %235 = vst.msk [vmem:[#allocation2 + $0x54] sm:$0x1] %vm232_vm1, %v8654_v4 }
  0x19   : > { %s7473_s12 = sshll.u32 %s11328_s7, 5  ;;  %11270 = vst [vmem:[#allocation7_spill] sm:$0xff] %v11269_v5  ;;  %234 = vst.msk [vmem:[#allocation2 + $0x50] sm:$0xf] %vm230_vm0, %v8654_v4  ;;  %v248_v6 = vsel %vm8748_vm3, 0, %v247_v3  ;;  %v11271_v28 = vmov 0 }
  0x1a   : > { %237 = vst.msk [vmem:[#allocation2 + $0x48] sm:$0xf] %vm230_vm0, %v8654_v4  ;;  %239 = vst.msk [vmem:[#allocation2 + $0x98] sm:$0xf] %vm230_vm0, %v8654_v4  ;;  %s8770_s15 = scalar_lea.vmem %s11251_s0, %s7473_s12  ;;  %v250_v8 = vld [vmem:[#allocation2 + $0x10] sm:$0x1] }
  0x1b   : > { %238 = vst.msk [vmem:[#allocation2 + $0x4c] sm:$0x1] %vm232_vm1, %v8654_v4  ;;  %240 = vst.msk [vmem:[#allocation2 + $0x9c] sm:$0x1] %vm232_vm1, %v8654_v4  ;;  %7711 = vmatpush3.bf16.msra.mxu0 %v8471_v1  ;;  %v495_v7 = vld [vmem:[%s8770_s15] sm:$0xf] }
  0x1c   : > { %366 = vst.msk [vmem:[#allocation3] sm:$0xf] %vm230_vm0, %v8654_v4  ;;  %368 = vst.msk [vmem:[#allocation3 + $0x50] sm:$0xf] %vm230_vm0, %v8654_v4  ;;  %7712 = vmatprep.subr.bf16.mxu0 %v8472_v2  ;;  %v512_v10 = vshrl.u32 %v495_v7, 16  ;;  %v515_v11 = vshll.u32 %v495_v7, 16 }
  0x1d   : > { %367 = vst.msk [vmem:[#allocation3 + $0x4] sm:$0x1] %vm232_vm1, %v8654_v4  ;;  %369 = vst.msk [vmem:[#allocation3 + $0x54] sm:$0x1] %vm232_vm1, %v8654_v4  ;;  %v251_v12 = vsel %vm8748_vm3, 0, %v250_v8  ;;  %v8799_v29 = vld [vmem:[%s11252_s1 + $0x20] sm:$0xff]  }
  0x1e   : > { %371 = vst.msk [vmem:[#allocation3 + $0x48] sm:$0xf] %vm230_vm0, %v8654_v4  ;;  %373 = vst.msk [vmem:[#allocation3 + $0x98] sm:$0xf] %vm230_vm0, %v8654_v4  ;;  %v253_v13 = vld [vmem:[#allocation2 + $0x18] sm:$0x1] }
  0x1f   : > { %372 = vst.msk [vmem:[#allocation3 + $0x4c] sm:$0x1] %vm232_vm1, %v8654_v4  ;;  %374 = vst.msk [vmem:[#allocation3 + $0x9c] sm:$0x1] %vm232_vm1, %v8654_v4  ;;  %v254_v14 = vsel %vm8748_vm3, 0, %v253_v13  ;;  %v8784_v17 = vrot.slane %v512_v10, 7  ;;  %7713 = vmatpush3.bf16.msra.mxu0 %v8472_v2 }
  0x20   : > { %249 = vst [vmem:[#allocation2 + $0x8] sm:$0x1] %v248_v6  ;;  %252 = vst [vmem:[#allocation2 + $0x10] sm:$0x1] %v251_v12  ;;  %v496_v15 = vld [vmem:[%s8770_s15 + $0x4] sm:$0xf]  ;;  %7714 = vmatprep.subr.bf16.mxu0 %v8473_v9 }
  0x21   : > { %v497_v16 = vld [vmem:[%s8770_s15 + $0x8] sm:$0xf]  ;;  %255 = vst [vmem:[#allocation2 + $0x18] sm:$0x1] %v254_v14  ;;  %v520_v18 = vshrl.u32 %v496_v15, 16  ;;  %v523_v19 = vshll.u32 %v496_v15, 16  ;;  %v517_v27 = vor.u32 %v515_v11, %v8784_v17  ;;  %vm8792_vm5 = vmand %vm230_vm0, %vm304_vm4 }
  0x22   : > { %v528_v20 = vshrl.u32 %v497_v16, 16  ;;  %v256_v21 = vld [vmem:[#allocation2 + $0x20] sm:$0x1]  ;;  %v531_v22 = vshll.u32 %v497_v16, 16  ;;  %v259_v24 = vld [vmem:[#allocation2 + $0x28] sm:$0x1]  ;;  %vm8976_vm7 = vmand %vm232_vm1, %vm304_vm4 }
  0x23   : > { %v257_v23 = vsel %vm8748_vm3, 0, %v256_v21  ;;  %v498_v25 = vld [vmem:[%s8770_s15 + $0xc] sm:$0xf]  ;;  %v244_v26 = vld [vmem:[#allocation2] sm:$0x1]  ;;  %v11272_v28 = vsel %vm8792_vm5, 4294967295, %v11271_v28  ;;  %7715 = vmatpush3.bf16.msra.mxu0 %v8473_v9 }
  0x24   : > { %11273 = vst [vmem:[#allocation8_spill] sm:$0xff] %v11272_v28  ;;  %v8801_v30 = vrot.slane %v520_v18, 7  ;;  %v8803_v31 = vrot.slane %v528_v20, 7  ;;  %258 = vst [vmem:[#allocation2 + $0x20] sm:$0x1] %v257_v23  ;;  %v245_v32 = vsel %vm8748_vm3, 0, %v244_v26  ;;  %7732 = vmatprep.subr.bf16.mxu0 %v8799_v29 }
  0x25   : > { %v260_v33 = vsel %vm8748_vm3, 0, %v259_v24  ;;  %v499_v34 = vld [vmem:[%s8770_s15 + $0x10] sm:$0xf]  ;;  %v536_v35 = vshrl.u32 %v498_v25, 16  ;;  %v539_v36 = vshll.u32 %v498_v25, 16  ;;  %v518_v37 = vrot.slane %v8784_v17, 4 }
  0x26   : > { %246 = vst [vmem:[#allocation2] sm:$0x1] %v245_v32  ;;  %v525_v39 = vor.u32 %v523_v19, %v8801_v30  ;;  %v533_v40 = vor.u32 %v531_v22, %v8803_v31  ;;  %261 = vst [vmem:[#allocation2 + $0x28] sm:$0x1] %v260_v33  ;;  %vm881_vm6 = vcmask 523264   ;;  %v544_v43 = vshrl.u32 %v499_v34, 16 }
  0x27   : > { %v674_v38 = vld [vmem:[#allocation2 + $0x8] sm:$0xf]  ;;  %v8815_v42 = vrot.slane %v536_v35, 7  ;;  %v547_v44 = vshll.u32 %v499_v34, 16  ;;  %v680_v45 = vld [vmem:[#allocation2 + $0x10] sm:$0xf] }
  0x28   : > { %v675_v41 = vsel %vm8792_vm5, %v517_v27, %v674_v38  ;;  %v262_v46 = vld [vmem:[#allocation2 + $0x30] sm:$0x1]  ;;  %v265_v47 = vld [vmem:[#allocation2 + $0x38] sm:$0x1]  ;;  %v681_v48 = vsel %vm8792_vm5, %v525_v39, %v680_v45  ;;  %v8821_v51 = vrot.slane %v544_v43, 7  ;;  %v526_v0 = vrot.slane %v8801_v30, 4 }
  0x29   : > { %676 = vst [vmem:[#allocation2 + $0x8] sm:$0xf] %v675_v41  ;;  %v686_v49 = vld [vmem:[#allocation2 + $0x18] sm:$0xf]  ;;  %v541_v50 = vor.u32 %v539_v36, %v8815_v42  ;;  %v263_v52 = vsel %vm8748_vm3, 0, %v262_v46  ;;  %v266_v55 = vsel %vm8748_vm3, 0, %v265_v47 }
  0x2a   : > { %v500_v53 = vld [vmem:[%s8770_s15 + $0x14] sm:$0xf]  ;;  %682 = vst [vmem:[#allocation2 + $0x10] sm:$0xf] %v681_v48  ;;  %v687_v54 = vsel %vm8792_vm5, %v533_v40, %v686_v49  ;;  %264 = vst [vmem:[#allocation2 + $0x30] sm:$0x1] %v263_v52  ;;  %v549_v59 = vor.u32 %v547_v44, %v8821_v51 }
  0x2b   : > { %v501_v56 = vld [vmem:[%s8770_s15 + $0x18] sm:$0xf]  ;;  %v552_v57 = vshrl.u32 %v500_v53, 16  ;;  %v555_v58 = vshll.u32 %v500_v53, 16  ;;  %688 = vst [vmem:[#allocation2 + $0x18] sm:$0xf] %v687_v54 }
  0x2c   : > { %v692_v60 = vld [vmem:[#allocation2 + $0x20] sm:$0xf]  ;;  %267 = vst [vmem:[#allocation2 + $0x38] sm:$0x1] %v266_v55  ;;  %v560_v61 = vshrl.u32 %v501_v56, 16  ;;  %v563_v62 = vshll.u32 %v501_v56, 16 }
  0x2d   : > { %v274_v63 = vld [vmem:[#allocation2 + $0x50] sm:$0x1]  ;;  %v693_v1 = vsel %vm8792_vm5, %v541_v50, %v692_v60  ;;  %v8835_v2 = vrot.slane %v552_v57, 7  ;;  %v277_v4 = vld [vmem:[#allocation2 + $0x58] sm:$0x1]  ;;  %v534_v16 = vrot.slane %v8803_v31, 4 }
  0x2e   : > { %v275_v3 = vsel %vm8748_vm3, 0, %v274_v63  ;;  %v8839_v6 = vld [vmem:[#allocation2] sm:$0xf]  ;;  %694 = vst [vmem:[#allocation2 + $0x20] sm:$0xf] %v693_v1  ;;  %v8841_v8 = vrot.slane %v560_v61, 7 }
  0x2f   : > { %v698_v7 = vld [vmem:[#allocation2 + $0x28] sm:$0xf]  ;;  %276 = vst [vmem:[#allocation2 + $0x50] sm:$0x1] %v275_v3  ;;  %v278_v9 = vsel %vm8748_vm3, 0, %v277_v4  ;;  %v1023_v10 = vshrl.u32 %v8839_v6, 16  ;;  %v557_v18 = vor.u32 %v555_v58, %v8835_v2 }
  0x30   : > { %v1026_v11 = vshll.u32 %v8839_v6, 16  ;;  %v699_v12 = vsel %vm8792_vm5, %v549_v59, %v698_v7  ;;  %279 = vst [vmem:[#allocation2 + $0x58] sm:$0x1] %v278_v9  ;;  %v8850_v13 = vld [vmem:[%s8770_s15 + $0x20] sm:$0xf]  ;;  %v565_v19 = vor.u32 %v563_v62, %v8841_v8  ;;  %v8478_v44 = vld [vmem:[%s11252_s1 + $0x28] sm:$0xff]  }
  0x31   : > { %v8852_v14 = vld [vmem:[#allocation2 + $0x8] sm:$0xf]  ;;  %700 = vst [vmem:[#allocation2 + $0x28] sm:$0xf] %v699_v12  ;;  %v1025_v21 = vrot.slane %v1023_v10, 4  ;;  %v576_v27 = vshrl.u32 %v8850_v13, 16 }
  0x32   : > { %v6866_v20 = vcombine.low %v8839_v6, %v8852_v14  ;;  %v1028_v22 = vrot.slane %v1026_v11, 5  ;;  %v1037_v23 = vshrl.u32 %v8852_v14, 16  ;;  %v1040_v24 = vshll.u32 %v8852_v14, 16  ;;  %v8863_v26 = vld [vmem:[#allocation2 + $0x10] sm:$0xf]  ;;  %s218_s12 = sand.u32 1, %s8644_s19  }
  0x33   : > { %v579_v32 = vshll.u32 %v8850_v13, 16  ;;  %v8868_v35 = vld [vmem:[#allocation2 + $0x18] sm:$0xf]  ;;  %v1051_v36 = vshrl.u32 %v8863_v26, 16  ;;  %v1054_v38 = vshll.u32 %v8863_v26, 16  ;;  %v8481_v58 = vld [vmem:[%s11252_s1 + $0x30] sm:$0xff]  }
  0x34   : > { %7716 = vmatprep.mubr.msk.bf16.mxu0 %vm881_vm6, %v6866_v20  ;;  %v1029_v33 = vor.u32 %v1028_v22, %v1025_v21  ;;  %v1039_v34 = vrot.slane %v1037_v23, 4  ;;  %v1042_v39 = vrot.slane %v1040_v24, 5  ;;  %v6867_v40 = vcombine.low %v8863_v26, %v8868_v35  ;;  %v704_v45 = vld [vmem:[#allocation2 + $0x30] sm:$0xf]  ;;  %v280_v52 = vld [vmem:[#allocation2 + $0x60] sm:$0x1] }
  0x35   : > { %v1065_v41 = vshrl.u32 %v8868_v35, 16  ;;  %v1068_v43 = vshll.u32 %v8868_v35, 16  ;;  %v1053_v47 = vrot.slane %v1051_v36, 4  ;;  %v1056_v48 = vrot.slane %v1054_v38, 5  ;;  %v8882_v50 = vld [vmem:[#allocation2 + $0x20] sm:$0xf] }
  0x36   : > { %v8879_v46 = vrot.slane %v1029_v33, 4  ;;  %v1043_v53 = vor.u32 %v1042_v39, %v1039_v34  ;;  %7717 = vmatmul.mubr.msk.bf16.vlgmr.msra.gmra.mrb[0].mxu0 %vm881_vm6, %v6867_v40  ;;  %v710_v57 = vld [vmem:[#allocation2 + $0x38] sm:$0xf]  ;;  %v1079_v61 = vshrl.u32 %v8882_v50, 16  ;;  %v1082_v62 = vshll.u32 %v8882_v50, 16  ;;  %s6861_s16 = sshll.u32 %s218_s12, 7 }
  0x37   : > { %v1067_v54 = vrot.slane %v1065_v41, 4  ;;  %v1070_v55 = vrot.slane %v1068_v43, 5  ;;  %v1057_v59 = vor.u32 %v1056_v48, %v1053_v47  ;;  %7733 = vmatpush3.bf16.msra.mxu0 %v8799_v29  ;;  %v705_v63 = vsel %vm8792_vm5, %v557_v18, %v704_v45  ;;  %v8896_v1 = vld [vmem:[#allocation2 + $0x50] sm:$0xf]  ;;  %v722_v9 = vld [vmem:[#allocation2 + $0x58] sm:$0xf] }
  0x38   : > { %v8890_v60 = vld [vmem:[#allocation2 + $0x28] sm:$0xf]  ;;  %v8898_v3 = vrot.slane %v1043_v53, 4  ;;  %7734 = vmatprep.subr.bf16.mxu0 %v8478_v44  ;;  %706 = vst [vmem:[#allocation2 + $0x30] sm:$0xf] %v705_v63  ;;  %v711_v18 = vsel %vm8792_vm5, %v565_v19, %v710_v57  ;;  %v8909_v20 = vrot.slane %v576_v27, 7 }
  0x39   : > { %v1071_v4 = vor.u32 %v1070_v55, %v1067_v54  ;;  %v6868_v7 = vcombine.low %v8882_v50, %v8890_v60  ;;  %v1093_v29 = vshrl.u32 %v8890_v60, 16  ;;  %v283_v10 = vld [vmem:[#allocation2 + $0x68] sm:$0x1]  ;;  %v504_v11 = vld [vmem:[%s8770_s15 + $0x24] sm:$0xf]  ;;  %v8904_v12 = vrot.slane %v1057_v59, 4 }
  0x3a   : > { %v1096_v13 = vshll.u32 %v8890_v60, 16  ;;  %v505_v21 = vld [vmem:[%s8770_s15 + $0x28] sm:$0xf]  ;;  %712 = vst [vmem:[#allocation2 + $0x38] sm:$0xf] %v711_v18  ;;  %v1135_v23 = vshrl.u32 %v8896_v1, 16  ;;  %v581_v19 = vor.u32 %v579_v32, %v8909_v20 }
  0x3b   : > { %v8912_v22 = vrot.slane %v1071_v4, 4  ;;  %7720 = vmatprep.mubr.msk.bf16.mxu0 %vm881_vm6, %v6868_v7  ;;  %v1138_v24 = vshll.u32 %v8896_v1, 16  ;;  %v281_v33 = vsel %vm8748_vm3, 0, %v280_v52  ;;  %v286_v34 = vld [vmem:[#allocation2 + $0x70] sm:$0x1]  ;;  %7735 = vmatpush3.bf16.msra.mxu0 %v8478_v44  ;;  %v284_v27 = vsel %vm8748_vm3, 0, %v283_v10 }
  0x3c   : > { %282 = vst [vmem:[#allocation2 + $0x60] sm:$0x1] %v281_v33  ;;  %v584_v36 = vshrl.u32 %v504_v11, 16  ;;  %v587_v38 = vshll.u32 %v504_v11, 16  ;;  %v289_v39 = vld [vmem:[#allocation2 + $0x78] sm:$0x1]  ;;  %7736 = vmatprep.subr.bf16.mxu0 %v8481_v58  ;;  %v723_v47 = vsel %vm8792_vm5, %v581_v19, %v722_v9 }
  0x3d   : > { %v8484_v40 = vld [vmem:[%s11252_s1 + $0x38] sm:$0xff]   ;;  %285 = vst [vmem:[#allocation2 + $0x68] sm:$0x1] %v284_v27  ;;  %v592_v41 = vshrl.u32 %v505_v21, 16  ;;  %v595_v43 = vshll.u32 %v505_v21, 16  ;;  %v287_v44 = vsel %vm8748_vm3, 0, %v286_v34 }
  0x3e   : > { %v290_v32 = vsel %vm8748_vm3, 0, %v289_v39  ;;  %v506_v45 = vld [vmem:[%s8770_s15 + $0x2c] sm:$0xf]  ;;  %v8932_v48 = vrot.slane %v584_v36, 7  ;;  %288 = vst [vmem:[#allocation2 + $0x70] sm:$0x1] %v287_v44 }
  0x3f   : > { %291 = vst [vmem:[#allocation2 + $0x78] sm:$0x1] %v290_v32  ;;  %v507_v52 = vld [vmem:[%s8770_s15 + $0x30] sm:$0xf]  ;;  %v600_v53 = vshrl.u32 %v506_v45, 16  ;;  %v603_v54 = vshll.u32 %v506_v45, 16  ;;  %7737 = vmatpush3.bf16.msra.mxu0 %v8481_v58 }
  0x40   : > { %724 = vst [vmem:[#allocation2 + $0x58] sm:$0xf] %v723_v47  ;;  %v8935_v55 = vrot.slane %v592_v41, 7  ;;  %v608_v57 = vshrl.u32 %v507_v52, 16  ;;  %v611_v59 = vshll.u32 %v507_v52, 16  ;;  %v542_v63 = vrot.slane %v8815_v42, 4  ;;  %7738 = vmatprep.subr.bf16.mxu0 %v8484_v40 }
  0x41   : > { %v8938_v4 = vld [vmem:[#allocation2 + $0x30] sm:$0xf]  ;;  %v589_v7 = vor.u32 %v587_v38, %v8932_v48  ;;  %v8941_v9 = vrot.slane %v600_v53, 7  ;;  %v550_v10 = vrot.slane %v8821_v51, 4  ;;  %v292_v34 = vld [vmem:[#allocation2 + $0x80] sm:$0x1] }
  0x42   : > { %v1107_v11 = vshrl.u32 %v8938_v4, 16  ;;  %v1110_v18 = vshll.u32 %v8938_v4, 16  ;;  %v597_v21 = vor.u32 %v595_v43, %v8935_v55  ;;  %v8947_v33 = vrot.slane %v608_v57, 7  ;;  %v8952_v19 = vld [vmem:[%s11252_s1 + $0x40] sm:$0xff]   ;;  %v8954_v58 = vld [vmem:[#allocation2 + $0x38] sm:$0xf] }
  0x43   : > { %v605_v27 = vor.u32 %v603_v54, %v8941_v9  ;;  %v293_v36 = vsel %vm8748_vm3, 0, %v292_v34  ;;  %v295_v38 = vld [vmem:[#allocation2 + $0x88] sm:$0x1]  ;;  %v8961_v39 = vrot.slane %v1079_v61, 4  ;;  %v6869_v41 = vcombine.low %v8938_v4, %v8954_v58  ;;  %v728_v32 = vld [vmem:[#allocation2 + $0x60] sm:$0xf]  ;;  %7739 = vmatpush3.bf16.msra.mxu0 %v8484_v40 }
  0x44   : > { %v1121_v43 = vshrl.u32 %v8954_v58, 16  ;;  %v1124_v44 = vshll.u32 %v8954_v58, 16  ;;  %v613_v45 = vor.u32 %v611_v59, %v8947_v33  ;;  %294 = vst [vmem:[#allocation2 + $0x80] sm:$0x1] %v293_v36  ;;  %v508_v47 = vld [vmem:[%s8770_s15 + $0x34] sm:$0xf]  ;;  %v729_v52 = vsel %vm8792_vm5, %v589_v7, %v728_v32  ;;  %7756 = vmatprep.subr.bf16.mxu0 %v8952_v19 }
  0x45   : > { %v734_v53 = vld [vmem:[#allocation2 + $0x68] sm:$0xf]  ;;  %v296_v61 = vsel %vm8748_vm3, 0, %v295_v38  ;;  %v509_v54 = vld [vmem:[%s8770_s15 + $0x38] sm:$0xf]  ;;  %v616_v57 = vshrl.u32 %v508_v47, 16  ;;  %7721 = vmatmul.mubr.msk.bf16.gmra.mrb[4].mxu0 %vm881_vm6, %v6869_v41 }
  0x46   : > { %v11274_v34 = vmov 0  ;;  %730 = vst [vmem:[#allocation2 + $0x60] sm:$0xf] %v729_v52  ;;  %v735_v59 = vsel %vm8792_vm5, %v597_v21, %v734_v53  ;;  %v740_v7 = vld [vmem:[#allocation2 + $0x70] sm:$0xf]  ;;  %v619_v32 = vshll.u32 %v508_v47, 16 }
  0x47   : > { %v11275_v34 = vsel %vm8976_vm7, 4294967295, %v11274_v34  ;;  %v746_v36 = vld [vmem:[#allocation2 + $0x78] sm:$0xf]  ;;  %297 = vst [vmem:[#allocation2 + $0x88] sm:$0x1] %v296_v61  ;;  %v624_v38 = vshrl.u32 %v509_v54, 16  ;;  %v741_v56 = vsel %vm8792_vm5, %v605_v27, %v740_v7 }
  0x48   : > { %11276 = vst [vmem:[#allocation9_spill] sm:$0xff] %v11275_v34  ;;  %v8984_v40 = vld [vmem:[#allocation2 + $0x58] sm:$0xf]  ;;  %736 = vst [vmem:[#allocation2 + $0x68] sm:$0xf] %v735_v59  ;;  %v747_v41 = vsel %vm8792_vm5, %v613_v45, %v746_v36  ;;  %v8990_v52 = vrot.slane %v616_v57, 7 }
  0x49   : > { %v627_v49 = vshll.u32 %v509_v54, 16  ;;  %v306_v21 = vld [vmem:[#allocation2 + $0x4] sm:$0x1]  ;;  %v6870_v53 = vcombine.low %v8896_v1, %v8984_v40  ;;  %v1149_v47 = vshrl.u32 %v8984_v40, 16  ;;  %v1152_v61 = vshll.u32 %v8984_v40, 16  ;;  %s11169_s17 = scalar_lea.vmem [#allocation4], %s6861_s16 }
  0x4a   : > { %742 = vst [vmem:[#allocation2 + $0x70] sm:$0xf] %v741_v56  ;;  %748 = vst [vmem:[#allocation2 + $0x78] sm:$0xf] %v747_v41  ;;  %v8996_v59 = vrot.slane %v624_v38, 7  ;;  %v621_v27 = vor.u32 %v619_v32, %v8990_v52  ;;  %v307_v45 = vsel %vm8976_vm7, 0, %v306_v21 }
  0x4b   : > { %v309_v25 = vld [vmem:[#allocation2 + $0xc] sm:$0x1]  ;;  %7724 = vmatprep.mubr.msk.bf16.mxu0 %vm881_vm6, %v6870_v53  ;;  %308 = vst [vmem:[#allocation2 + $0x4] sm:$0x1] %v307_v45  ;;  %v312_v7 = vld [vmem:[#allocation2 + $0x14] sm:$0x1] }
  0x4c   : > { %v310_v54 = vsel %vm8976_vm7, 0, %v309_v25  ;;  %v629_v57 = vor.u32 %v627_v49, %v8996_v59  ;;  %v315_v56 = vld [vmem:[#allocation2 + $0x1c] sm:$0x1]  ;;  %v318_v36 = vld [vmem:[#allocation2 + $0x24] sm:$0x1]  ;;  %v313_v41 = vsel %vm8976_vm7, 0, %v312_v7 }
  0x4d   : > { %311 = vst [vmem:[#allocation2 + $0xc] sm:$0x1] %v310_v54  ;;  %v752_v38 = vld [vmem:[#allocation2 + $0x80] sm:$0xf]  ;;  %v316_v32 = vsel %vm8976_vm7, 0, %v315_v56  ;;  %v319_v21 = vsel %vm8976_vm7, 0, %v318_v36 }
  0x4e   : > { %v1084_v25 = vrot.slane %v1082_v62, 5  ;;  %v753_v49 = vsel %vm8792_vm5, %v621_v27, %v752_v38  ;;  %314 = vst [vmem:[#allocation2 + $0x14] sm:$0x1] %v313_v41  ;;  %317 = vst [vmem:[#allocation2 + $0x1c] sm:$0x1] %v316_v32  ;;  %v1095_v45 = vrot.slane %v1093_v29, 4 }
  0x4f   : > { %320 = vst [vmem:[#allocation2 + $0x24] sm:$0x1] %v319_v21  ;;  %v321_v53 = vld [vmem:[#allocation2 + $0x2c] sm:$0x1]  ;;  %v1098_v54 = vrot.slane %v1096_v13, 5  ;;  %v1123_v51 = vrot.slane %v1121_v43, 4 }
  0x50   : > { %v9019_v7 = vld [vmem:[#allocation2 + $0x60] sm:$0xf]  ;;  %754 = vst [vmem:[#allocation2 + $0x80] sm:$0xf] %v753_v49  ;;  %v758_v56 = vld [vmem:[#allocation2 + $0x88] sm:$0xf]  ;;  %v1085_v36 = vor.u32 %v1084_v25, %v8961_v39 }
  0x51   : > { %v322_v62 = vsel %vm8976_vm7, 0, %v321_v53  ;;  %v9025_v38 = vld [vmem:[#allocation2 + $0x68] sm:$0xf]  ;;  %v759_v13 = vsel %vm8792_vm5, %v629_v57, %v758_v56  ;;  %vm1019_vm8 = vsmask.f32 3328  ;;  %v1099_v32 = vor.u32 %v1098_v54, %v1095_v45  ;;  %s7491_s23 = sshll.u32 %s8709_s22, 11 }
  0x52   : > { %vm1020_vm9 = vsmask.f32 7440  ;;  %323 = vst [vmem:[#allocation2 + $0x2c] sm:$0x1] %v322_v62  ;;  %v6871_v21 = vcombine.low %v9019_v7, %v9025_v38  ;;  %v9035_v49 = vld [vmem:[#allocation2 + $0x70] sm:$0xf]  ;;  %s11201_s6 = scalar_lea.hbm %s11256_s5, %s7491_s23 }
  0x53   : > { %v9037_v53 = vld [vmem:[#allocation2 + $0x78] sm:$0xf]  ;;  %760 = vst [vmem:[#allocation2 + $0x88] sm:$0xf] %v759_v13  ;;  %v324_v54 = vld [vmem:[#allocation2 + $0x34] sm:$0x1]  ;;  %vm9106_vm10 = vmor %vm1019_vm8, %vm1020_vm9 }
  0x54   : > { %v6872_v15 = vcombine.low %v9035_v49, %v9037_v53  ;;  %7725 = vmatmul.mubr.msk.bf16.gmra.mrb[8].mxu0 %vm881_vm6, %v6871_v21  ;;  %v677_v25 = vld [vmem:[#allocation2 + $0xc] sm:$0x1]  ;;  %v9046_v39 = vld [vmem:[#allocation2 + $0x4] sm:$0x1]  ;;  %v9048_v29 = vrot.slane %v1085_v36, 4  ;;  %v9056_v45 = vrot.slane %v1099_v32, 4 }
  0x55   : > { %v678_v13 = vsel %vm8748_vm3, %v518_v37, %v677_v25  ;;  %v1032_v56 = vshll.u32 %v9046_v39, 16  ;;  %v325_v21 = vsel %vm8976_vm7, 0, %v324_v54  ;;  %v327_v62 = vld [vmem:[#allocation2 + $0x3c] sm:$0x1]  ;;  %v683_v57 = vld [vmem:[#allocation2 + $0x14] sm:$0x1] }
  0x56   : > { %7728 = vmatprep.mubr.msk.bf16.mxu0 %vm881_vm6, %v6872_v15  ;;  %679 = vst [vmem:[#allocation2 + $0xc] sm:$0x1] %v678_v13  ;;  %v689_v41 = vld [vmem:[#allocation2 + $0x1c] sm:$0x1]  ;;  %v695_v36 = vld [vmem:[#allocation2 + $0x24] sm:$0x1]  ;;  %v684_v17 = vsel %vm8748_vm3, %v526_v0, %v683_v57 }
  0x57   : > { %326 = vst [vmem:[#allocation2 + $0x34] sm:$0x1] %v325_v21  ;;  %v9060_v27 = vld [vmem:[#allocation2 + $0x80] sm:$0xf]  ;;  %v9062_v15 = vrot.slane %v1032_v56, 5  ;;  %v690_v37 = vsel %vm8748_vm3, %v534_v16, %v689_v41  ;;  %v696_v32 = vsel %vm8748_vm3, %v542_v63, %v695_v36  ;;  %v328_v31 = vsel %vm8976_vm7, 0, %v327_v62 }
  0x58   : > { %v336_v25 = vld [vmem:[#allocation2 + $0x54] sm:$0x1]  ;;  %v1219_v54 = vshrl.u32 %v9060_v27, 16  ;;  %685 = vst [vmem:[#allocation2 + $0x14] sm:$0x1] %v684_v17  ;;  %v566_v0 = vrot.slane %v8841_v8, 4 }
  0x59   : > { %691 = vst [vmem:[#allocation2 + $0x1c] sm:$0x1] %v690_v37  ;;  %697 = vst [vmem:[#allocation2 + $0x24] sm:$0x1] %v696_v32  ;;  %v701_v30 = vld [vmem:[#allocation2 + $0x2c] sm:$0x1] }
  0x5a   : > { %v9081_v16 = vld [vmem:[#allocation2 + $0x88] sm:$0xf]  ;;  %v702_v42 = vsel %vm8748_vm3, %v550_v10, %v701_v30  ;;  %329 = vst [vmem:[#allocation2 + $0x3c] sm:$0x1] %v328_v31  ;;  %v1109_v63 = vrot.slane %v1107_v11, 4  ;;  %v1112_v41 = vrot.slane %v1110_v18, 5 }
  0x5b   : > { %v339_v57 = vld [vmem:[#allocation2 + $0x5c] sm:$0x1]  ;;  %v6873_v62 = vcombine.low %v9060_v27, %v9081_v16  ;;  %703 = vst [vmem:[#allocation2 + $0x2c] sm:$0x1] %v702_v42  ;;  %v1126_v21 = vrot.slane %v1124_v44, 5  ;;  %v337_v11 = vsel %vm8976_vm7, 0, %v336_v25 }
  0x5c   : > { %v1113_v10 = vor.u32 %v1112_v41, %v1109_v63  ;;  %v340_v18 = vsel %vm8976_vm7, 0, %v339_v57  ;;  %338 = vst [vmem:[#allocation2 + $0x54] sm:$0x1] %v337_v11  ;;  %v582_v43 = vrot.slane %v8909_v20, 4  ;;  %v1137_v44 = vrot.slane %v1135_v23, 4  ;;  %s6795_s25 = sshll.u32 %s11169_s17, 4  ;;  %s11203_s25 = int_to_ptr.vmem [resolvable:$true] %s6795_s25 }
  0x5d   : > { %7729 = vmatmul.mubr.msk.bf16.gmra.mrb[12].mxu0 %vm881_vm6, %v6873_v62  ;;  %341 = vst [vmem:[#allocation2 + $0x5c] sm:$0x1] %v340_v18  ;;  %v1140_v17 = vrot.slane %v1138_v24, 5  ;;  %v1151_v37 = vrot.slane %v1149_v47, 4  ;;  %v342_v32 = vld [vmem:[#allocation2 + $0x64] sm:$0x1]  ;;  %v1127_v42 = vor.u32 %v1126_v21, %v1123_v51  ;;  %v1035_v62 = vsel %vm9106_vm10, %v8879_v46, %v9062_v15 }
  0x5e   : > { %v9117_v25 = vld [vmem:[#allocation2 + $0xc] sm:$0x1]  ;;  %v707_v30 = vld [vmem:[#allocation2 + $0x34] sm:$0x1]  ;;  %v9119_v31 = vrot.slane %v1113_v10, 4  ;;  %v1154_v63 = vrot.slane %v1152_v61, 5 }
  0x5f   : > { %v1046_v20 = vshll.u32 %v9117_v25, 16  ;;  %v11279_v23 = vrot.slane %v8835_v2, 4  ;;  %v1141_v41 = vor.u32 %v1140_v17, %v1137_v44  ;;  %v343_v47 = vsel %vm8976_vm7, 0, %v342_v32  ;;  %v345_v57 = vld [vmem:[#allocation2 + $0x6c] sm:$0x1]  ;;  %s11210_s22 = scalar_lea.sflag [#allocation5], %s218_s12 }
  0x60   : > { %v9134_v51 = vld [vmem:[#allocation2 + $0x14] sm:$0x1]  ;;  %v9136_v61 = vld [vmem:[#allocation2 + $0x1c] sm:$0x1]  ;;  %v9138_v10 = vld [vmem:[#allocation2 + $0x24] sm:$0x1]  ;;  %v1155_v2 = vor.u32 %v1154_v63, %v1151_v37 }
  0x61   : > { %v708_v24 = vsel %vm8748_vm3, %v11279_v23, %v707_v30  ;;  %344 = vst [vmem:[#allocation2 + $0x64] sm:$0x1] %v343_v47  ;;  %v1048_v21 = vrot.slane %v1046_v20, 5  ;;  %v1060_v11 = vshll.u32 %v9134_v51, 16  ;;  %v1074_v18 = vshll.u32 %v9136_v61, 16  ;;  %s8590_s7 = scalar_lea.vmem %s11203_s25, 2048 }
  0x62   : > { %709 = vst [vmem:[#allocation2 + $0x34] sm:$0x1] %v708_v24  ;;  %v1088_v44 = vshll.u32 %v9138_v10, 16  ;;  %v713_v17 = vld [vmem:[#allocation2 + $0x3c] sm:$0x1]  ;;  %v9147_v15 = vrot.slane %v1127_v42, 4  ;;  %p8591_p11 = scmp.ne.s32.totalorder %s11203_s25, %s8590_s7 }
  0x63   : > { %v9143_v32 = vld [vmem:[#allocation2 + $0x2c] sm:$0x1]  ;;  %v714_v46 = vsel %vm8748_vm3, %v566_v0, %v713_v17  ;;  %v9149_v30 = vrot.slane %v1141_v41, 4  ;;  %v9151_v23 = vrot.slane %v1155_v2, 4  ;;  %v1049_v37 = vsel %vm9106_vm10, %v8898_v3, %v1048_v21  ;;  %v9157_v56 = vld [vmem:[#allocation2 + $0x54] sm:$0x1] }
  0x64   : > { %v1062_v63 = vrot.slane %v1060_v11, 5  ;;  %v1076_v20 = vrot.slane %v1074_v18, 5  ;;  %v1090_v24 = vrot.slane %v1088_v44, 5  ;;  %715 = vst [vmem:[#allocation2 + $0x3c] sm:$0x1] %v714_v46  ;;  %v6894_v47 = vcombine.low %v1035_v62, %v1049_v37  ;;  %p8592_p12 = pnand %p8591_p11, %p8726_p5  ;;  %s8655_s8 = smov [#allocation4]  }
  0x65   : > { %v1102_v13 = vshll.u32 %v9143_v32, 16  ;;  %v725_v8 = vld [vmem:[#allocation2 + $0x5c] sm:$0x1]  ;;  %v346_v0 = vsel %vm8976_vm7, 0, %v345_v57  ;;  %v348_v2 = vld [vmem:[#allocation2 + $0x74] sm:$0x1] }
  0x66   : > { %v1063_v42 = vsel %vm9106_vm10, %v8904_v12, %v1062_v63  ;;  %v1077_v3 = vsel %vm9106_vm10, %v8912_v22, %v1076_v20  ;;  %v1091_v41 = vsel %vm9106_vm10, %v9048_v29, %v1090_v24  ;;  %v726_v62 = vsel %vm8748_vm3, %v582_v43, %v725_v8  ;;  %347 = vst [vmem:[#allocation2 + $0x6c] sm:$0x1] %v346_v0  ;;  %v8487_v12 = vld [vmem:[%s11252_s1 + $0x48] sm:$0xff]   ;;  %v351_v18 = vld [vmem:[#allocation2 + $0x7c] sm:$0x1]  ;;  %p8593_p13 = pneg %p8592_p12 }
  0x67   : > { %7740 = vmatprep.mubr.msk.bf16.mxu0 %vm881_vm6, %v6894_v47  ;;  %v6895_v57 = vcombine.low %v1063_v42, %v1077_v3  ;;  %v1104_v21 = vrot.slane %v1102_v13, 5  ;;  %727 = vst [vmem:[#allocation2 + $0x5c] sm:$0x1] %v726_v62  ;;  %v1144_v22 = vshll.u32 %v9157_v56, 16  ;;  %v590_v11 = vrot.slane %v8932_v48, 4 }
  0x68   : > { %v598_v8 = vrot.slane %v8935_v55, 4  ;;  %v731_v43 = vld [vmem:[#allocation2 + $0x64] sm:$0x1]  ;;  %v11280_v44 = vshrl.u32 %v9019_v7, 16  ;;  %v11281_v63 = vshll.u32 %v9019_v7, 16  ;;  %v11282_v24 = vshrl.u32 %v9025_v38, 16 }
  0x69   : > { %v9178_v29 = vld [vmem:[#allocation2 + $0x34] sm:$0x1]  ;;  %7741 = vmatmul.mubr.msk.bf16.vlgmr.msra.gmra.mrb[0].mxu0 %vm881_vm6, %v6895_v57  ;;  %v1105_v13 = vsel %vm9106_vm10, %v9056_v45, %v1104_v21  ;;  %v9188_v37 = vrot.slane %v1144_v22, 5  ;;  %v732_v48 = vsel %vm8748_vm3, %v590_v11, %v731_v43  ;;  %v11283_v0 = vshll.u32 %v9025_v38, 16  ;;  %v354_v21 = vld [vmem:[#allocation2 + $0x84] sm:$0x1] }
  0x6a   : > { %v1165_v17 = vrot.slane %v11280_v44, 4  ;;  %v1116_v46 = vshll.u32 %v9178_v29, 16  ;;  %7757 = vmatpush3.bf16.msra.mxu0 %v8952_v19  ;;  %v6896_v55 = vcombine.low %v1091_v41, %v1105_v13  ;;  %733 = vst [vmem:[#allocation2 + $0x64] sm:$0x1] %v732_v48  ;;  %v1168_v20 = vrot.slane %v11281_v63, 5  ;;  %v8488_v41 = vld [vmem:[%s11252_s1 + $0x50] sm:$0xff]  }
  0x6b   : > { %v1179_v47 = vrot.slane %v11282_v24, 4  ;;  %v1182_v45 = vrot.slane %v11283_v0, 5  ;;  %7758 = vmatprep.subr.bf16.mxu0 %v8487_v12  ;;  %v9199_v42 = vld [vmem:[#allocation2 + $0x3c] sm:$0x1]  ;;  %v1147_v19 = vsel %vm9106_vm10, %v9149_v30, %v9188_v37  ;;  %v349_v62 = vsel %vm8976_vm7, 0, %v348_v2 }
  0x6c   : > { %v1118_v3 = vrot.slane %v1116_v46, 5  ;;  %v352_v57 = vsel %vm8976_vm7, 0, %v351_v18  ;;  %v357_v22 = vld [vmem:[#allocation2 + $0x8c] sm:$0x1]  ;;  %7744 = vmatprep.mubr.msk.bf16.mxu0 %vm881_vm6, %v6896_v55  ;;  %v1130_v11 = vshll.u32 %v9199_v42, 16  ;;  %v1169_v43 = vor.u32 %v1168_v20, %v1165_v17 }
  0x6d   : > { %v1183_v44 = vor.u32 %v1182_v45, %v1179_v47  ;;  %350 = vst [vmem:[#allocation2 + $0x74] sm:$0x1] %v349_v62  ;;  %353 = vst [vmem:[#allocation2 + $0x7c] sm:$0x1] %v352_v57  ;;  %v606_v30 = vrot.slane %v8941_v9, 4  ;;  %v614_v46 = vrot.slane %v8947_v33, 4 }
  0x6e   : > { %v1119_v13 = vsel %vm9106_vm10, %v9119_v31, %v1118_v3  ;;  %v737_v2 = vld [vmem:[#allocation2 + $0x6c] sm:$0x1]  ;;  %v11284_v18 = vshrl.u32 %v9035_v49, 16  ;;  %v11285_v48 = vshll.u32 %v9035_v49, 16  ;;  %v1132_v63 = vrot.slane %v1130_v11, 5  ;;  %7759 = vmatpush3.bf16.msra.mxu0 %v8487_v12  ;;  %v8489_v3 = vld [vmem:[%s11252_s1 + $0x58] sm:$0xff]  }
  0x6f   : > { %v9223_v17 = vld [vmem:[#allocation2 + $0x5c] sm:$0x1]  ;;  %v738_v9 = vsel %vm8748_vm3, %v598_v8, %v737_v2  ;;  %v9227_v20 = vrot.slane %v1169_v43, 4  ;;  %v9229_v24 = vrot.slane %v1183_v44, 4  ;;  %7760 = vmatprep.subr.bf16.mxu0 %v8488_v41  ;;  %v11286_v47 = vshrl.u32 %v9037_v53, 16 }
  0x70   : > { %v1193_v37 = vrot.slane %v11284_v18, 4  ;;  %v1196_v55 = vrot.slane %v11285_v48, 5  ;;  %v1158_v31 = vshll.u32 %v9223_v17, 16  ;;  %739 = vst [vmem:[#allocation2 + $0x6c] sm:$0x1] %v738_v9  ;;  %v11287_v45 = vshll.u32 %v9037_v53, 16 }
  0x71   : > { %v1207_v0 = vrot.slane %v11286_v47, 4  ;;  %v1133_v8 = vsel %vm9106_vm10, %v9147_v15, %v1132_v63  ;;  %v355_v62 = vsel %vm8976_vm7, 0, %v354_v21  ;;  %v358_v57 = vsel %vm8976_vm7, 0, %v357_v22  ;;  %v9247_v2 = vld [vmem:[#allocation2 + $0x64] sm:$0x1] }
  0x72   : > { %v1197_v33 = vor.u32 %v1196_v55, %v1193_v37  ;;  %v1210_v12 = vrot.slane %v11287_v45, 5  ;;  %v622_v11 = vrot.slane %v8990_v52, 4  ;;  %v6897_v43 = vcombine.low %v1119_v13, %v1133_v8  ;;  %356 = vst [vmem:[#allocation2 + $0x84] sm:$0x1] %v355_v62  ;;  %359 = vst [vmem:[#allocation2 + $0x8c] sm:$0x1] %v358_v57  ;;  %7761 = vmatpush3.bf16.msra.mxu0 %v8488_v41 }
  0x73   : > { %v1160_v44 = vrot.slane %v1158_v31, 5  ;;  %v1172_v48 = vshll.u32 %v9247_v2, 16  ;;  %v630_v15 = vrot.slane %v8996_v59, 4  ;;  %v1221_v21 = vrot.slane %v1219_v54, 4  ;;  %v9260_v13 = vld [vmem:[%s11252_s1 + $0x60] sm:$0xff]   ;;  %7762 = vmatprep.subr.bf16.mxu0 %v8489_v3 }
  0x74   : > { %v9249_v18 = vrot.slane %v1197_v33, 4  ;;  %v1211_v37 = vor.u32 %v1210_v12, %v1207_v0  ;;  %v11288_v22 = vshll.u32 %v9060_v27, 16  ;;  %7745 = vmatmul.mubr.msk.bf16.gmra.mrb[4].mxu0 %vm881_vm6, %v6897_v43  ;;  %v743_v41 = vld [vmem:[#allocation2 + $0x74] sm:$0x1]  ;;  %v749_v63 = vld [vmem:[#allocation2 + $0x7c] sm:$0x1] }
  0x75   : > { %v1161_v55 = vsel %vm9106_vm10, %v9151_v23, %v1160_v44  ;;  %v11289_v54 = vshrl.u32 %v9081_v16, 16  ;;  %v1174_v33 = vrot.slane %v1172_v48, 5  ;;  %v744_v47 = vsel %vm8748_vm3, %v606_v30, %v743_v41 }
  0x76   : > { %v1224_v52 = vrot.slane %v11288_v22, 5  ;;  %v9266_v59 = vrot.slane %v1211_v37, 4  ;;  %v6898_v31 = vcombine.low %v1147_v19, %v1161_v55  ;;  %v750_v0 = vsel %vm8748_vm3, %v614_v46, %v749_v63  ;;  %745 = vst [vmem:[#allocation2 + $0x74] sm:$0x1] %v744_v47  ;;  %7763 = vmatpush3.bf16.msra.mxu0 %v8489_v3 }
  0x77   : > { %v1235_v9 = vrot.slane %v11289_v54, 4  ;;  %751 = vst [vmem:[#allocation2 + $0x7c] sm:$0x1] %v750_v0  ;;  %v11290_v23 = vshll.u32 %v9081_v16, 16  ;;  %vm1456_vm11 = vcmask 1042432   ;;  %vm1457_vm12 = vcmask 1046532   ;;  %7780 = vmatprep.subr.bf16.mxu0 %v9260_v13 }
  0x78   : > { %v1225_v45 = vor.u32 %v1224_v52, %v1221_v21  ;;  %7748 = vmatprep.mubr.msk.bf16.mxu0 %vm881_vm6, %v6898_v31  ;;  %v9277_v8 = vld [vmem:[#allocation2 + $0x6c] sm:$0x1]  ;;  %v1175_v19 = vsel %vm9106_vm10, %v9227_v20, %v1174_v33  ;;  %vm9282_vm13 = vmor %vm1456_vm11, %vm1457_vm12  ;;  %v1461_v46 = vrot.slane %v9046_v39, 5  ;;  %v1465_v62 = vrot.slane %v9117_v25, 5 }
  0x79   : > { %v1238_v12 = vrot.slane %v11290_v23, 5  ;;  %v1469_v57 = vrot.slane %v9134_v51, 5  ;;  %v1186_v43 = vshll.u32 %v9277_v8, 16  ;;  %v1473_v20 = vrot.slane %v9136_v61, 5  ;;  %v755_v3 = vld [vmem:[#allocation2 + $0x84] sm:$0x1] }
  0x7a   : > { %v9290_v44 = vrot.slane %v1225_v45, 4  ;;  %v761_v48 = vld [vmem:[#allocation2 + $0x8c] sm:$0x1]  ;;  %v11293_v21 = vrot.slane %v8839_v6, 9  ;;  %v11294_v25 = vrot.slane %v8852_v14, 9  ;;  %v11295_v22 = vrot.slane %v8863_v26, 9 }
  0x7b   : > { %v1239_v37 = vor.u32 %v1238_v12, %v1235_v9  ;;  %v6918_v61 = vrot.slane %v8882_v50, 9  ;;  %v1188_v55 = vrot.slane %v1186_v43, 5  ;;  %v756_v6 = vsel %vm8748_vm3, %v622_v11, %v755_v3 }
  0x7c   : > { %v9298_v39 = vsel %vm9282_vm13, %v11293_v21, %v1461_v46  ;;  %v9304_v51 = vsel %vm9282_vm13, %v11294_v25, %v1465_v62  ;;  %v9310_v52 = vsel %vm9282_vm13, %v11295_v22, %v1469_v57  ;;  %v762_v41 = vsel %vm8748_vm3, %v630_v15, %v761_v48  ;;  %757 = vst [vmem:[#allocation2 + $0x84] sm:$0x1] %v756_v6 }
  0x7d   : > { %v1240_v14 = vrot.slane %v1239_v37, 4  ;;  %763 = vst [vmem:[#allocation2 + $0x8c] sm:$0x1] %v762_v41  ;;  %v6938_v63 = vcombine.low %v9298_v39, %v9304_v51  ;;  %v11296_v26 = vrot.slane %v8868_v35, 9  ;;  %v1477_v50 = vrot.slane %v9138_v10, 5 }
  0x7e   : > { %v6919_v9 = vrot.slane %v8890_v60, 9  ;;  %v1189_v11 = vsel %vm9106_vm10, %v9229_v24, %v1188_v55  ;;  %v1481_v31 = vrot.slane %v9143_v32, 5  ;;  %v6920_v33 = vrot.slane %v8938_v4, 9  ;;  %v802_v47 = vld [vmem:[#allocation2 + $0x74] sm:$0x1] }
  0x7f   : > { %v9323_v54 = vsel %vm9282_vm13, %v11296_v26, %v1473_v20  ;;  %v6899_v35 = vcombine.low %v1175_v19, %v1189_v11  ;;  %v804_v0 = vld [vmem:[#allocation2 + $0x7c] sm:$0x1]  ;;  %v9336_v45 = vsel %vm9282_vm13, %v6918_v61, %v1477_v50  ;;  %v1485_v60 = vrot.slane %v9178_v29, 5 }
  0x80   : > { %v6939_v15 = vcombine.low %v9310_v52, %v9323_v54  ;;  %v6921_v10 = vrot.slane %v8954_v58, 9  ;;  %v1200_v23 = vshll.u32 %v802_v47, 16  ;;  %v1214_v24 = vshll.u32 %v804_v0, 16  ;;  %v510_v39 = vld [vmem:[%s8770_s15 + $0x3c] sm:$0xf] }
  0x81   : > { %v9342_v12 = vsel %vm9282_vm13, %v6919_v9, %v1481_v31  ;;  %v1489_v32 = vrot.slane %v9199_v42, 5  ;;  %7749 = vmatmul.mubr.msk.bf16.gmra.mrb[8].mxu0 %vm881_vm6, %v6899_v35  ;;  %v9350_v19 = vsel %vm9282_vm13, %v6920_v33, %v1485_v60  ;;  %v6922_v29 = vrot.slane %v8896_v1, 9 }
  0x82   : > { %v6940_v4 = vcombine.low %v9336_v45, %v9342_v12  ;;  %v1493_v58 = vrot.slane %v9157_v56, 5  ;;  %v1202_v46 = vrot.slane %v1200_v23, 5  ;;  %v1216_v62 = vrot.slane %v1214_v24, 5 }
  0x83   : > { %v9356_v57 = vsel %vm9282_vm13, %v6921_v10, %v1489_v32  ;;  %v6923_v42 = vrot.slane %v8984_v40, 9  ;;  %v1497_v20 = vrot.slane %v9223_v17, 5  ;;  %v6924_v1 = vrot.slane %v9019_v7, 9  ;;  %v806_v40 = vld [vmem:[#allocation2 + $0x84] sm:$0x1]  ;;  %v8491_v32 = vld [vmem:[%s11252_s1 + $0x68] sm:$0xff]  }
  0x84   : > { %v6941_v43 = vcombine.low %v9350_v19, %v9356_v57  ;;  %v9363_v37 = vsel %vm9282_vm13, %v6922_v29, %v1493_v58  ;;  %v1203_v56 = vsel %vm9106_vm10, %v9249_v18, %v1202_v46  ;;  %v1217_v3 = vsel %vm9106_vm10, %v9266_v59, %v1216_v62  ;;  %v808_v48 = vld [vmem:[#allocation2 + $0x8c] sm:$0x1]  ;;  %v502_v10 = vld [vmem:[%s8770_s15 + $0x1c] sm:$0xf]  ;;  %v298_v58 = vld [vmem:[#allocation2 + $0x90] sm:$0x1] }
  0x85   : > { %v1501_v21 = vrot.slane %v9247_v2, 5  ;;  %v6925_v25 = vrot.slane %v9025_v38, 9  ;;  %v6900_v22 = vcombine.low %v1203_v56, %v1217_v3  ;;  %v1228_v61 = vshll.u32 %v806_v40, 16  ;;  %v8492_v62 = vld [vmem:[%s11252_s1 + $0x70] sm:$0xff]   ;;  %v9449_v57 = vld [vmem:[#allocation2 + $0x8] sm:$0xf] }
  0x86   : > { %v1242_v55 = vshll.u32 %v808_v48, 16  ;;  %v1498_v7 = vsel %vm9282_vm13, %v6923_v42, %v1497_v20  ;;  %v1505_v59 = vrot.slane %v9277_v8, 5  ;;  %v6926_v6 = vrot.slane %v9035_v49, 9  ;;  %v330_v20 = vld [vmem:[#allocation2 + $0x44] sm:$0x1]  ;;  %s8594_s15 = sshll.u32 %s8655_s8, 4  ;;  %s8595_s15 = int_to_ptr.vmem [resolvable:$false] %s8594_s15 }
  0x87   : > { %v6942_v17 = vcombine.low %v9363_v37, %v1498_v7  ;;  %v9380_v18 = vsel %vm9282_vm13, %v6924_v1, %v1501_v21  ;;  %7752 = vmatprep.mubr.msk.bf16.mxu0 %vm881_vm6, %v6900_v22  ;;  %v1230_v2 = vrot.slane %v1228_v61, 5  ;;  %v1509_v41 = vrot.slane %v802_v47, 5  ;;  %v8495_v1 = vld [vmem:[%s11252_s1 + $0x80] sm:$0xff]   ;;  %v360_v61 = vld [vmem:[#allocation2 + $0x94] sm:$0x1]  ;;  %s8596_s9 = scalar_lea.vmem %s8595_s15, 4096  ;;  %p8597_p0 = scmp.lt.s32.totalorder %s11203_s25, %s8595_s15 }
  0x88   : > { %v1244_v38 = vrot.slane %v1242_v55, 5  ;;  %v6927_v26 = vrot.slane %v9037_v53, 9  ;;  %v1506_v50 = vsel %vm9282_vm13, %v6925_v25, %v1505_v59  ;;  %v1513_v9 = vrot.slane %v804_v0, 5  ;;  %v9459_v25 = vld [vmem:[#allocation2 + $0x18] sm:$0xf]  ;;  %p8598_p1 = scmp.lt.s32.totalorder %s8596_s9, %s8590_s7 }
  0x89   : > { %v6928_v11 = vrot.slane %v9060_v27, 9  ;;  %v1517_v31 = vrot.slane %v806_v40, 5  ;;  %v1231_v8 = vsel %vm9106_vm10, %v9290_v44, %v1230_v2  ;;  %v6943_v33 = vcombine.low %v9380_v18, %v1506_v50  ;;  %v9461_v22 = vld [vmem:[#allocation2 + $0x20] sm:$0xf]  ;;  %v9463_v55 = vld [vmem:[#allocation2 + $0x28] sm:$0xf] }
  0x8a   : > { %v1245_v49 = vsel %vm9106_vm10, %v1240_v14, %v1244_v38  ;;  %v1510_v53 = vsel %vm9282_vm13, %v6926_v6, %v1509_v41  ;;  %v1514_v47 = vsel %vm9282_vm13, %v6927_v26, %v1513_v9  ;;  %v6929_v27 = vrot.slane %v9081_v16, 9  ;;  %v268_v14 = vld [vmem:[#allocation2 + $0x40] sm:$0x1]  ;;  %v9465_v7 = vld [vmem:[#allocation2 + $0x30] sm:$0xf]  ;;  %v8498_v6 = vld [vmem:[%s11252_s1 + $0x88] sm:$0xff]   ;;  %p8599_p2 = por %p8598_p1, %p8597_p0 }
  0x8b   : > { %v6901_v35 = vcombine.low %v1231_v8, %v1245_v49  ;;  %v6944_v0 = vcombine.low %v1510_v53, %v1514_v47  ;;  %v1518_v45 = vsel %vm9282_vm13, %v6928_v11, %v1517_v31  ;;  %v1521_v44 = vrot.slane %v808_v48, 5  ;;  %v9478_v41 = vld [vmem:[#allocation2 + $0x38] sm:$0xf]  ;;  %v9489_v49 = vld [vmem:[#allocation2 + $0x60] sm:$0xf] }
  0x8c   : > { %v269_v16 = vsel %vm8748_vm3, 0, %v268_v14  ;;  %v568_v24 = vshrl.u32 %v502_v10, 16  ;;  %v571_v12 = vshll.u32 %v502_v10, 16  ;;  %v632_v46 = vshrl.u32 %v510_v39, 16  ;;  %v9487_v8 = vld [vmem:[#allocation2 + $0x58] sm:$0xf]  ;;  %p8600_p3 = pnand %p8599_p2, %p8593_p13 }
  0x8d   : > { %7753 = vmatmul.mubr.msk.bf16.gmra.mrb[12].mxu0 %vm881_vm6, %v6901_v35  ;;  %v1522_v60 = vsel %vm9282_vm13, %v6929_v27, %v1521_v44  ;;  %270 = vst [vmem:[#allocation2 + $0x40] sm:$0x1] %v269_v16  ;;  %v635_v42 = vshll.u32 %v510_v39, 16  ;;  %v331_v3 = vsel %vm8976_vm7, 0, %v330_v20  ;;  %v361_v18 = vsel %vm8976_vm7, 0, %v360_v61 }
  0x8e   : > { %7764 = vmatprep.mubr.msk.bf16.mxu0 %vm881_vm6, %v6938_v63  ;;  %v6945_v23 = vcombine.low %v1518_v45, %v1522_v60  ;;  %v570_v29 = vrot.slane %v568_v24, 7  ;;  %v299_v63 = vsel %vm8748_vm3, 0, %v298_v58  ;;  %v9427_v52 = vrot.slane %v632_v46, 7  ;;  %332 = vst [vmem:[#allocation2 + $0x44] sm:$0x1] %v331_v3 }
  0x8f   : > { %300 = vst [vmem:[#allocation2 + $0x90] sm:$0x1] %v299_v63  ;;  %v6968_v59 = vcombine.low %v9463_v55, %v9465_v7  ;;  %362 = vst [vmem:[#allocation2 + $0x94] sm:$0x1] %v361_v18  ;;  %v1960_v2 = vshrl.u32 %v9449_v57, 16  ;;  %v1963_v38 = vshll.u32 %v9449_v57, 16  ;;  %v6970_v63 = vcombine.low %v9487_v8, %v9489_v49 }
  0x90   : > { %v573_v51 = vor.u32 %v571_v12, %v570_v29  ;;  %v574_v19 = vrot.slane %v570_v29, 4  ;;  %v1988_v9 = vshrl.u32 %v9459_v25, 16  ;;  %v1991_v11 = vshll.u32 %v9459_v25, 16  ;;  %v9496_v35 = vld [vmem:[#allocation2 + $0x68] sm:$0xf] }
  0x91   : > { %v2002_v53 = vshrl.u32 %v9461_v22, 16  ;;  %v638_v47 = vrot.slane %v9427_v52, 4  ;;  %v2005_v27 = vshll.u32 %v9461_v22, 16  ;;  %v2019_v45 = vshll.u32 %v9463_v55, 16  ;;  %v9503_v14 = vld [vmem:[#allocation2 + $0x70] sm:$0xf] }
  0x92   : > { %v2030_v44 = vshrl.u32 %v9465_v7, 16  ;;  %v2033_v60 = vshll.u32 %v9465_v7, 16  ;;  %v2044_v10 = vshrl.u32 %v9478_v41, 16  ;;  %v2072_v16 = vshrl.u32 %v9487_v8, 16  ;;  %v9509_v24 = vld [vmem:[#allocation2 + $0xc] sm:$0x1] }
  0x93   : > { %v9514_v29 = vld [vmem:[#allocation2 + $0x14] sm:$0x1]  ;;  %v1962_v58 = vrot.slane %v1960_v2, 4  ;;  %v1965_v39 = vrot.slane %v1963_v38, 5  ;;  %v9530_v20 = vld [vmem:[#allocation2 + $0x24] sm:$0x1] }
  0x94   : > { %v716_v37 = vld [vmem:[#allocation2 + $0x40] sm:$0xf]  ;;  %v1990_v3 = vrot.slane %v1988_v9, 4  ;;  %v9538_v61 = vld [vmem:[#allocation2 + $0x34] sm:$0x1]  ;;  %v1983_v38 = vshll.u32 %v9514_v29, 16 }
  0x95   : > { %7765 = vmatmul.mubr.msk.bf16.vlgmr.msra.gmra.mrb[0].mxu0 %vm881_vm6, %v6939_v15  ;;  %v717_v54 = vsel %vm8792_vm5, %v573_v51, %v716_v37  ;;  %v637_v15 = vor.u32 %v635_v42, %v9427_v52  ;;  %v719_v40 = vld [vmem:[#allocation2 + $0x44] sm:$0x1]  ;;  %v2086_v37 = vshrl.u32 %v9489_v49, 16  ;;  %v2089_v52 = vshll.u32 %v9489_v49, 16 }
  0x96   : > { %7781 = vmatpush3.bf16.msra.mxu0 %v9260_v13  ;;  %7768 = vmatprep.mubr.msk.bf16.mxu0 %vm881_vm6, %v6940_v4  ;;  %718 = vst [vmem:[#allocation2 + $0x40] sm:$0xf] %v717_v54  ;;  %v8493_v13 = vld [vmem:[%s11252_s1 + $0x78] sm:$0xff]   ;;  %v764_v4 = vld [vmem:[#allocation2 + $0x90] sm:$0xf]  ;;  %v720_v21 = vsel %vm8748_vm3, %v574_v19, %v719_v40  ;;  %v6971_v54 = vcombine.low %v9496_v35, %v9503_v14  ;;  %v1993_v19 = vrot.slane %v1991_v11, 5 }
  0x97   : > { %7782 = vmatprep.subr.bf16.mxu0 %v8491_v32  ;;  %v765_v56 = vsel %vm8792_vm5, %v637_v15, %v764_v4  ;;  %721 = vst [vmem:[#allocation2 + $0x44] sm:$0x1] %v720_v21  ;;  %v767_v51 = vld [vmem:[#allocation2 + $0x94] sm:$0x1]  ;;  %v1969_v15 = vshll.u32 %v9509_v24, 16  ;;  %v2004_v40 = vrot.slane %v2002_v53, 4  ;;  %v1966_v18 = vor.u32 %v1965_v39, %v1962_v58 }
  0x98   : > { %766 = vst [vmem:[#allocation2 + $0x90] sm:$0xf] %v765_v56  ;;  %v768_v42 = vsel %vm8748_vm3, %v638_v47, %v767_v51  ;;  %v9528_v4 = vld [vmem:[#allocation2 + $0x1c] sm:$0x1]  ;;  %v9534_v56 = vld [vmem:[#allocation2 + $0x80] sm:$0xf] }
  0x99   : > { %769 = vst [vmem:[#allocation2 + $0x94] sm:$0x1] %v768_v42  ;;  %11297 = vst [vmem:[#allocation10_spill] sm:$0xff] %v9534_v56  ;;  %v9536_v21 = vld [vmem:[#allocation2 + $0x2c] sm:$0x1]  ;;  %v2103_v9 = vshll.u32 %v9496_v35, 16 }
  0x9a   : > { %7783 = vmatpush3.bf16.msra.mxu0 %v8491_v32  ;;  %v2075_v32 = vshll.u32 %v9487_v8, 16  ;;  %v1971_v47 = vrot.slane %v1969_v15, 5  ;;  %v2025_v58 = vshll.u32 %v9536_v21, 16  ;;  %v2039_v39 = vshll.u32 %v9538_v61, 16  ;;  %v9609_v11 = vld [vmem:[#allocation2 + $0x6c] sm:$0x1] }
  0x9b   : > { %7784 = vmatprep.subr.bf16.mxu0 %v8492_v62  ;;  %v1967_v51 = vrot.slane %v1966_v18, 4  ;;  %v2109_v28 = vshll.u32 %v9609_v11, 16 }
  0x9d   : > { %7769 = vmatmul.mubr.msk.bf16.gmra.mrb[4].mxu0 %vm881_vm6, %v6941_v43  ;;  %v9451_v43 = vld [vmem:[#allocation2 + $0x10] sm:$0xf]  ;;  %v9485_v31 = vld [vmem:[#allocation2 + $0x40] sm:$0xf] }
  0x9e   : > { %7772 = vmatprep.mubr.msk.bf16.mxu0 %vm881_vm6, %v6942_v17  ;;  %7785 = vmatpush3.bf16.msra.mxu0 %v8492_v62  ;;  %v6966_v48 = vcombine.low %v9449_v57, %v9451_v43  ;;  %v6967_v17 = vcombine.low %v9459_v25, %v9461_v22  ;;  %v1974_v26 = vshrl.u32 %v9451_v43, 16  ;;  %v1977_v50 = vshll.u32 %v9451_v43, 16 }
  0x9f   : > { %7786 = vmatprep.subr.bf16.mxu0 %v8493_v13  ;;  %v6969_v12 = vcombine.low %v9478_v41, %v9485_v31  ;;  %v2058_v42 = vshrl.u32 %v9485_v31, 16  ;;  %v2061_v15 = vshll.u32 %v9485_v31, 16 }
  0xa0   : > { %v1976_v46 = vrot.slane %v1974_v26, 4  ;;  %v1979_v62 = vrot.slane %v1977_v50, 5  ;;  %v2032_v26 = vrot.slane %v2030_v44, 4  ;;  %v2035_v50 = vrot.slane %v2033_v60, 5 }
  0xa1   : > { %v2011_v44 = vshll.u32 %v9530_v20, 16 }
  0xa2   : > { %7787 = vmatpush3.bf16.msra.mxu0 %v8493_v13  ;;  %v8504_v13 = vld [vmem:[%s11252_s1 + $0x98] sm:$0xff]   ;;  %v1980_v2 = vor.u32 %v1979_v62, %v1976_v46  ;;  %v1985_v46 = vrot.slane %v1983_v38, 5  ;;  %v2036_v62 = vor.u32 %v2035_v50, %v2032_v26  ;;  %v2041_v38 = vrot.slane %v2039_v39, 5  ;;  %v271_v39 = vld [vmem:[#allocation2 + $0x48] sm:$0x1] }
  0xa3   : > { %7804 = vmatprep.subr.bf16.mxu0 %v8495_v1  ;;  %v9566_v26 = vld [vmem:[#allocation2 + $0x3c] sm:$0x1]  ;;  %v2046_v50 = vrot.slane %v2044_v10, 4  ;;  %v2074_v10 = vrot.slane %v2072_v16, 4 }
  0xa5   : > { %7773 = vmatmul.mubr.msk.bf16.gmra.mrb[8].mxu0 %vm881_vm6, %v6943_v33  ;;  %v8501_v33 = vld [vmem:[%s11252_s1 + $0x90] sm:$0xff]  }
  0xa6   : > { %7776 = vmatprep.mubr.msk.bf16.mxu0 %vm881_vm6, %v6944_v0  ;;  %v2016_v0 = vshrl.u32 %v9463_v55, 16 }
  0xad   : > { %7777 = vmatmul.mubr.msk.bf16.gmra.mrb[12].mxu0 %vm881_vm6, %v6945_v23  ;;  %v2047_v23 = vshll.u32 %v9478_v41, 16 }
  0xae   : > { %7788 = vmatprep.mubr.msk.bf16.mxu0 %vm881_vm6, %v6966_v48  ;;  %v2007_v48 = vrot.slane %v2005_v27, 5  ;;  %v9550_v27 = vld [vmem:[%s11252_s1 + $0xa0] sm:$0xff]  }
  0xb5   : > { %7789 = vmatmul.mubr.msk.bf16.vlgmr.msra.gmra.mrb[0].mxu0 %vm881_vm6, %v6967_v17  ;;  %v2100_v17 = vshrl.u32 %v9496_v35, 16 }
  0xb6   : > { %7805 = vmatpush3.bf16.msra.mxu0 %v8495_v1  ;;  %7792 = vmatprep.mubr.msk.bf16.mxu0 %vm881_vm6, %v6968_v59  ;;  %v9532_v1 = vld [vmem:[#allocation2 + $0x78] sm:$0xf]  ;;  %v2018_v59 = vrot.slane %v2016_v0, 4  ;;  %v1994_v0 = vor.u32 %v1993_v19, %v1990_v3  ;;  %v9571_v19 = vld [vmem:[#allocation2 + $0x90] sm:$0xf] }
  0xb7   : > { %7806 = vmatprep.subr.bf16.mxu0 %v8498_v6  ;;  %v6972_v60 = vcombine.low %v9532_v1, %v9534_v56  ;;  %11299 = vst [vmem:[#allocation12_spill] sm:$0xff] %v9571_v19 }
  0xba   : > { %7807 = vmatpush3.bf16.msra.mxu0 %v8498_v6  ;;  %v2021_v6 = vrot.slane %v2019_v45, 5  ;;  %v2008_v45 = vor.u32 %v2007_v48, %v2004_v40  ;;  %v9563_v40 = vld [vmem:[#allocation2 + $0x88] sm:$0xf]  ;;  %v1995_v48 = vrot.slane %v1994_v0, 4  ;;  %v1972_v0 = vsel %vm9106_vm10, %v1967_v51, %v1971_v47 }
  0xbb   : > { %7808 = vmatprep.subr.bf16.mxu0 %v8501_v33  ;;  %11298 = vst [vmem:[#allocation11_spill] sm:$0xff] %v9563_v40  ;;  %v2142_v47 = vshrl.u32 %v9534_v56, 16  ;;  %v6973_v51 = vcombine.low %v9563_v40, %v9571_v19 }
  0xbd   : > { %7793 = vmatmul.mubr.msk.bf16.gmra.mrb[4].mxu0 %vm881_vm6, %v6969_v12  ;;  %v2022_v12 = vor.u32 %v2021_v6, %v2018_v59  ;;  %v2009_v6 = vrot.slane %v2008_v45, 4  ;;  %v2037_v45 = vrot.slane %v2036_v62, 4 }
  0xbe   : > { %7796 = vmatprep.mubr.msk.bf16.mxu0 %vm881_vm6, %v6970_v63  ;;  %7809 = vmatpush3.bf16.msra.mxu0 %v8501_v33  ;;  %v1997_v33 = vshll.u32 %v9528_v4, 16  ;;  %v1981_v63 = vrot.slane %v1980_v2, 4  ;;  %v2027_v2 = vrot.slane %v2025_v58, 5  ;;  %v9579_v58 = vld [vmem:[#allocation2 + $0x5c] sm:$0x1] }
  0xbf   : > { %7810 = vmatprep.subr.bf16.mxu0 %v8504_v13  ;;  %v2023_v18 = vrot.slane %v2022_v12, 4  ;;  %v2063_v12 = vrot.slane %v2061_v15, 5 }
  0xc0   : > { %v1999_v59 = vrot.slane %v1997_v33, 5  ;;  %v1986_v33 = vsel %vm9106_vm10, %v1981_v63, %v1985_v46  ;;  %v2088_v63 = vrot.slane %v2086_v37, 4  ;;  %v2145_v46 = vshll.u32 %v9534_v56, 16  ;;  %v9602_v37 = vld [vmem:[#allocation2 + $0x44] sm:$0x1] }
  0xc1   : > { %v6994_v62 = vcombine.low %v1972_v0, %v1986_v33  ;;  %v2028_v3 = vsel %vm9106_vm10, %v2023_v18, %v2027_v2  ;;  %v2042_v0 = vsel %vm9106_vm10, %v2037_v45, %v2041_v38  ;;  %v2081_v33 = vshll.u32 %v9579_v58, 16  ;;  %v9613_v2 = vld [vmem:[#allocation2 + $0x74] sm:$0x1] }
  0xc2   : > { %7811 = vmatpush3.bf16.msra.mxu0 %v8504_v13  ;;  %v2013_v13 = vrot.slane %v2011_v44, 5  ;;  %v2060_v44 = vrot.slane %v2058_v42, 4  ;;  %v2000_v16 = vsel %vm9106_vm10, %v1995_v48, %v1999_v59  ;;  %v9596_v42 = vld [vmem:[#allocation2 + $0x64] sm:$0x1]  ;;  %v2105_v38 = vrot.slane %v2103_v9, 5 }
  0xc3   : > { %7828 = vmatprep.subr.bf16.mxu0 %v9550_v27  ;;  %v2095_v18 = vshll.u32 %v9596_v42, 16 }
  0xc4   : > { %v2014_v15 = vsel %vm9106_vm10, %v2009_v6, %v2013_v13  ;;  %v2064_v48 = vor.u32 %v2063_v12, %v2060_v44  ;;  %v301_v6 = vld [vmem:[#allocation2 + $0x98] sm:$0x1]  ;;  %v2067_v44 = vshll.u32 %v9602_v37, 16  ;;  %v9621_v12 = vld [vmem:[#allocation2 + $0x7c] sm:$0x1] }
  0xc5   : > { %7797 = vmatmul.mubr.msk.bf16.gmra.mrb[8].mxu0 %vm881_vm6, %v6971_v54  ;;  %v2049_v54 = vrot.slane %v2047_v23, 5  ;;  %v2091_v23 = vrot.slane %v2089_v52, 5  ;;  %v272_v52 = vsel %vm8748_vm3, 0, %v271_v39  ;;  %v6995_v45 = vcombine.low %v2000_v16, %v2014_v15 }
  0xc6   : > { %7800 = vmatprep.mubr.msk.bf16.mxu0 %vm881_vm6, %v6972_v60  ;;  %v2077_v60 = vrot.slane %v2075_v32, 5  ;;  %v2053_v32 = vshll.u32 %v9566_v26, 16  ;;  %273 = vst [vmem:[#allocation2 + $0x48] sm:$0x1] %v272_v52  ;;  %v2065_v9 = vrot.slane %v2064_v48, 4 }
  0xc7   : > { %v2050_v53 = vor.u32 %v2049_v54, %v2046_v50  ;;  %v2092_v13 = vor.u32 %v2091_v23, %v2088_v63  ;;  %v2102_v50 = vrot.slane %v2100_v17, 4  ;;  %v302_v17 = vsel %vm8748_vm3, 0, %v301_v6 }
  0xc8   : > { %v2078_v59 = vor.u32 %v2077_v60, %v2074_v10  ;;  %v2055_v54 = vrot.slane %v2053_v32, 5  ;;  %v6996_v10 = vcombine.low %v2028_v3, %v2042_v0  ;;  %v11300_v60 = vshrl.u32 %v9503_v14, 16  ;;  %303 = vst [vmem:[#allocation2 + $0x98] sm:$0x1] %v302_v17 }
  0xc9   : > { %v2051_v23 = vrot.slane %v2050_v53, 4  ;;  %v2093_v16 = vrot.slane %v2092_v13, 4  ;;  %v2097_v32 = vrot.slane %v2095_v18, 5  ;;  %v2106_v15 = vor.u32 %v2105_v38, %v2102_v50  ;;  %v8507_v53 = vld [vmem:[%s11252_s1 + $0xa8] sm:$0xff]  }
  0xca   : > { %v2116_v39 = vrot.slane %v11300_v60, 4  ;;  %v2079_v52 = vrot.slane %v2078_v59, 4  ;;  %v2069_v3 = vrot.slane %v2067_v44, 5  ;;  %v2123_v0 = vshll.u32 %v9613_v2, 16  ;;  %v9638_v59 = vld [vmem:[#allocation2 + $0x84] sm:$0x1] }
  0xcb   : > { %v11302_v60 = vshrl.u32 %v9532_v1, 16  ;;  %v2144_v6 = vrot.slane %v2142_v47, 4  ;;  %v2147_v13 = vrot.slane %v2145_v46, 5  ;;  %v2156_v18 = vshrl.u32 %v9563_v40, 16 }
  0xcc   : > { %v2159_v50 = vshll.u32 %v9563_v40, 16  ;;  %v2170_v38 = vshrl.u32 %v9571_v19, 16  ;;  %v2173_v44 = vshll.u32 %v9571_v19, 16  ;;  %v2056_v17 = vsel %vm9106_vm10, %v2051_v23, %v2055_v54  ;;  %v8508_v54 = vld [vmem:[%s11252_s1 + $0xb0] sm:$0xff]  }
  0xcd   : > { %7801 = vmatmul.mubr.msk.bf16.gmra.mrb[12].mxu0 %vm881_vm6, %v6973_v51  ;;  %v11301_v51 = vshll.u32 %v9503_v14, 16  ;;  %v2130_v56 = vrot.slane %v11302_v60, 4  ;;  %v2098_v47 = vsel %vm9106_vm10, %v2093_v16, %v2097_v32  ;;  %v2111_v46 = vrot.slane %v2109_v28, 5  ;;  %v9660_v16 = vld [vmem:[#allocation2 + $0x8c] sm:$0x1] }
  0xce   : > { %7812 = vmatprep.mubr.msk.bf16.mxu0 %vm881_vm6, %v6994_v62  ;;  %v2083_v62 = vrot.slane %v2081_v33, 5  ;;  %v2137_v33 = vshll.u32 %v9621_v12, 16  ;;  %v2107_v60 = vrot.slane %v2106_v15, 4  ;;  %v2148_v28 = vor.u32 %v2147_v13, %v2144_v6 }
  0xcf   : > { %v2119_v63 = vrot.slane %v11301_v51, 5  ;;  %v11303_v51 = vshll.u32 %v9532_v1, 16  ;;  %v2172_v19 = vrot.slane %v2170_v38, 4  ;;  %v2175_v40 = vrot.slane %v2173_v44, 5 }
  0xd0   : > { %v2165_v13 = vshll.u32 %v9660_v16, 16 }
  0xd1   : > { %v2133_v5 = vrot.slane %v11303_v51, 5  ;;  %v2120_v48 = vor.u32 %v2119_v63, %v2116_v39  ;;  %v2084_v39 = vsel %vm9106_vm10, %v2079_v52, %v2083_v62  ;;  %v2070_v63 = vsel %vm9106_vm10, %v2065_v9, %v2069_v3 }
  0xd2   : > { %v2125_v52 = vrot.slane %v2123_v0, 5  ;;  %v2139_v62 = vrot.slane %v2137_v33, 5  ;;  %v6998_v32 = vcombine.low %v2084_v39, %v2098_v47  ;;  %v2161_v9 = vrot.slane %v2159_v50, 5  ;;  %v8510_v39 = vld [vmem:[%s11252_s1 + $0xc0] sm:$0xff]  }
  0xd3   : > { %v2134_v51 = vor.u32 %v2133_v5, %v2130_v56  ;;  %v2121_v23 = vrot.slane %v2120_v48, 4  ;;  %v8509_v5 = vld [vmem:[%s11252_s1 + $0xb8] sm:$0xff]   ;;  %v2158_v56 = vrot.slane %v2156_v18, 4  ;;  %v2149_v0 = vrot.slane %v2148_v28, 4  ;;  %v9665_v48 = vld [vmem:[#allocation2 + $0x94] sm:$0x1] }
  0xd4   : > { %v2176_v50 = vor.u32 %v2175_v40, %v2172_v19  ;;  %v2179_v38 = vshll.u32 %v9665_v48, 16  ;;  %v7014_v19 = vrot.slane %v9449_v57, 9  ;;  %v2395_v40 = vrot.slane %v9509_v24, 5 }
  0xd5   : > { %7813 = vmatmul.mubr.msk.bf16.vlgmr.msra.gmra.mrb[0].mxu0 %vm881_vm6, %v6995_v45  ;;  %v2151_v45 = vshll.u32 %v9638_v59, 16  ;;  %v2135_v15 = vrot.slane %v2134_v51, 4  ;;  %v2162_v6 = vor.u32 %v2161_v9, %v2158_v56  ;;  %v2126_v18 = vsel %vm9106_vm10, %v2121_v23, %v2125_v52 }
  0xd6   : > { %7829 = vmatpush3.bf16.msra.mxu0 %v9550_v27  ;;  %7816 = vmatprep.mubr.msk.bf16.mxu0 %vm881_vm6, %v6996_v10  ;;  %v333_v27 = vld [vmem:[#allocation2 + $0x4c] sm:$0x1]  ;;  %v6997_v10 = vcombine.low %v2056_v17, %v2070_v63  ;;  %v2167_v63 = vrot.slane %v2165_v13, 5  ;;  %v2177_v51 = vrot.slane %v2176_v50, 4  ;;  %v2399_v23 = vrot.slane %v9514_v29, 5 }
  0xd7   : > { %7830 = vmatprep.subr.bf16.mxu0 %v8507_v53  ;;  %v2153_v3 = vrot.slane %v2151_v45, 5  ;;  %v334_v33 = vsel %vm8976_vm7, 0, %v333_v27  ;;  %v2140_v44 = vsel %vm9106_vm10, %v2135_v15, %v2139_v62  ;;  %v2181_v45 = vrot.slane %v2179_v38, 5  ;;  %v8511_v13 = vld [vmem:[%s11252_s1 + $0xc8] sm:$0xff]  }
  0xd8   : > { %335 = vst [vmem:[#allocation2 + $0x4c] sm:$0x1] %v334_v33  ;;  %v2396_v57 = vsel %vm9282_vm13, %v7014_v19, %v2395_v40  ;;  %v7016_v29 = vrot.slane %v9459_v25, 9  ;;  %v2403_v28 = vrot.slane %v9528_v4, 5  ;;  %v7018_v56 = vrot.slane %v9463_v55, 9 }
  0xd9   : > { %v2154_v17 = vsel %vm9106_vm10, %v2149_v0, %v2153_v3  ;;  %v2182_v62 = vsel %vm9106_vm10, %v2177_v51, %v2181_v45  ;;  %v2411_v9 = vrot.slane %v9536_v21, 5  ;;  %v7019_v3 = vrot.slane %v9465_v7, 9  ;;  %v444_v51 = vld [vmem:[#allocation3 + $0x1c] sm:$0x1] }
  0xda   : > { %7831 = vmatpush3.bf16.msra.mxu0 %v8507_v53  ;;  %v2112_v53 = vsel %vm9106_vm10, %v2107_v60, %v2111_v46  ;;  %v2163_v46 = vrot.slane %v2162_v6, 4  ;;  %v7000_v60 = vcombine.low %v2140_v44, %v2154_v17  ;;  %v2415_v0 = vrot.slane %v9538_v61, 5 }
  0xdb   : > { %7832 = vmatprep.subr.bf16.mxu0 %v8508_v54  ;;  %v6999_v47 = vcombine.low %v2112_v53, %v2126_v18  ;;  %v2404_v25 = vsel %vm9282_vm13, %v7016_v29, %v2403_v28  ;;  %v2412_v55 = vsel %vm9282_vm13, %v7018_v56, %v2411_v9  ;;  %v7020_v7 = vrot.slane %v9478_v41, 9  ;;  %v9788_v56 = vld [vmem:[#allocation2 + $0x20] sm:$0xf]  ;;  %v9790_v9 = vld [vmem:[#allocation2 + $0x28] sm:$0xf] }
  0xdc   : > { %v2168_v52 = vsel %vm9106_vm10, %v2163_v46, %v2167_v63  ;;  %v2416_v4 = vsel %vm9282_vm13, %v7019_v3, %v2415_v0  ;;  %v7021_v61 = vrot.slane %v9485_v31, 9  ;;  %v2423_v33 = vrot.slane %v9602_v37, 5  ;;  %v8513_v46 = vld [vmem:[%s11252_s1 + $0xd8] sm:$0xff]  }
  0xdd   : > { %7817 = vmatmul.mubr.msk.bf16.gmra.mrb[4].mxu0 %vm881_vm6, %v6997_v10  ;;  %v7001_v27 = vcombine.low %v2168_v52, %v2182_v62  ;;  %v7017_v10 = vrot.slane %v9461_v22, 9  ;;  %v7040_v6 = vcombine.low %v2412_v55, %v2416_v4  ;;  %v7022_v53 = vrot.slane %v9487_v8, 9  ;;  %v11306_v52 = vld [vmem:[#allocation11_spill] sm:$0xff]  ;;  %v9794_v3 = vld [vmem:[#allocation2 + $0x38] sm:$0xf] }
  0xde   : > { %7820 = vmatprep.mubr.msk.bf16.mxu0 %vm881_vm6, %v6998_v32  ;;  %7833 = vmatpush3.bf16.msra.mxu0 %v8508_v54  ;;  %v7015_v54 = vrot.slane %v9451_v43, 9  ;;  %v363_v43 = vld [vmem:[#allocation2 + $0x9c] sm:$0x1]  ;;  %v2407_v32 = vrot.slane %v9530_v20, 5  ;;  %v2419_v20 = vrot.slane %v9566_v26, 5  ;;  %v2427_v18 = vrot.slane %v9579_v58, 5 }
  0xdf   : > { %7834 = vmatprep.subr.bf16.mxu0 %v8509_v5  ;;  %v364_v15 = vsel %vm8976_vm7, 0, %v363_v43  ;;  %v7023_v50 = vrot.slane %v9489_v49, 9  ;;  %v2431_v41 = vrot.slane %v9596_v42, 5  ;;  %v2424_v26 = vsel %vm9282_vm13, %v7021_v61, %v2423_v33  ;;  %v8512_v58 = vld [vmem:[%s11252_s1 + $0xd0] sm:$0xff]   ;;  %v11307_v43 = vld [vmem:[#allocation12_spill] sm:$0xff] }
  0xe0   : > { %v2400_v24 = vsel %vm9282_vm13, %v7015_v54, %v2399_v23  ;;  %365 = vst [vmem:[#allocation2 + $0x9c] sm:$0x1] %v364_v15  ;;  %v2408_v22 = vsel %vm9282_vm13, %v7017_v10, %v2407_v32  ;;  %v2420_v31 = vsel %vm9282_vm13, %v7020_v7, %v2419_v20  ;;  %v2428_v8 = vsel %vm9282_vm13, %v7022_v53, %v2427_v18  ;;  %v8515_v54 = vld [vmem:[%s11252_s1 + $0xe0] sm:$0xff]   ;;  %v9780_v32 = vld [vmem:[#allocation2 + $0x10] sm:$0xf] }
  0xe1   : > { %v7039_v21 = vcombine.low %v2404_v25, %v2408_v22  ;;  %v2432_v49 = vsel %vm9282_vm13, %v7023_v50, %v2431_v41  ;;  %v7041_v42 = vcombine.low %v2420_v31, %v2424_v26  ;;  %v7024_v37 = vrot.slane %v9496_v35, 9  ;;  %v11304_v35 = vld [vmem:[#allocation10_spill] sm:$0xff]  ;;  %v9792_v15 = vld [vmem:[#allocation2 + $0x30] sm:$0xf]  ;;  %v8518_v22 = vld [vmem:[%s11252_s1 + $0xe8] sm:$0xff]  }
  0xe2   : > { %7835 = vmatpush3.bf16.msra.mxu0 %v8509_v5  ;;  %v7038_v5 = vcombine.low %v2396_v57, %v2400_v24  ;;  %v2435_v38 = vrot.slane %v9609_v11, 5  ;;  %v7025_v44 = vrot.slane %v9503_v14, 9  ;;  %v2439_v17 = vrot.slane %v9613_v2, 5  ;;  %v9811_v61 = vld [vmem:[#allocation2 + $0x48] sm:$0xf]  ;;  %v8521_v33 = vld [vmem:[%s11252_s1 + $0xf0] sm:$0xff]  }
  0xe3   : > { %7852 = vmatprep.subr.bf16.mxu0 %v8510_v39  ;;  %v7042_v63 = vcombine.low %v2428_v8, %v2432_v49  ;;  %v7027_v45 = vrot.slane %v11304_v35, 9  ;;  %v2447_v11 = vrot.slane %v9638_v59, 5  ;;  %v445_v2 = vsel %vm8976_vm7, 0, %v444_v51  ;;  %v9820_v53 = vld [vmem:[#allocation2 + $0x14] sm:$0x1] }
  0xe4   : > { %v2440_v19 = vsel %vm9282_vm13, %v7025_v44, %v2439_v17  ;;  %446 = vst [vmem:[#allocation3 + $0x1c] sm:$0x1] %v445_v2  ;;  %v7028_v62 = vrot.slane %v11306_v52, 9  ;;  %v2451_v24 = vrot.slane %v9660_v16, 5  ;;  %v7029_v29 = vrot.slane %v11307_v43, 9 }
  0xe5   : > { %7821 = vmatmul.mubr.msk.bf16.gmra.mrb[8].mxu0 %vm881_vm6, %v6999_v47  ;;  %v2443_v47 = vrot.slane %v9621_v12, 5  ;;  %v2436_v12 = vsel %vm9282_vm13, %v7024_v37, %v2435_v38  ;;  %v2448_v40 = vsel %vm9282_vm13, %v7027_v45, %v2447_v11  ;;  %v2455_v28 = vrot.slane %v9665_v48, 5  ;;  %v9822_v18 = vld [vmem:[#allocation2 + $0x1c] sm:$0x1]  ;;  %v9844_v45 = vld [vmem:[#allocation2 + $0x80] sm:$0xf] }
  0xe6   : > { %7824 = vmatprep.mubr.msk.bf16.mxu0 %vm881_vm6, %v7000_v60  ;;  %v384_v60 = vld [vmem:[#allocation3 + $0x18] sm:$0x1]  ;;  %v7043_v23 = vcombine.low %v2436_v12, %v2440_v19  ;;  %v7067_v0 = vcombine.low %v9788_v56, %v9790_v9  ;;  %v7068_v25 = vcombine.low %v9792_v15, %v9794_v3  ;;  %v2895_v55 = vshrl.u32 %v9780_v32, 16  ;;  %v9849_v11 = vld [vmem:[%s11252_s1 + $0x100] sm:$0xff]  }
  0xe7   : > { %v2456_v10 = vsel %vm9282_vm13, %v7029_v29, %v2455_v28  ;;  %v2898_v4 = vshll.u32 %v9780_v32, 16  ;;  %v2923_v8 = vshrl.u32 %v9788_v56, 16  ;;  %v2926_v49 = vshll.u32 %v9788_v56, 16  ;;  %v8524_v37 = vld [vmem:[%s11252_s1 + $0xf8] sm:$0xff]  }
  0xe8   : > { %v2897_v50 = vrot.slane %v2895_v55, 4  ;;  %v2904_v38 = vshll.u32 %v9820_v53, 16  ;;  %v2918_v44 = vshll.u32 %v9822_v18, 16  ;;  %v2937_v17 = vshrl.u32 %v9790_v9, 16 }
  0xe9   : > { %v2900_v41 = vrot.slane %v2898_v4, 5  ;;  %v2951_v51 = vshrl.u32 %v9792_v15, 16  ;;  %v2954_v35 = vshll.u32 %v9792_v15, 16  ;;  %v2928_v2 = vrot.slane %v2926_v49, 5 }
  0xea   : > { %v2965_v12 = vshrl.u32 %v9794_v3, 16  ;;  %v2968_v19 = vshll.u32 %v9794_v3, 16  ;;  %v2939_v28 = vrot.slane %v2937_v17, 4 }
  0xed   : > { %7825 = vmatmul.mubr.msk.bf16.gmra.mrb[12].mxu0 %vm881_vm6, %v7001_v27  ;;  %v2452_v27 = vsel %vm9282_vm13, %v7028_v62, %v2451_v24  ;;  %v9860_v62 = vld [vmem:[#allocation2 + $0x88] sm:$0xf]  ;;  %v2920_v24 = vrot.slane %v2918_v44, 5 }
  0xee   : > { %7836 = vmatprep.mubr.msk.bf16.mxu0 %vm881_vm6, %v7038_v5  ;;  %v9782_v5 = vld [vmem:[#allocation2 + $0x18] sm:$0xf]  ;;  %v7045_v16 = vcombine.low %v2452_v27, %v2456_v10 }
  0xef   : > { %v7066_v48 = vcombine.low %v9780_v32, %v9782_v5  ;;  %v2909_v7 = vshrl.u32 %v9782_v5, 16  ;;  %v2912_v20 = vshll.u32 %v9782_v5, 16 }
  0xf1   : > { %v2911_v31 = vrot.slane %v2909_v7, 4  ;;  %v2914_v26 = vrot.slane %v2912_v20, 5  ;;  %v7072_v20 = vcombine.low %v9844_v45, %v9860_v62 }
  0xf5   : > { %7837 = vmatmul.mubr.msk.bf16.vlgmr.msra.gmra.mrb[0].mxu0 %vm881_vm6, %v7039_v21  ;;  %v9809_v21 = vld [vmem:[#allocation2 + $0x40] sm:$0xf] }
  0xf6   : > { %7853 = vmatpush3.bf16.msra.mxu0 %v8510_v39  ;;  %7840 = vmatprep.mubr.msk.bf16.mxu0 %vm881_vm6, %v7040_v6  ;;  %v7026_v39 = vrot.slane %v9532_v1, 9  ;;  %v385_v1 = vsel %vm8748_vm3, 0, %v384_v60  ;;  %v9816_v6 = vld [vmem:[#allocation2 + $0x60] sm:$0xf]  ;;  %v2915_v60 = vor.u32 %v2914_v26, %v2911_v31  ;;  %v2956_v31 = vrot.slane %v2954_v35, 5 }
  0xf7   : > { %7854 = vmatprep.subr.bf16.mxu0 %v8511_v13  ;;  %386 = vst [vmem:[#allocation3 + $0x18] sm:$0x1] %v385_v1  ;;  %v2925_v1 = vrot.slane %v2923_v8, 4  ;;  %v3010_v52 = vshll.u32 %v9816_v6, 16  ;;  %v2967_v26 = vrot.slane %v2965_v12, 4  ;;  %v2970_v8 = vrot.slane %v2968_v19, 5 }
  0xf8   : > { %v2444_v59 = vsel %vm9282_vm13, %v7026_v39, %v2443_v47  ;;  %v2940_v39 = vshll.u32 %v9790_v9, 16  ;;  %v9837_v47 = vld [vmem:[#allocation2 + $0x70] sm:$0xf]  ;;  %v2916_v29 = vrot.slane %v2915_v60, 4  ;;  %v2993_v60 = vshrl.u32 %v9811_v61, 16 }
  0xf9   : > { %v7044_v57 = vcombine.low %v2444_v59, %v2448_v40  ;;  %v2979_v59 = vshrl.u32 %v9809_v21, 16  ;;  %v2982_v40 = vshll.u32 %v9809_v21, 16  ;;  %v2971_v19 = vor.u32 %v2970_v8, %v2967_v26 }
  0xfa   : > { %7855 = vmatpush3.bf16.msra.mxu0 %v8511_v13  ;;  %v9818_v13 = vld [vmem:[#allocation2 + $0x68] sm:$0xf]  ;;  %v2942_v27 = vrot.slane %v2940_v39, 5  ;;  %v2995_v26 = vrot.slane %v2993_v60, 4  ;;  %v3080_v60 = vshll.u32 %v9860_v62, 16 }
  0xfb   : > { %7856 = vmatprep.subr.bf16.mxu0 %v8512_v58  ;;  %v3021_v10 = vshrl.u32 %v9818_v13, 16  ;;  %v3024_v55 = vshll.u32 %v9818_v13, 16  ;;  %v2972_v4 = vrot.slane %v2971_v19, 4 }
  0xfd   : > { %7841 = vmatmul.mubr.msk.bf16.gmra.mrb[4].mxu0 %vm881_vm6, %v7041_v42  ;;  %v7070_v42 = vcombine.low %v9816_v6, %v9818_v13  ;;  %v3023_v7 = vrot.slane %v3021_v10, 4 }
  0xfe   : > { %7844 = vmatprep.mubr.msk.bf16.mxu0 %vm881_vm6, %v7042_v63  ;;  %7857 = vmatpush3.bf16.msra.mxu0 %v8512_v58  ;;  %v7069_v58 = vcombine.low %v9809_v21, %v9811_v61  ;;  %v2901_v63 = vor.u32 %v2900_v41, %v2897_v50  ;;  %v9877_v50 = vld [vmem:[#allocation2 + $0x98] sm:$0xf]  ;;  %v2953_v41 = vrot.slane %v2951_v51, 4  ;;  %v2996_v51 = vshll.u32 %v9811_v61, 16 }
  0xff   : > { %7858 = vmatprep.subr.bf16.mxu0 %v8513_v46 }
 0x100   : > { %v2902_v43 = vrot.slane %v2901_v63, 4  ;;  %v2957_v12 = vor.u32 %v2956_v31, %v2953_v41  ;;  %v2981_v41 = vrot.slane %v2979_v59, 4  ;;  %v2984_v31 = vrot.slane %v2982_v40, 5 }
 0x101   : > { %v2998_v8 = vrot.slane %v2996_v51, 5  ;;  %v3063_v59 = vshrl.u32 %v9844_v45, 16  ;;  %v3066_v40 = vshll.u32 %v9844_v45, 16 }
 0x102   : > { %7859 = vmatpush3.bf16.msra.mxu0 %v8513_v46  ;;  %v9839_v46 = vld [vmem:[#allocation2 + $0x78] sm:$0xf]  ;;  %v2985_v51 = vor.u32 %v2984_v31, %v2981_v41  ;;  %v11309_v41 = vshll.u32 %v9837_v47, 16 }
 0x103   : > { %7876 = vmatprep.subr.bf16.mxu0 %v8515_v54  ;;  %v3049_v44 = vshrl.u32 %v9839_v46, 16  ;;  %v3052_v35 = vshll.u32 %v9839_v46, 16 }
 0x104   : > { %v3040_v31 = vrot.slane %v11309_v41, 5 }
 0x105   : > { %7845 = vmatmul.mubr.msk.bf16.gmra.mrb[8].mxu0 %vm881_vm6, %v7043_v23  ;;  %v3007_v23 = vshrl.u32 %v9816_v6, 16 }
 0x106   : > { %7848 = vmatprep.mubr.msk.bf16.mxu0 %vm881_vm6, %v7044_v57  ;;  %v2906_v57 = vrot.slane %v2904_v38, 5 }
 0x108   : > { %v2907_v49 = vsel %vm9106_vm10, %v2902_v43, %v2906_v57 }
 0x10d   : > { %7849 = vmatmul.mubr.msk.bf16.gmra.mrb[12].mxu0 %vm881_vm6, %v7045_v16  ;;  %v7071_v16 = vcombine.low %v9837_v47, %v9839_v46 }
 0x10e   : > { %7860 = vmatprep.mubr.msk.bf16.mxu0 %vm881_vm6, %v7066_v48  ;;  %v9865_v48 = vld [vmem:[#allocation2 + $0x90] sm:$0xf] }
 0x115   : > { %7861 = vmatmul.mubr.msk.bf16.vlgmr.msra.gmra.mrb[0].mxu0 %vm881_vm6, %v7067_v0  ;;  %v9867_v0 = vld [vmem:[#allocation2 + $0x2c] sm:$0x1] }
 0x116   : > { %7877 = vmatpush3.bf16.msra.mxu0 %v8515_v54  ;;  %7864 = vmatprep.mubr.msk.bf16.mxu0 %vm881_vm6, %v7068_v25  ;;  %v9856_v54 = vld [vmem:[#allocation2 + $0x24] sm:$0x1]  ;;  %v2929_v25 = vor.u32 %v2928_v2, %v2925_v1  ;;  %v2946_v38 = vshll.u32 %v9867_v0, 16  ;;  %v7073_v1 = vcombine.low %v9865_v48, %v9877_v50 }
 0x117   : > { %7878 = vmatprep.subr.bf16.mxu0 %v8518_v22 }
 0x118   : > { %v2930_v17 = vrot.slane %v2929_v25, 4 }
 0x11a   : > { %7879 = vmatpush3.bf16.msra.mxu0 %v8518_v22  ;;  %v2932_v22 = vshll.u32 %v9856_v54, 16 }
 0x11b   : > { %7880 = vmatprep.subr.bf16.mxu0 %v8521_v33 }
 0x11c   : > { %v2934_v39 = vrot.slane %v2932_v22, 5 }
 0x11d   : > { %7865 = vmatmul.mubr.msk.bf16.gmra.mrb[4].mxu0 %vm881_vm6, %v7069_v58  ;;  %v2921_v58 = vsel %vm9106_vm10, %v2916_v29, %v2920_v24  ;;  %v9897_v24 = vld [vmem:[#allocation2 + $0x44] sm:$0x1]  ;;  %v2948_v29 = vrot.slane %v2946_v38, 5  ;;  %v9905_v38 = vld [vmem:[#allocation2 + $0x4c] sm:$0x1] }
 0x11e   : > { %7868 = vmatprep.mubr.msk.bf16.mxu0 %vm881_vm6, %v7070_v42  ;;  %7881 = vmatpush3.bf16.msra.mxu0 %v8521_v33  ;;  %v9875_v33 = vld [vmem:[#allocation2 + $0x34] sm:$0x1]  ;;  %v2943_v42 = vor.u32 %v2942_v27, %v2939_v28  ;;  %v7094_v2 = vcombine.low %v2907_v49, %v2921_v58  ;;  %v9899_v28 = vld [vmem:[#allocation2 + $0x64] sm:$0x1]  ;;  %v3009_v27 = vrot.slane %v3007_v23, 4  ;;  %v2935_v25 = vsel %vm9106_vm10, %v2930_v17, %v2934_v39 }
 0x11f   : > { %7882 = vmatprep.subr.bf16.mxu0 %v8524_v37  ;;  %v2960_v63 = vshll.u32 %v9875_v33, 16  ;;  %v3026_v49 = vrot.slane %v3024_v55, 5  ;;  %v2958_v58 = vrot.slane %v2957_v12, 4  ;;  %v2988_v23 = vshll.u32 %v9897_v24, 16 }
 0x120   : > { %v2944_v43 = vrot.slane %v2943_v42, 4  ;;  %v3016_v39 = vshll.u32 %v9899_v28, 16  ;;  %v3077_v55 = vshrl.u32 %v9860_v62, 16  ;;  %v2999_v12 = vor.u32 %v2998_v8, %v2995_v26 }
 0x121   : > { %v2962_v22 = vrot.slane %v2960_v63, 5  ;;  %v3027_v63 = vor.u32 %v3026_v49, %v3023_v7  ;;  %v3002_v19 = vshll.u32 %v9905_v38, 16  ;;  %v11308_v7 = vshrl.u32 %v9837_v47, 16 }
 0x122   : > { %7883 = vmatpush3.bf16.msra.mxu0 %v8524_v37  ;;  %v9885_v37 = vld [vmem:[#allocation2 + $0x3c] sm:$0x1]  ;;  %v3018_v34 = vrot.slane %v3016_v39, 5  ;;  %v3054_v26 = vrot.slane %v3052_v35, 5  ;;  %v3068_v39 = vrot.slane %v3066_v40, 5 }
 0x123   : > { %7900 = vmatprep.subr.bf16.mxu0 %v9849_v11  ;;  %v2974_v57 = vshll.u32 %v9885_v37, 16  ;;  %v3037_v49 = vrot.slane %v11308_v7, 4  ;;  %v3028_v14 = vrot.slane %v3027_v63, 4  ;;  %v3082_v63 = vrot.slane %v3080_v60, 5 }
 0x124   : > { %v3091_v7 = vshrl.u32 %v9865_v48, 16  ;;  %v3105_v60 = vshrl.u32 %v9877_v50, 16 }
 0x125   : > { %7869 = vmatmul.mubr.msk.bf16.gmra.mrb[8].mxu0 %vm881_vm6, %v7071_v16  ;;  %v3012_v16 = vrot.slane %v3010_v52, 5  ;;  %v2976_v42 = vrot.slane %v2974_v57, 5  ;;  %v2949_v52 = vsel %vm9106_vm10, %v2944_v43, %v2948_v29  ;;  %v2963_v43 = vsel %vm9106_vm10, %v2958_v58, %v2962_v22 }
 0x126   : > { %7872 = vmatprep.mubr.msk.bf16.mxu0 %vm881_vm6, %v7072_v20  ;;  %v9903_v20 = vld [vmem:[#allocation2 + $0x6c] sm:$0x1]  ;;  %v7095_v57 = vcombine.low %v2935_v25, %v2949_v52  ;;  %v3051_v25 = vrot.slane %v3049_v44, 4  ;;  %v2986_v22 = vrot.slane %v2985_v51, 4  ;;  %v3000_v58 = vrot.slane %v2999_v12, 4 }
 0x127   : > { %v3013_v17 = vor.u32 %v3012_v16, %v3009_v27  ;;  %v3030_v10 = vshll.u32 %v9903_v20, 16  ;;  %v2977_v29 = vsel %vm9106_vm10, %v2972_v4, %v2976_v42  ;;  %v2990_v27 = vrot.slane %v2988_v23, 5  ;;  %v8527_v4 = vld [vmem:[%s11252_s1 + $0x108] sm:$0xff]   ;;  %v9932_v23 = vld [vmem:[#allocation2 + $0x7c] sm:$0x1] }
 0x128   : > { %v7096_v8 = vcombine.low %v2963_v43, %v2977_v29  ;;  %v3004_v42 = vrot.slane %v3002_v19, 5  ;;  %v9934_v52 = vld [vmem:[#allocation2 + $0x84] sm:$0x1]  ;;  %v3094_v44 = vshll.u32 %v9865_v48, 16  ;;  %v9941_v51 = vld [vmem:[#allocation2 + $0x8c] sm:$0x1]  ;;  %v3055_v40 = vor.u32 %v3054_v26, %v3051_v25 }
 0x129   : > { %v3014_v16 = vrot.slane %v3013_v17, 4  ;;  %v3065_v17 = vrot.slane %v3063_v59, 4  ;;  %v3041_v59 = vor.u32 %v3040_v31, %v3037_v49  ;;  %v3108_v19 = vshll.u32 %v9877_v50, 16 }
 0x12a   : > { %v3086_v49 = vshll.u32 %v9941_v51, 16  ;;  %v3056_v26 = vrot.slane %v3055_v40, 4 }
 0x12b   : > { %v3019_v35 = vsel %vm9106_vm10, %v3014_v16, %v3018_v34  ;;  %v2991_v34 = vsel %vm9106_vm10, %v2986_v22, %v2990_v27  ;;  %v3069_v29 = vor.u32 %v3068_v39, %v3065_v17  ;;  %v3072_v16 = vshll.u32 %v9934_v52, 16  ;;  %v9963_v22 = vld [vmem:[#allocation2 + $0x94] sm:$0x1] }
 0x12c   : > { %v3042_v25 = vrot.slane %v3041_v59, 4  ;;  %v3107_v17 = vrot.slane %v3105_v60, 4  ;;  %v3110_v39 = vrot.slane %v3108_v19, 5 }
 0x12d   : > { %7873 = vmatmul.mubr.msk.bf16.gmra.mrb[12].mxu0 %vm881_vm6, %v7073_v1  ;;  %v3032_v1 = vrot.slane %v3030_v10, 5  ;;  %v3079_v10 = vrot.slane %v3077_v55, 4  ;;  %v3058_v55 = vshll.u32 %v9932_v23, 16 }
 0x12e   : > { %7884 = vmatprep.mubr.msk.bf16.mxu0 %vm881_vm6, %v7094_v2  ;;  %v9925_v2 = vld [vmem:[#allocation2 + $0x74] sm:$0x1]  ;;  %v3111_v40 = vor.u32 %v3110_v39, %v3107_v17  ;;  %v7118_v17 = vrot.slane %v9792_v15, 9  ;;  %v3346_v39 = vrot.slane %v9875_v33, 5 }
 0x12f   : > { %v3044_v43 = vshll.u32 %v9925_v2, 16  ;;  %v3033_v12 = vsel %vm9106_vm10, %v3028_v14, %v3032_v1  ;;  %v8528_v14 = vld [vmem:[%s11252_s1 + $0x110] sm:$0xff]   ;;  %v3083_v1 = vor.u32 %v3082_v63, %v3079_v10  ;;  %v3060_v27 = vrot.slane %v3058_v55, 5 }
 0x130   : > { %v3070_v10 = vrot.slane %v3069_v29, 4  ;;  %v3074_v63 = vrot.slane %v3072_v16, 5 }
 0x131   : > { %v3046_v41 = vrot.slane %v3044_v43, 5  ;;  %v3088_v43 = vrot.slane %v3086_v49, 5 }
 0x132   : > { %v3075_v60 = vsel %vm9106_vm10, %v3070_v10, %v3074_v63  ;;  %v7119_v10 = vrot.slane %v9794_v3, 9  ;;  %v3350_v63 = vrot.slane %v9885_v37, 5  ;;  %v7120_v3 = vrot.slane %v9809_v21, 9 }
 0x133   : > { %v3047_v59 = vsel %vm9106_vm10, %v3042_v25, %v3046_v41  ;;  %v7115_v41 = vrot.slane %v9782_v5, 9  ;;  %v7116_v5 = vrot.slane %v9788_v56, 9  ;;  %v3354_v37 = vrot.slane %v9897_v24, 5 }
 0x134   : > { %v3351_v15 = vsel %vm9282_vm13, %v7119_v10, %v3350_v63  ;;  %v450_v63 = vld [vmem:[#allocation3 + $0x2c] sm:$0x1] }
 0x135   : > { %7885 = vmatmul.mubr.msk.bf16.vlgmr.msra.gmra.mrb[0].mxu0 %vm881_vm6, %v7095_v57  ;;  %v3005_v57 = vsel %vm9106_vm10, %v3000_v58, %v3004_v42  ;;  %v3093_v58 = vrot.slane %v3091_v7, 4  ;;  %v3096_v42 = vrot.slane %v3094_v44, 5  ;;  %v3061_v7 = vsel %vm9106_vm10, %v3056_v26, %v3060_v27 }
 0x136   : > { %7901 = vmatpush3.bf16.msra.mxu0 %v9849_v11  ;;  %7888 = vmatprep.mubr.msk.bf16.mxu0 %vm881_vm6, %v7096_v8  ;;  %v7098_v11 = vcombine.low %v3019_v35, %v3033_v12  ;;  %v7097_v31 = vcombine.low %v2991_v34, %v3005_v57  ;;  %v8529_v8 = vld [vmem:[%s11252_s1 + $0x118] sm:$0xff]   ;;  %v3084_v35 = vrot.slane %v3083_v1, 4  ;;  %v7099_v34 = vcombine.low %v3047_v59, %v3061_v7 }
 0x137   : > { %7902 = vmatprep.subr.bf16.mxu0 %v8527_v4  ;;  %v9965_v12 = vld [vmem:[#allocation2 + $0x9c] sm:$0x1]  ;;  %v3097_v44 = vor.u32 %v3096_v42, %v3093_v58  ;;  %v3112_v1 = vrot.slane %v3111_v40, 4  ;;  %v7117_v58 = vrot.slane %v9790_v9, 9  ;;  %v3342_v42 = vrot.slane %v9867_v0, 5 }
 0x138   : > { %v3114_v55 = vshll.u32 %v9965_v12, 16  ;;  %v3089_v19 = vsel %vm9106_vm10, %v3084_v35, %v3088_v43  ;;  %v7121_v35 = vrot.slane %v9811_v61, 9  ;;  %v3358_v43 = vrot.slane %v9905_v38, 5 }
 0x139   : > { %v7100_v29 = vcombine.low %v3075_v60, %v3089_v19  ;;  %v3098_v16 = vrot.slane %v3097_v44, 4  ;;  %v3343_v9 = vsel %vm9282_vm13, %v7117_v58, %v3342_v42  ;;  %v7122_v59 = vrot.slane %v9816_v6, 9  ;;  %v456_v58 = vld [vmem:[#allocation3 + $0x3c] sm:$0x1] }
 0x13a   : > { %7903 = vmatpush3.bf16.msra.mxu0 %v8527_v4  ;;  %v3100_v4 = vshll.u32 %v9963_v22, 16  ;;  %v3116_v49 = vrot.slane %v3114_v55, 5  ;;  %v7123_v7 = vrot.slane %v9818_v13, 9  ;;  %v3366_v44 = vrot.slane %v9903_v20, 5 }
 0x13b   : > { %7904 = vmatprep.subr.bf16.mxu0 %v8528_v14  ;;  %v3355_v21 = vsel %vm9282_vm13, %v7120_v3, %v3354_v37  ;;  %v3359_v61 = vsel %vm9282_vm13, %v7121_v35, %v3358_v43  ;;  %v7124_v13 = vrot.slane %v9837_v47, 9  ;;  %v3370_v38 = vrot.slane %v9925_v2, 5  ;;  %v8530_v3 = vld [vmem:[%s11254_s3] sm:$0xff]   ;;  %v393_v37 = vld [vmem:[#allocation3 + $0x30] sm:$0x1] }
 0x13c   : > { %v3102_v57 = vrot.slane %v3100_v4, 5  ;;  %v3117_v26 = vsel %vm9106_vm10, %v3112_v1, %v3116_v49  ;;  %v3362_v4 = vrot.slane %v9899_v28, 5  ;;  %v3367_v6 = vsel %vm9282_vm13, %v7123_v7, %v3366_v44  ;;  %7924 = vmatprep.subr.bf16.mxu1 %v8530_v3  ;;  %v453_v35 = vld [vmem:[#allocation3 + $0x34] sm:$0x1]  ;;  %v474_v7 = vld [vmem:[#allocation3 + $0x6c] sm:$0x1] }
 0x13d   : > { %7889 = vmatmul.mubr.msk.bf16.gmra.mrb[4].mxu0 %vm881_vm6, %v7097_v31  ;;  %v3334_v31 = vrot.slane %v9822_v18, 5  ;;  %v7141_v28 = vcombine.low %v3355_v21, %v3359_v61  ;;  %v7125_v40 = vrot.slane %v9839_v46, 9  ;;  %v3374_v55 = vrot.slane %v9932_v23, 5  ;;  %7925 = vmatpush3.bf16.msra.mxu1 %v8530_v3  ;;  %v8532_v44 = vld [vmem:[%s11254_s3 + $0x10] sm:$0xff]  }
 0x13e   : > { %7892 = vmatprep.mubr.msk.bf16.mxu0 %vm881_vm6, %v7098_v11  ;;  %7905 = vmatpush3.bf16.msra.mxu0 %v8528_v14  ;;  %v7114_v14 = vrot.slane %v9780_v32, 9  ;;  %v3330_v11 = vrot.slane %v9820_v53, 5  ;;  %v3103_v25 = vsel %vm9106_vm10, %v3098_v16, %v3102_v57  ;;  %v3363_v24 = vsel %vm9282_vm13, %v7122_v59, %v3362_v4  ;;  %v414_v4 = vld [vmem:[#allocation3 + $0x68] sm:$0x1] }
 0x13f   : > { %7906 = vmatprep.subr.bf16.mxu0 %v8529_v8  ;;  %v3335_v32 = vsel %vm9282_vm13, %v7115_v41, %v3334_v31  ;;  %v7101_v53 = vcombine.low %v3103_v25, %v3117_v26  ;;  %v7142_v20 = vcombine.low %v3363_v24, %v3367_v6  ;;  %v7126_v60 = vrot.slane %v9844_v45, 9  ;;  %v387_v31 = vld [vmem:[#allocation3 + $0x20] sm:$0x1]  ;;  %v447_v25 = vld [vmem:[#allocation3 + $0x24] sm:$0x1] }
 0x140   : > { %v3331_v27 = vsel %vm9282_vm13, %v7114_v14, %v3330_v11  ;;  %v3378_v19 = vrot.slane %v9934_v52, 5  ;;  %v3382_v57 = vrot.slane %v9941_v51, 5  ;;  %v3371_v47 = vsel %vm9282_vm13, %v7124_v13, %v3370_v38  ;;  %v438_v11 = vld [vmem:[#allocation3 + $0xc] sm:$0x1]  ;;  %v408_v24 = vld [vmem:[#allocation3 + $0x58] sm:$0x1] }
 0x141   : > { %v7138_v18 = vcombine.low %v3331_v27, %v3335_v32  ;;  %v3375_v46 = vsel %vm9282_vm13, %v7125_v40, %v3374_v55  ;;  %v3386_v51 = vrot.slane %v9963_v22, 5  ;;  %v3390_v16 = vrot.slane %v9965_v12, 5  ;;  %v381_v32 = vld [vmem:[#allocation3 + $0x10] sm:$0x1]  ;;  %v468_v6 = vld [vmem:[#allocation3 + $0x5c] sm:$0x1] }
 0x142   : > { %7907 = vmatpush3.bf16.msra.mxu0 %v8529_v8  ;;  %v3338_v8 = vrot.slane %v9856_v54, 5  ;;  %v3347_v54 = vsel %vm9282_vm13, %v7118_v17, %v3346_v39  ;;  %v3379_v2 = vsel %vm9282_vm13, %v7126_v60, %v3378_v19  ;;  %v7143_v23 = vcombine.low %v3371_v47, %v3375_v46  ;;  %v390_v39 = vld [vmem:[#allocation3 + $0x28] sm:$0x1]  ;;  %v477_v40 = vld [vmem:[#allocation3 + $0x74] sm:$0x1]  ;;  %v8533_v60 = vld [vmem:[%s11254_s3 + $0x18] sm:$0xff]  }
 0x143   : > { %v7140_v33 = vcombine.low %v3347_v54, %v3351_v15  ;;  %v439_v12 = vsel %vm8976_vm7, 0, %v438_v11  ;;  %v388_v26 = vsel %vm8748_vm3, 0, %v387_v31  ;;  %v448_v27 = vsel %vm8976_vm7, 0, %v447_v25  ;;  %v411_v19 = vld [vmem:[#allocation3 + $0x60] sm:$0x1] }
 0x144   : > { %v3339_v56 = vsel %vm9282_vm13, %v7116_v5, %v3338_v8  ;;  %440 = vst [vmem:[#allocation3 + $0xc] sm:$0x1] %v439_v12  ;;  %389 = vst [vmem:[#allocation3 + $0x20] sm:$0x1] %v388_v26  ;;  %v382_v5 = vsel %vm8748_vm3, 0, %v381_v32  ;;  %v457_v17 = vsel %vm8976_vm7, 0, %v456_v58 }
 0x145   : > { %7893 = vmatmul.mubr.msk.bf16.gmra.mrb[8].mxu0 %vm881_vm6, %v7099_v34  ;;  %v7139_v0 = vcombine.low %v3339_v56, %v3343_v9  ;;  %v7127_v34 = vrot.slane %v9860_v62, 9  ;;  %v7128_v62 = vrot.slane %v9865_v48, 9  ;;  %v378_v48 = vld [vmem:[#allocation3 + $0x8] sm:$0x1]  ;;  %449 = vst [vmem:[#allocation3 + $0x24] sm:$0x1] %v448_v27 }
 0x146   : > { %7896 = vmatprep.mubr.msk.bf16.mxu0 %vm881_vm6, %v7100_v29  ;;  %v7129_v29 = vrot.slane %v9877_v50, 9  ;;  %v379_v50 = vsel %vm8748_vm3, 0, %v378_v48  ;;  %383 = vst [vmem:[#allocation3 + $0x10] sm:$0x1] %v382_v5  ;;  %v396_v8 = vld [vmem:[#allocation3 + $0x38] sm:$0x1] }
 0x147   : > { %v3383_v45 = vsel %vm9282_vm13, %v7127_v34, %v3382_v57  ;;  %v3387_v1 = vsel %vm9282_vm13, %v7128_v62, %v3386_v51  ;;  %380 = vst [vmem:[#allocation3 + $0x8] sm:$0x1] %v379_v50  ;;  %v397_v42 = vsel %vm8748_vm3, 0, %v396_v8  ;;  %458 = vst [vmem:[#allocation3 + $0x3c] sm:$0x1] %v457_v17  ;;  %v391_v10 = vsel %vm8748_vm3, 0, %v390_v39 }
 0x148   : > { %v7144_v52 = vcombine.low %v3379_v2, %v3383_v45  ;;  %v3391_v49 = vsel %vm9282_vm13, %v7129_v29, %v3390_v16  ;;  %398 = vst [vmem:[#allocation3 + $0x38] sm:$0x1] %v397_v42  ;;  %392 = vst [vmem:[#allocation3 + $0x28] sm:$0x1] %v391_v10  ;;  %v399_v56 = vld [vmem:[#allocation3 + $0x40] sm:$0x1] }
 0x149   : > { %v7145_v14 = vcombine.low %v3387_v1, %v3391_v49  ;;  %v459_v9 = vld [vmem:[#allocation3 + $0x44] sm:$0x1]  ;;  %v451_v54 = vsel %vm8976_vm7, 0, %v450_v63  ;;  %v400_v15 = vsel %vm8748_vm3, 0, %v399_v56  ;;  %v394_v43 = vsel %vm8748_vm3, 0, %v393_v37 }
 0x14a   : > { %452 = vst [vmem:[#allocation3 + $0x2c] sm:$0x1] %v451_v54  ;;  %401 = vst [vmem:[#allocation3 + $0x40] sm:$0x1] %v400_v15  ;;  %v454_v59 = vsel %vm8976_vm7, 0, %v453_v35  ;;  %v415_v21 = vsel %vm8748_vm3, 0, %v414_v4 }
 0x14b   : > { %395 = vst [vmem:[#allocation3 + $0x30] sm:$0x1] %v394_v43  ;;  %455 = vst [vmem:[#allocation3 + $0x34] sm:$0x1] %v454_v59  ;;  %v475_v61 = vsel %vm8976_vm7, 0, %v474_v7  ;;  %v469_v13 = vsel %vm8976_vm7, 0, %v468_v6 }
 0x14c   : > { %416 = vst [vmem:[#allocation3 + $0x68] sm:$0x1] %v415_v21  ;;  %476 = vst [vmem:[#allocation3 + $0x6c] sm:$0x1] %v475_v61  ;;  %v478_v55 = vsel %vm8976_vm7, 0, %v477_v40  ;;  %v412_v47 = vsel %vm8748_vm3, 0, %v411_v19 }
 0x14d   : > { %7897 = vmatmul.mubr.msk.bf16.gmra.mrb[12].mxu0 %vm881_vm6, %v7101_v53  ;;  %v441_v53 = vld [vmem:[#allocation3 + $0x14] sm:$0x1]  ;;  %470 = vst [vmem:[#allocation3 + $0x5c] sm:$0x1] %v469_v13  ;;  %479 = vst [vmem:[#allocation3 + $0x74] sm:$0x1] %v478_v55 }
 0x14e   : > { %7908 = vmatprep.mubr.msk.bf16.mxu0 %vm881_vm6, %v7138_v18  ;;  %v442_v18 = vsel %vm8976_vm7, 0, %v441_v53  ;;  %v471_v34 = vld [vmem:[#allocation3 + $0x64] sm:$0x1]  ;;  %v375_v57 = vld [vmem:[#allocation3] sm:$0x1] }
 0x14f   : > { %443 = vst [vmem:[#allocation3 + $0x14] sm:$0x1] %v442_v18  ;;  %v472_v46 = vsel %vm8976_vm7, 0, %v471_v34  ;;  %v376_v2 = vsel %vm8748_vm3, 0, %v375_v57  ;;  %413 = vst [vmem:[#allocation3 + $0x60] sm:$0x1] %v412_v47 }
 0x150   : > { %473 = vst [vmem:[#allocation3 + $0x64] sm:$0x1] %v472_v46  ;;  %377 = vst [vmem:[#allocation3] sm:$0x1] %v376_v2  ;;  %v426_v45 = vld [vmem:[#allocation3 + $0x88] sm:$0x1] }
 0x151   : > { %v486_v62 = vld [vmem:[#allocation3 + $0x8c] sm:$0x1]  ;;  %v480_v16 = vld [vmem:[#allocation3 + $0x7c] sm:$0x1]  ;;  %v429_v49 = vld [vmem:[#allocation3 + $0x90] sm:$0x1] }
 0x152   : > { %v487_v51 = vsel %vm8976_vm7, 0, %v486_v62  ;;  %v481_v1 = vsel %vm8976_vm7, 0, %v480_v16  ;;  %v489_v48 = vld [vmem:[#allocation3 + $0x94] sm:$0x1]  ;;  %v435_v50 = vld [vmem:[#allocation3 + $0x4] sm:$0x1] }
 0x153   : > { %488 = vst [vmem:[#allocation3 + $0x8c] sm:$0x1] %v487_v51  ;;  %482 = vst [vmem:[#allocation3 + $0x7c] sm:$0x1] %v481_v1  ;;  %v490_v11 = vsel %vm8976_vm7, 0, %v489_v48  ;;  %v436_v25 = vsel %vm8976_vm7, 0, %v435_v50 }
 0x154   : > { %491 = vst [vmem:[#allocation3 + $0x94] sm:$0x1] %v490_v11  ;;  %v423_v12 = vld [vmem:[#allocation3 + $0x80] sm:$0x1]  ;;  %v483_v31 = vld [vmem:[#allocation3 + $0x84] sm:$0x1] }
 0x155   : > { %7909 = vmatmul.mubr.msk.bf16.vlgmr.msra.gmra.mrb[0].mxu0 %vm881_vm6, %v7139_v0  ;;  %v460_v0 = vsel %vm8976_vm7, 0, %v459_v9  ;;  %v424_v26 = vsel %vm8748_vm3, 0, %v423_v12  ;;  %v484_v27 = vsel %vm8976_vm7, 0, %v483_v31  ;;  %437 = vst [vmem:[#allocation3 + $0x4] sm:$0x1] %v436_v25  ;;  %v10137_v32 = vld [vmem:[%s11254_s3 + $0x20] sm:$0xff]  }
 0x156   : > { %7912 = vmatprep.mubr.msk.bf16.mxu0 %vm881_vm6, %v7140_v33  ;;  %461 = vst [vmem:[#allocation3 + $0x44] sm:$0x1] %v460_v0  ;;  %v8531_v33 = vld [vmem:[%s11254_s3 + $0x8] sm:$0xff]   ;;  %425 = vst [vmem:[#allocation3 + $0x80] sm:$0x1] %v424_v26  ;;  %v8570_v41 = vld [vmem:[%s11254_s3 + $0xc0] sm:$0xff]  }
 0x157   : > { %7926 = vmatprep.subr.bf16.mxu1 %v8531_v33  ;;  %485 = vst [vmem:[#allocation3 + $0x84] sm:$0x1] %v484_v27  ;;  %v405_v53 = vld [vmem:[#allocation3 + $0x50] sm:$0x1]  ;;  %v465_v18 = vld [vmem:[#allocation3 + $0x54] sm:$0x1] }
 0x158   : > { %7927 = vmatpush3.bf16.msra.mxu1 %v8531_v33  ;;  %v406_v5 = vsel %vm8748_vm3, 0, %v405_v53  ;;  %v466_v8 = vsel %vm8976_vm7, 0, %v465_v18  ;;  %v10147_v58 = vld [vmem:[%s11253_s2] ss:$0 sm:$0xff]  ;;  %v3839_v13 = vld [vmem:[#allocation3 + $0x18] sm:$0xf] }
 0x159   : > { %7928 = vmatprep.subr.bf16.mxu1 %v8532_v44  ;;  %407 = vst [vmem:[#allocation3 + $0x50] sm:$0x1] %v406_v5  ;;  %467 = vst [vmem:[#allocation3 + $0x54] sm:$0x1] %v466_v8  ;;  %v3827_v16 = vld [vmem:[#allocation3 + $0x8] sm:$0xf] }
 0x15a   : > { %v3830_v1 = vld [vmem:[#allocation3 + $0xc] sm:$0x1]  ;;  %v3845_v50 = vld [vmem:[#allocation3 + $0x20] sm:$0xf]  ;;  %v3848_v12 = vld [vmem:[#allocation3 + $0x24] sm:$0x1] }
 0x15b   : > { %v3833_v8 = vld [vmem:[#allocation3 + $0x10] sm:$0xf] }
 0x15c   : > { %7929 = vmatpush3.bf16.msra.mxu1 %v8532_v44 }
 0x15d   : > { %7913 = vmatmul.mubr.msk.bf16.gmra.mrb[4].mxu0 %vm881_vm6, %v7141_v28  ;;  %v409_v28 = vsel %vm8748_vm3, 0, %v408_v24  ;;  %7930 = vmatprep.subr.bf16.mxu1 %v8533_v60 }
 0x15e   : > { %7916 = vmatprep.mubr.msk.bf16.mxu0 %vm881_vm6, %v7142_v20  ;;  %v417_v20 = vld [vmem:[#allocation3 + $0x70] sm:$0x1]  ;;  %410 = vst [vmem:[#allocation3 + $0x58] sm:$0x1] %v409_v28 }
 0x15f   : > { %v418_v38 = vsel %vm8748_vm3, 0, %v417_v20  ;;  %v3842_v20 = vld [vmem:[#allocation3 + $0x1c] sm:$0x1] }
 0x160   : > { %419 = vst [vmem:[#allocation3 + $0x70] sm:$0x1] %v418_v38  ;;  %7931 = vmatpush3.bf16.msra.mxu1 %v8533_v60 }
 0x161   : > { %7948 = vmatprep.subr.bf16.mxu1 %v10137_v32 }
 0x165   : > { %7917 = vmatmul.mubr.msk.bf16.gmra.mrb[8].mxu0 %vm881_vm6, %v7143_v23  ;;  %v427_v23 = vsel %vm8748_vm3, 0, %v426_v45 }
 0x166   : > { %7920 = vmatprep.mubr.msk.bf16.mxu0 %vm881_vm6, %v7144_v52  ;;  %v420_v52 = vld [vmem:[#allocation3 + $0x78] sm:$0x1]  ;;  %428 = vst [vmem:[#allocation3 + $0x88] sm:$0x1] %v427_v23 }
 0x167   : > { %v421_v29 = vsel %vm8748_vm3, 0, %v420_v52 }
 0x168   : > { %422 = vst [vmem:[#allocation3 + $0x78] sm:$0x1] %v421_v29 }
 0x16d   : > { %7921 = vmatmul.mubr.msk.bf16.gmra.mrb[12].mxu0 %vm881_vm6, %v7145_v14  ;;  %v430_v14 = vsel %vm8748_vm3, 0, %v429_v49 }
 0x16e   : > { %431 = vst [vmem:[#allocation3 + $0x90] sm:$0x1] %v430_v14 }
 0x228   : > { %v7910_v42 = vpop.f32.mrb[0].mxu0 }
 0x229   : > { %v8140_v17 = vadd.f32 %v7910_v42, %v10147_v58  ;;  %v3507_v39 = vpop.f32.mrb[1].mxu0  ;;  %v3836_v42 = vld [vmem:[#allocation3 + $0x14] sm:$0x1] }
 0x22a   : > { %v8141_v10 = vadd.f32 %v10147_v58, %v3507_v39  ;;  %v7911_v63 = vpop.f32.mrb[2].mxu0 }
 0x22b   : > { %v3588_v56 = vmul.f32 0.01, %v8140_v17  ;;  %v8142_v9 = vadd.f32 %v7911_v63, %v10147_v58  ;;  %v3510_v54 = vpop.f32.mrb[3].mxu0 }
 0x22c   : > { %v3586_v15 = vmul.f32 0.01, %v8141_v10  ;;  %v8143_v0 = vadd.f32 %v10147_v58, %v3510_v54 }
 0x22d   : > { %v3604_v3 = vmax.f32 %v8140_v17, %v3588_v56  ;;  %v3589_v33 = vmul.f32 0.01, %v8142_v9 }
 0x22e   : > { %v3602_v37 = vmax.f32 %v8141_v10, %v3586_v15  ;;  %v3587_v35 = vmul.f32 0.01, %v8143_v0 }
 0x22f   : > { %v7476_v43 = vpack.c.bf16 %v3604_v3, %v3604_v3  ;;  %v3605_v59 = vmax.f32 %v8142_v9, %v3589_v33 }
 0x230   : > { %v7474_v4 = vpack.c.bf16 %v3602_v37, %v3602_v37  ;;  %v3603_v7 = vmax.f32 %v8143_v0, %v3587_v35  ;;  %v7914_v44 = vpop.f32.mrb[4].mxu0 }
 0x231   : > { %v3683_v21 = vshrl.u32 %v7476_v43, 16  ;;  %v3686_v61 = vshll.u32 %v7476_v43, 16  ;;  %v7477_v24 = vpack.c.bf16 %v3605_v59, %v3605_v59  ;;  %v8144_v6 = vadd.f32 %v7914_v44, %v10147_v58  ;;  %v3523_v28 = vpop.f32.mrb[5].mxu0 }
 0x232   : > { %v3667_v38 = vshrl.u32 %v7474_v4, 16  ;;  %v3670_v40 = vshll.u32 %v7474_v4, 16  ;;  %v7475_v55 = vpack.c.bf16 %v3603_v7, %v3603_v7  ;;  %v8145_v60 = vadd.f32 %v10147_v58, %v3523_v28  ;;  %v7915_v19 = vpop.f32.mrb[6].mxu0 }
 0x233   : > { %v3685_v34 = vrot.slane %v3683_v21, 7  ;;  %v3691_v57 = vshrl.u32 %v7477_v24, 16  ;;  %v3694_v47 = vshll.u32 %v7477_v24, 16  ;;  %v3592_v46 = vmul.f32 0.01, %v8144_v6  ;;  %v3526_v2 = vpop.f32.mrb[7].mxu0 }
 0x234   : > { %v3669_v45 = vrot.slane %v3667_v38, 7  ;;  %v3675_v23 = vshrl.u32 %v7475_v55, 16  ;;  %v3678_v62 = vshll.u32 %v7475_v55, 16  ;;  %v3590_v52 = vmul.f32 0.01, %v8145_v60 }
 0x235   : > { %v3688_v51 = vor.u32 %v3686_v61, %v3685_v34  ;;  %v3689_v29 = vrot.slane %v3685_v34, 4  ;;  %v3693_v49 = vrot.slane %v3691_v57, 7  ;;  %v3608_v14 = vmax.f32 %v8144_v6, %v3592_v46  ;;  %v3863_v24 = vld [vmem:[#allocation3 + $0x38] sm:$0xf]  ;;  %v3854_v57 = vld [vmem:[#allocation3 + $0x2c] sm:$0x1] }
 0x236   : > { %v3672_v48 = vor.u32 %v3670_v40, %v3669_v45  ;;  %v3673_v11 = vrot.slane %v3669_v45, 4  ;;  %v3677_v31 = vrot.slane %v3675_v23, 7  ;;  %v3606_v25 = vmax.f32 %v8145_v60, %v3590_v52  ;;  %v3866_v40 = vld [vmem:[#allocation3 + $0x3c] sm:$0x1]  ;;  %v3851_v60 = vld [vmem:[#allocation3 + $0x28] sm:$0xf] }
 0x237   : > { %v3840_v27 = vsel %vm8792_vm5, %v3688_v51, %v3839_v13  ;;  %v3843_v53 = vsel %vm8748_vm3, %v3689_v29, %v3842_v20  ;;  %v3696_v5 = vor.u32 %v3694_v47, %v3693_v49  ;;  %v3697_v18 = vrot.slane %v3693_v49, 4 }
 0x238   : > { %3841 = vst [vmem:[#allocation3 + $0x18] sm:$0xf] %v3840_v27  ;;  %3844 = vst [vmem:[#allocation3 + $0x1c] sm:$0x1] %v3843_v53  ;;  %v3828_v17 = vsel %vm8792_vm5, %v3672_v48, %v3827_v16  ;;  %v3831_v39 = vsel %vm8748_vm3, %v3673_v11, %v3830_v1  ;;  %v3680_v10 = vor.u32 %v3678_v62, %v3677_v31  ;;  %v3681_v63 = vrot.slane %v3677_v31, 4  ;;  %v7918_v56 = vpop.f32.mrb[8].mxu0 }
 0x239   : > { %3829 = vst [vmem:[#allocation3 + $0x8] sm:$0xf] %v3828_v17  ;;  %3832 = vst [vmem:[#allocation3 + $0xc] sm:$0x1] %v3831_v39  ;;  %v3846_v9 = vsel %vm8792_vm5, %v3696_v5, %v3845_v50  ;;  %v3849_v54 = vsel %vm8748_vm3, %v3697_v18, %v3848_v12  ;;  %v7480_v15 = vpack.c.bf16 %v3608_v14, %v3608_v14  ;;  %v3539_v3 = vpop.f32.mrb[9].mxu0 }
 0x23a   : > { %v7478_v0 = vpack.c.bf16 %v3606_v25, %v3606_v25  ;;  %3847 = vst [vmem:[#allocation3 + $0x20] sm:$0xf] %v3846_v9  ;;  %3850 = vst [vmem:[#allocation3 + $0x24] sm:$0x1] %v3849_v54  ;;  %v3834_v33 = vsel %vm8792_vm5, %v3680_v10, %v3833_v8  ;;  %v3837_v37 = vsel %vm8748_vm3, %v3681_v63, %v3836_v42  ;;  %v7919_v59 = vpop.f32.mrb[10].mxu0 }
 0x23b   : > { %v8146_v35 = vadd.f32 %v7915_v19, %v10147_v58  ;;  %v8147_v43 = vadd.f32 %v10147_v58, %v3526_v2  ;;  %3835 = vst [vmem:[#allocation3 + $0x10] sm:$0xf] %v3834_v33  ;;  %3838 = vst [vmem:[#allocation3 + $0x14] sm:$0x1] %v3837_v37  ;;  %v3715_v4 = vshrl.u32 %v7480_v15, 16  ;;  %v3718_v7 = vshll.u32 %v7480_v15, 16 }
 0x23c   : > { %v3699_v44 = vshrl.u32 %v7478_v0, 16  ;;  %v3702_v21 = vshll.u32 %v7478_v0, 16  ;;  %v3542_v61 = vpop.f32.mrb[11].mxu0  ;;  %v8148_v13 = vadd.f32 %v7918_v56, %v10147_v58  ;;  %v8149_v20 = vadd.f32 %v10147_v58, %v3539_v3  ;;  %v3869_v8 = vld [vmem:[#allocation3 + $0x40] sm:$0xf] }
 0x23d   : > { %v3593_v6 = vmul.f32 0.01, %v8146_v35  ;;  %v3591_v28 = vmul.f32 0.01, %v8147_v43  ;;  %v3717_v38 = vrot.slane %v3715_v4, 7  ;;  %v8150_v19 = vadd.f32 %v7919_v59, %v10147_v58 }
 0x23e   : > { %v3701_v55 = vrot.slane %v3699_v44, 7  ;;  %v8151_v34 = vadd.f32 %v10147_v58, %v3542_v61  ;;  %v3596_v2 = vmul.f32 0.01, %v8148_v13  ;;  %v3594_v45 = vmul.f32 0.01, %v8149_v20 }
 0x23f   : > { %v3609_v47 = vmax.f32 %v8146_v35, %v3593_v6  ;;  %v3607_v46 = vmax.f32 %v8147_v43, %v3591_v28  ;;  %v3720_v23 = vor.u32 %v3718_v7, %v3717_v38  ;;  %v3721_v62 = vrot.slane %v3717_v38, 4  ;;  %v3872_v9 = vld [vmem:[#allocation3 + $0x44] sm:$0x1]  ;;  %v3857_v15 = vld [vmem:[#allocation3 + $0x30] sm:$0xf] }
 0x240   : > { %v3704_v52 = vor.u32 %v3702_v21, %v3701_v55  ;;  %v3705_v51 = vrot.slane %v3701_v55, 4  ;;  %v3612_v1 = vmax.f32 %v8148_v13, %v3596_v2  ;;  %v3610_v49 = vmax.f32 %v8149_v20, %v3594_v45  ;;  %v7922_v14 = vpop.f32.mrb[12].mxu0  ;;  %v3860_v33 = vld [vmem:[#allocation3 + $0x34] sm:$0x1]  ;;  %v10197_v45 = vld [vmem:[#allocation3] sm:$0xf] }
 0x241   : > { %v7481_v29 = vpack.c.bf16 %v3609_v47, %v3609_v47  ;;  %v7479_v16 = vpack.c.bf16 %v3607_v46, %v3607_v46  ;;  %v3864_v48 = vsel %vm8792_vm5, %v3720_v23, %v3863_v24  ;;  %v3867_v11 = vsel %vm8748_vm3, %v3721_v62, %v3866_v40  ;;  %v3555_v31 = vpop.f32.mrb[13].mxu0  ;;  %v3887_v24 = vld [vmem:[#allocation3 + $0x68] sm:$0xf]  ;;  %v3878_v47 = vld [vmem:[#allocation3 + $0x5c] sm:$0x1] }
 0x242   : > { %v3852_v50 = vsel %vm8792_vm5, %v3704_v52, %v3851_v60  ;;  %v3855_v12 = vsel %vm8748_vm3, %v3705_v51, %v3854_v57  ;;  %3865 = vst [vmem:[#allocation3 + $0x38] sm:$0xf] %v3864_v48  ;;  %3868 = vst [vmem:[#allocation3 + $0x3c] sm:$0x1] %v3867_v11  ;;  %v10185_v18 = vpop.f32.mrb[14].mxu0  ;;  %v7484_v42 = vpack.c.bf16 %v3612_v1, %v3612_v1 }
 0x243   : > { %3853 = vst [vmem:[#allocation3 + $0x28] sm:$0xf] %v3852_v50  ;;  %3856 = vst [vmem:[#allocation3 + $0x2c] sm:$0x1] %v3855_v12  ;;  %v3723_v25 = vshrl.u32 %v7481_v29, 16  ;;  %v3726_v27 = vshll.u32 %v7481_v29, 16  ;;  %v7482_v17 = vpack.c.bf16 %v3610_v49, %v3610_v49  ;;  %v8152_v0 = vadd.f32 %v7922_v14, %v10147_v58 }
 0x244   : > { %v3707_v53 = vshrl.u32 %v7479_v16, 16  ;;  %v3710_v5 = vshll.u32 %v7479_v16, 16  ;;  %v3597_v39 = vmul.f32 0.01, %v8150_v19  ;;  %v3595_v10 = vmul.f32 0.01, %v8151_v34 }
 0x245   : > { %v3558_v63 = vpop.f32.mrb[15].mxu0  ;;  %v3725_v56 = vrot.slane %v3723_v25, 7  ;;  %v8153_v3 = vadd.f32 %v10147_v58, %v3555_v31  ;;  %v3747_v37 = vshrl.u32 %v7484_v42, 16  ;;  %v3750_v35 = vshll.u32 %v7484_v42, 16  ;;  %v3890_v60 = vld [vmem:[#allocation3 + $0x6c] sm:$0x1] }
 0x246   : > { %v3709_v54 = vrot.slane %v3707_v53, 7  ;;  %v3731_v43 = vshrl.u32 %v7482_v17, 16  ;;  %v3734_v59 = vshll.u32 %v7482_v17, 16  ;;  %v3613_v28 = vmax.f32 %v8150_v19, %v3597_v39  ;;  %v3875_v57 = vld [vmem:[#allocation3 + $0x58] sm:$0xf] }
 0x247   : > { %v3728_v4 = vor.u32 %v3726_v27, %v3725_v56  ;;  %v3729_v7 = vrot.slane %v3725_v56, 4  ;;  %v3749_v61 = vrot.slane %v3747_v37, 7  ;;  %v3611_v13 = vmax.f32 %v8151_v34, %v3595_v10  ;;  %v10207_v14 = vld [vmem:[#allocation3 + $0x8] sm:$0xf]  ;;  %v3893_v31 = vld [vmem:[#allocation3 + $0x70] sm:$0xf] }
 0x248   : > { %v3712_v44 = vor.u32 %v3710_v5, %v3709_v54  ;;  %v3713_v21 = vrot.slane %v3709_v54, 4  ;;  %v3733_v6 = vrot.slane %v3731_v43, 7  ;;  %v7485_v23 = vpack.c.bf16 %v3613_v28, %v3613_v28  ;;  %v3896_v25 = vld [vmem:[#allocation3 + $0x74] sm:$0x1]  ;;  %v3881_v10 = vld [vmem:[#allocation3 + $0x60] sm:$0xf] }
 0x249   : > { %v3870_v20 = vsel %vm8792_vm5, %v3728_v4, %v3869_v8  ;;  %v3873_v38 = vsel %vm8748_vm3, %v3729_v7, %v3872_v9  ;;  %v3752_v19 = vor.u32 %v3750_v35, %v3749_v61  ;;  %v3753_v34 = vrot.slane %v3749_v61, 4  ;;  %v3884_v9 = vld [vmem:[#allocation3 + $0x64] sm:$0x1]  ;;  %v10216_v4 = vld [vmem:[#allocation3 + $0x10] sm:$0xf] }
 0x24a   : > { %v3858_v40 = vsel %vm8792_vm5, %v3712_v44, %v3857_v15  ;;  %v3861_v55 = vsel %vm8748_vm3, %v3713_v21, %v3860_v33  ;;  %3871 = vst [vmem:[#allocation3 + $0x40] sm:$0xf] %v3870_v20  ;;  %3874 = vst [vmem:[#allocation3 + $0x44] sm:$0x1] %v3873_v38  ;;  %v3736_v46 = vor.u32 %v3734_v59, %v3733_v6  ;;  %v3737_v2 = vrot.slane %v3733_v6, 4 }
 0x24b   : > { %3859 = vst [vmem:[#allocation3 + $0x30] sm:$0xf] %v3858_v40  ;;  %3862 = vst [vmem:[#allocation3 + $0x34] sm:$0x1] %v3861_v55  ;;  %v7483_v62 = vpack.c.bf16 %v3611_v13, %v3611_v13  ;;  %v3600_v52 = vmul.f32 0.01, %v8152_v0  ;;  %v3888_v29 = vsel %vm8792_vm5, %v3752_v19, %v3887_v24  ;;  %v3891_v16 = vsel %vm8748_vm3, %v3753_v34, %v3890_v60 }
 0x24c   : > { %v3598_v51 = vmul.f32 0.01, %v8153_v3  ;;  %v3876_v1 = vsel %vm8792_vm5, %v3736_v46, %v3875_v57  ;;  %v3879_v49 = vsel %vm8748_vm3, %v3737_v2, %v3878_v47  ;;  %3889 = vst [vmem:[#allocation3 + $0x68] sm:$0xf] %v3888_v29  ;;  %3892 = vst [vmem:[#allocation3 + $0x6c] sm:$0x1] %v3891_v16  ;;  %v8154_v5 = vadd.f32 %v10185_v18, %v10147_v58 }
 0x24d   : > { %3877 = vst [vmem:[#allocation3 + $0x58] sm:$0xf] %v3876_v1  ;;  %3880 = vst [vmem:[#allocation3 + $0x5c] sm:$0x1] %v3879_v49  ;;  %v3755_v48 = vshrl.u32 %v7485_v23, 16  ;;  %v3758_v11 = vshll.u32 %v7485_v23, 16  ;;  %v3616_v27 = vmax.f32 %v8152_v0, %v3600_v52  ;;  %v8155_v8 = vadd.f32 %v10147_v58, %v3558_v63 }
 0x24e   : > { %v3739_v50 = vshrl.u32 %v7483_v62, 16  ;;  %v4172_v12 = vshrl.u32 %v10197_v45, 16  ;;  %v3614_v53 = vmax.f32 %v8153_v3, %v3598_v51  ;;  %v3742_v39 = vshll.u32 %v7483_v62, 16  ;;  %v3911_v24 = vld [vmem:[#allocation3 + $0x88] sm:$0xf] }
 0x24f   : > { %v3757_v42 = vrot.slane %v3755_v48, 7  ;;  %v7175_v56 = vcombine.low %v10197_v45, %v10207_v14  ;;  %v7488_v54 = vpack.c.bf16 %v3616_v27, %v3616_v27  ;;  %v3601_v33 = vmul.f32 0.01, %v8154_v5  ;;  %v3914_v6 = vld [vmem:[#allocation3 + $0x8c] sm:$0x1]  ;;  %v8541_v27 = vld [vmem:[%s11254_s3 + $0x30] sm:$0xff]  }
 0x250   : > { %v3741_v17 = vrot.slane %v3739_v50, 7  ;;  %v7486_v15 = vpack.c.bf16 %v3614_v53, %v3614_v53  ;;  %v3599_v37 = vmul.f32 0.01, %v8155_v8  ;;  %v10226_v40 = vld [vmem:[#allocation3 + $0x18] sm:$0xf]  ;;  %v4175_v47 = vshll.u32 %v10197_v45, 16 }
 0x251   : > { %v3760_v35 = vor.u32 %v3758_v11, %v3757_v42  ;;  %v3761_v0 = vrot.slane %v3757_v42, 4  ;;  %7932 = vmatprep.mubr.msk.bf16.mxu1 %vm881_vm6, %v7175_v56  ;;  %v3779_v18 = vshrl.u32 %v7488_v54, 16  ;;  %v3782_v58 = vshll.u32 %v7488_v54, 16  ;;  %v10228_v55 = vld [vmem:[#allocation3 + $0x50] sm:$0xf]  ;;  %v8538_v34 = vld [vmem:[%s11254_s3 + $0x28] sm:$0xff]  }
 0x252   : > { %v3744_v3 = vor.u32 %v3742_v39, %v3741_v17  ;;  %v3745_v43 = vrot.slane %v3741_v17, 4  ;;  %v3763_v63 = vshrl.u32 %v7486_v15, 16  ;;  %v3766_v59 = vshll.u32 %v7486_v15, 16  ;;  %v3899_v60 = vld [vmem:[#allocation3 + $0x78] sm:$0xf] }
 0x253   : > { %v3894_v7 = vsel %vm8792_vm5, %v3760_v35, %v3893_v31  ;;  %v3897_v44 = vsel %vm8748_vm3, %v3761_v0, %v3896_v25  ;;  %v3781_v28 = vrot.slane %v3779_v18, 7  ;;  %v3617_v20 = vmax.f32 %v8154_v5, %v3601_v33  ;;  %v3902_v57 = vld [vmem:[#allocation3 + $0x7c] sm:$0x1]  ;;  %v3917_v53 = vld [vmem:[#allocation3 + $0x90] sm:$0xf] }
 0x254   : > { %v3882_v21 = vsel %vm8792_vm5, %v3744_v3, %v3881_v10  ;;  %v3885_v61 = vsel %vm8748_vm3, %v3745_v43, %v3884_v9  ;;  %3895 = vst [vmem:[#allocation3 + $0x70] sm:$0xf] %v3894_v7  ;;  %3898 = vst [vmem:[#allocation3 + $0x74] sm:$0x1] %v3897_v44  ;;  %v3765_v13 = vrot.slane %v3763_v63, 7  ;;  %v3615_v38 = vmax.f32 %v8155_v8, %v3599_v37  ;;  %v8544_v43 = vld [vmem:[%s11254_s3 + $0x38] sm:$0xff]  }
 0x255   : > { %3883 = vst [vmem:[#allocation3 + $0x60] sm:$0xf] %v3882_v21  ;;  %3886 = vst [vmem:[#allocation3 + $0x64] sm:$0x1] %v3885_v61  ;;  %v7176_v19 = vcombine.low %v10216_v4, %v10226_v40  ;;  %v3784_v46 = vor.u32 %v3782_v58, %v3781_v28  ;;  %v3785_v2 = vrot.slane %v3781_v28, 4  ;;  %v7489_v52 = vpack.c.bf16 %v3617_v20, %v3617_v20 }
 0x256   : > { %v3768_v23 = vor.u32 %v3766_v59, %v3765_v13  ;;  %v3769_v62 = vrot.slane %v3765_v13, 4  ;;  %v7487_v51 = vpack.c.bf16 %v3615_v38, %v3615_v38  ;;  %v4284_v29 = vshrl.u32 %v10228_v55, 16  ;;  %v3920_v5 = vld [vmem:[#allocation3 + $0x94] sm:$0x1]  ;;  %v3905_v8 = vld [vmem:[#allocation3 + $0x80] sm:$0xf] }
 0x257   : > { %7933 = vmatmul.mubr.msk.bf16.vlgmr.msra.gmra.mrb[0].mxu1 %vm881_vm6, %v7176_v19  ;;  %v4287_v16 = vshll.u32 %v10228_v55, 16  ;;  %v3912_v1 = vsel %vm8792_vm5, %v3784_v46, %v3911_v24  ;;  %v3915_v49 = vsel %vm8748_vm3, %v3785_v2, %v3914_v6  ;;  %v3787_v50 = vshrl.u32 %v7489_v52, 16  ;;  %v10253_v10 = vld [vmem:[#allocation3 + $0x28] sm:$0xf]  ;;  %v3908_v56 = vld [vmem:[#allocation3 + $0x84] sm:$0x1] }
 0x258   : > { %v3900_v48 = vsel %vm8792_vm5, %v3768_v23, %v3899_v60  ;;  %v3903_v11 = vsel %vm8748_vm3, %v3769_v62, %v3902_v57  ;;  %7949 = vmatpush3.bf16.msra.mxu1 %v10137_v32  ;;  %3913 = vst [vmem:[#allocation3 + $0x88] sm:$0xf] %v3912_v1  ;;  %3916 = vst [vmem:[#allocation3 + $0x8c] sm:$0x1] %v3915_v49  ;;  %v3771_v31 = vshrl.u32 %v7487_v51, 16  ;;  %v4174_v25 = vrot.slane %v4172_v12, 4 }
 0x259   : > { %3901 = vst [vmem:[#allocation3 + $0x78] sm:$0xf] %v3900_v48  ;;  %3904 = vst [vmem:[#allocation3 + $0x7c] sm:$0x1] %v3903_v11  ;;  %7950 = vmatprep.subr.bf16.mxu1 %v8538_v34  ;;  %v3789_v42 = vrot.slane %v3787_v50, 7  ;;  %v3790_v17 = vshll.u32 %v7489_v52, 16 }
 0x25a   : > { %v3773_v32 = vrot.slane %v3771_v31, 7  ;;  %v3774_v39 = vshll.u32 %v7487_v51, 16  ;;  %v4177_v9 = vrot.slane %v4175_v47, 5  ;;  %v4186_v54 = vshrl.u32 %v10207_v14, 16  ;;  %v10256_v3 = vld [vmem:[#allocation3 + $0x20] sm:$0xf] }
 0x25b   : > { %v4286_v12 = vrot.slane %v4284_v29, 4  ;;  %v4289_v15 = vrot.slane %v4287_v16, 5  ;;  %v3792_v33 = vor.u32 %v3790_v17, %v3789_v42  ;;  %v3793_v37 = vrot.slane %v3789_v42, 4  ;;  %v10266_v7 = vld [vmem:[#allocation3 + $0x30] sm:$0xf]  ;;  %v10288_v47 = vld [vmem:[%s11254_s3 + $0x40] sm:$0xff]  }
 0x25c   : > { %7951 = vmatpush3.bf16.msra.mxu1 %v8538_v34  ;;  %v3776_v35 = vor.u32 %v3774_v39, %v3773_v32  ;;  %v3777_v0 = vrot.slane %v3773_v32, 4  ;;  %v4189_v18 = vshll.u32 %v10207_v14, 16  ;;  %v4200_v58 = vshrl.u32 %v10216_v4, 16  ;;  %v10276_v6 = vld [vmem:[#allocation3 + $0x58] sm:$0xf] }
 0x25d   : > { %7952 = vmatprep.subr.bf16.mxu1 %v8541_v27  ;;  %v4203_v63 = vshll.u32 %v10216_v4, 16  ;;  %v7177_v59 = vcombine.low %v10256_v3, %v10253_v10  ;;  %v3918_v44 = vsel %vm8792_vm5, %v3792_v33, %v3917_v53  ;;  %v3921_v21 = vsel %vm8748_vm3, %v3793_v37, %v3920_v5  ;;  %v3931_v28 = vld [vmem:[#allocation3 + $0x4] sm:$0x1]  ;;  %v10281_v60 = vld [vmem:[#allocation3 + $0x38] sm:$0xf] }
 0x25e   : > { %v3906_v61 = vsel %vm8792_vm5, %v3776_v35, %v3905_v8  ;;  %v3909_v24 = vsel %vm8748_vm3, %v3777_v0, %v3908_v56  ;;  %3919 = vst [vmem:[#allocation3 + $0x90] sm:$0xf] %v3918_v44  ;;  %3922 = vst [vmem:[#allocation3 + $0x94] sm:$0x1] %v3921_v21  ;;  %v4178_v13 = vor.u32 %v4177_v9, %v4174_v25  ;;  %v4214_v20 = vshrl.u32 %v10226_v40, 16 }
 0x25f   : > { %3907 = vst [vmem:[#allocation3 + $0x80] sm:$0xf] %v3906_v61  ;;  %3910 = vst [vmem:[#allocation3 + $0x84] sm:$0x1] %v3909_v24  ;;  %v4217_v38 = vshll.u32 %v10226_v40, 16  ;;  %7936 = vmatprep.mubr.msk.bf16.mxu1 %vm881_vm6, %v7177_v59  ;;  %v4181_v26 = vshll.u32 %v3931_v28, 16  ;;  %v7178_v57 = vcombine.low %v10266_v7, %v10281_v60  ;;  %v4290_v34 = vor.u32 %v4289_v15, %v4286_v12 }
 0x260   : > { %7953 = vmatpush3.bf16.msra.mxu1 %v8541_v27  ;;  %v10290_v19 = vld [vmem:[#allocation3 + $0x54] sm:$0x1]  ;;  %v4188_v46 = vrot.slane %v4186_v54, 4  ;;  %v4191_v2 = vrot.slane %v4189_v18, 5  ;;  %v7179_v23 = vcombine.low %v10228_v55, %v10276_v6  ;;  %v4202_v52 = vrot.slane %v4200_v58, 4 }
 0x261   : > { %7954 = vmatprep.subr.bf16.mxu1 %v8544_v43  ;;  %v4293_v62 = vshll.u32 %v10290_v19, 16  ;;  %v4205_v51 = vrot.slane %v4203_v63, 5  ;;  %7937 = vmatmul.mubr.msk.bf16.gmra.mrb[4].mxu1 %vm881_vm6, %v7178_v57  ;;  %v10296_v29 = vrot.slane %v4178_v13, 4  ;;  %v4216_v16 = vrot.slane %v4214_v20, 4  ;;  %v10299_v49 = vld [vmem:[#allocation3 + $0x60] sm:$0xf] }
 0x262   : > { %v4219_v1 = vrot.slane %v4217_v38, 5  ;;  %7940 = vmatprep.mubr.msk.bf16.mxu1 %vm881_vm6, %v7179_v23  ;;  %v10301_v48 = vrot.slane %v4181_v26, 5  ;;  %v7223_v11 = vrot.slane %v10197_v45, 9  ;;  %v10304_v50 = vld [vmem:[#allocation3 + $0x78] sm:$0xf]  ;;  %v4607_v31 = vrot.slane %v3931_v28, 5 }
 0x263   : > { %v4192_v25 = vor.u32 %v4191_v2, %v4188_v46  ;;  %v10307_v27 = vld [vmem:[#allocation3 + $0x68] sm:$0xf]  ;;  %v10309_v53 = vld [vmem:[#allocation3 + $0xc] sm:$0x1]  ;;  %v10311_v5 = vrot.slane %v4290_v34, 4  ;;  %v10313_v8 = vrot.slane %v4293_v62, 5  ;;  %v4206_v42 = vor.u32 %v4205_v51, %v4202_v52 }
 0x264   : > { %7955 = vmatpush3.bf16.msra.mxu1 %v8544_v43  ;;  %v4242_v17 = vshrl.u32 %v10253_v10, 16  ;;  %v4245_v32 = vshll.u32 %v10253_v10, 16  ;;  %v7180_v45 = vcombine.low %v10299_v49, %v10307_v27  ;;  %v10319_v39 = vld [vmem:[#allocation3 + $0x70] sm:$0xf]  ;;  %v4220_v56 = vor.u32 %v4219_v1, %v4216_v16  ;;  %v10344_v59 = vld [vmem:[#allocation3 + $0x14] sm:$0x1] }
 0x265   : > { %7972 = vmatprep.subr.bf16.mxu1 %v10288_v47  ;;  %v7181_v9 = vcombine.low %v10319_v39, %v10304_v50  ;;  %v4184_v54 = vsel %vm9106_vm10, %v10296_v29, %v10301_v48  ;;  %v4228_v12 = vshrl.u32 %v10256_v3, 16  ;;  %v4231_v15 = vshll.u32 %v10256_v3, 16  ;;  %v10346_v44 = vld [vmem:[#allocation3 + $0x1c] sm:$0x1]  ;;  %v10355_v34 = vld [vmem:[#allocation3 + $0x2c] sm:$0x1] }
 0x266   : > { %v4195_v33 = vshll.u32 %v10309_v53, 16  ;;  %v10332_v37 = vsel %vm9282_vm13, %v7223_v11, %v4607_v31  ;;  %v4193_v35 = vrot.slane %v4192_v25, 4  ;;  %v10340_v58 = vrot.slane %v4206_v42, 4  ;;  %v10352_v38 = vld [vmem:[#allocation3 + $0x80] sm:$0xf] }
 0x267   : > { %v4244_v21 = vrot.slane %v4242_v17, 4  ;;  %v4247_v61 = vrot.slane %v4245_v32, 5  ;;  %v4221_v24 = vrot.slane %v4220_v56, 4  ;;  %v4256_v28 = vshrl.u32 %v10266_v7, 16  ;;  %v10360_v51 = vld [vmem:[#allocation3 + $0x88] sm:$0xf] }
 0x268   : > { %v4259_v13 = vshll.u32 %v10266_v7, 16  ;;  %v4270_v20 = vshrl.u32 %v10281_v60, 16  ;;  %v4273_v26 = vshll.u32 %v10281_v60, 16  ;;  %v4197_v57 = vrot.slane %v4195_v33, 5  ;;  %v10368_v11 = vld [vmem:[#allocation3 + $0x24] sm:$0x1] }
 0x269   : > { %7941 = vmatmul.mubr.msk.bf16.gmra.mrb[8].mxu1 %vm881_vm6, %v7180_v45  ;;  %v4230_v46 = vrot.slane %v4228_v12, 4  ;;  %v4233_v2 = vrot.slane %v4231_v15, 5  ;;  %v4298_v23 = vshrl.u32 %v10276_v6, 16  ;;  %v4301_v62 = vshll.u32 %v10276_v6, 16  ;;  %v10379_v18 = vld [vmem:[#allocation3 + $0x3c] sm:$0x1] }
 0x26a   : > { %7944 = vmatprep.mubr.msk.bf16.mxu1 %vm881_vm6, %v7181_v9  ;;  %v4312_v52 = vshrl.u32 %v10299_v49, 16  ;;  %v4209_v29 = vshll.u32 %v10344_v59, 16  ;;  %v4315_v16 = vshll.u32 %v10299_v49, 16  ;;  %v7182_v1 = vcombine.low %v10352_v38, %v10360_v51 }
 0x26b   : > { %v4198_v48 = vsel %vm9106_vm10, %v4193_v35, %v4197_v57  ;;  %v4248_v31 = vor.u32 %v4247_v61, %v4244_v21  ;;  %v4326_v25 = vshrl.u32 %v10307_v27, 16  ;;  %v4329_v42 = vshll.u32 %v10307_v27, 16  ;;  %v10376_v57 = vld [vmem:[#allocation3 + $0x34] sm:$0x1] }
 0x26c   : > { %v4223_v32 = vshll.u32 %v10346_v44, 16  ;;  %v4234_v45 = vor.u32 %v4233_v2, %v4230_v46  ;;  %v4251_v56 = vshll.u32 %v10355_v34, 16  ;;  %v4258_v9 = vrot.slane %v4256_v28, 4 }
 0x26d   : > { %v4261_v12 = vrot.slane %v4259_v13, 5  ;;  %v7203_v15 = vcombine.low %v4184_v54, %v4198_v48  ;;  %v4211_v33 = vrot.slane %v4209_v29, 5  ;;  %v4237_v35 = vshll.u32 %v10368_v11, 16 }
 0x26e   : > { %v4272_v21 = vrot.slane %v4270_v20, 4  ;;  %v4249_v61 = vrot.slane %v4248_v31, 4  ;;  %v4275_v63 = vrot.slane %v4273_v26, 5  ;;  %v4300_v43 = vrot.slane %v4298_v23, 4  ;;  %v10391_v31 = vld [vmem:[#allocation3 + $0x5c] sm:$0x1] }
 0x26f   : > { %v4303_v0 = vrot.slane %v4301_v62, 5  ;;  %v4343_v46 = vshll.u32 %v10319_v39, 16  ;;  %v4354_v28 = vshrl.u32 %v10304_v50, 16  ;;  %v4212_v54 = vsel %vm9106_vm10, %v10340_v58, %v4211_v33  ;;  %v8547_v23 = vld [vmem:[%s11254_s3 + $0x48] sm:$0xff]  }
 0x270   : > { %v4225_v13 = vrot.slane %v4223_v32, 5  ;;  %v4235_v20 = vrot.slane %v4234_v45, 4  ;;  %v4253_v2 = vrot.slane %v4251_v56, 5  ;;  %v4262_v29 = vor.u32 %v4261_v12, %v4258_v9 }
 0x271   : > { %7945 = vmatmul.mubr.msk.bf16.gmra.mrb[12].mxu1 %vm881_vm6, %v7182_v1  ;;  %v4265_v1 = vshll.u32 %v10376_v57, 16  ;;  %v4357_v26 = vshll.u32 %v10304_v50, 16  ;;  %v4239_v62 = vrot.slane %v4237_v35, 5  ;;  %v4279_v48 = vshll.u32 %v10379_v18, 16 }
 0x272   : > { %7956 = vmatprep.mubr.msk.bf16.mxu1 %vm881_vm6, %v7203_v15  ;;  %v4226_v15 = vsel %vm9106_vm10, %v4221_v24, %v4225_v13  ;;  %v4254_v58 = vsel %vm9106_vm10, %v4249_v61, %v4253_v2  ;;  %v4276_v32 = vor.u32 %v4275_v63, %v4272_v21  ;;  %v4304_v45 = vor.u32 %v4303_v0, %v4300_v43 }
 0x273   : > { %v4368_v56 = vshrl.u32 %v10352_v38, 16  ;;  %v4371_v9 = vshll.u32 %v10352_v38, 16  ;;  %v4385_v12 = vshll.u32 %v10360_v51, 16  ;;  %v7204_v33 = vcombine.low %v4212_v54, %v4226_v15 }
 0x274   : > { %v4240_v35 = vsel %vm9106_vm10, %v4235_v20, %v4239_v62  ;;  %v4263_v24 = vrot.slane %v4262_v29, 4  ;;  %v4267_v13 = vrot.slane %v4265_v1, 5  ;;  %v4307_v61 = vshll.u32 %v10391_v31, 16  ;;  %v10409_v20 = vld [vmem:[#allocation3 + $0x64] sm:$0x1] }
 0x275   : > { %v7205_v63 = vcombine.low %v4240_v35, %v4254_v58  ;;  %v4281_v0 = vrot.slane %v4279_v48, 5  ;;  %v4314_v43 = vrot.slane %v4312_v52, 4  ;;  %v4317_v21 = vrot.slane %v4315_v16, 5 }
 0x276   : > { %v4277_v2 = vrot.slane %v4276_v32, 4  ;;  %v4305_v17 = vrot.slane %v4304_v45, 4  ;;  %v4356_v54 = vrot.slane %v4354_v28, 4  ;;  %v4359_v15 = vrot.slane %v4357_v26, 5  ;;  %v8548_v28 = vld [vmem:[%s11254_s3 + $0x50] sm:$0xff]  }
 0x277   : > { %v4328_v29 = vrot.slane %v4326_v25, 4  ;;  %v4331_v1 = vrot.slane %v4329_v42, 5  ;;  %v4611_v62 = vrot.slane %v10309_v53, 5  ;;  %v4615_v48 = vrot.slane %v10344_v59, 5  ;;  %v10422_v32 = vld [vmem:[#allocation3 + $0x7c] sm:$0x1] }
 0x278   : > { %v4268_v52 = vsel %vm9106_vm10, %v4263_v24, %v4267_v13  ;;  %v4309_v16 = vrot.slane %v4307_v61, 5  ;;  %v11313_v26 = vshrl.u32 %v10319_v39, 16  ;;  %v4345_v25 = vrot.slane %v4343_v46, 5 }
 0x279   : > { %7957 = vmatmul.mubr.msk.bf16.vlgmr.msra.gmra.mrb[0].mxu1 %vm881_vm6, %v7204_v33  ;;  %v4318_v42 = vor.u32 %v4317_v21, %v4314_v43  ;;  %v11314_v53 = vrot.slane %v10207_v14, 9  ;;  %v11315_v45 = vrot.slane %v10216_v4, 9  ;;  %v4619_v35 = vrot.slane %v10346_v44, 5  ;;  %v10445_v43 = vld [vmem:[#allocation3 + $0x74] sm:$0x1] }
 0x27a   : > { %7973 = vmatpush3.bf16.msra.mxu1 %v10288_v47  ;;  %7960 = vmatprep.mubr.msk.bf16.mxu1 %vm881_vm6, %v7205_v63  ;;  %v10418_v47 = vld [vmem:[#allocation3 + $0x6c] sm:$0x1]  ;;  %v4342_v58 = vrot.slane %v11313_v26, 4  ;;  %v4310_v46 = vsel %vm9106_vm10, %v4305_v17, %v4309_v16  ;;  %v4321_v24 = vshll.u32 %v10409_v20, 16  ;;  %v4360_v13 = vor.u32 %v4359_v15, %v4356_v54 }
 0x27b   : > { %7974 = vmatprep.subr.bf16.mxu1 %v8547_v23  ;;  %v10428_v59 = vsel %vm9282_vm13, %v11314_v53, %v4611_v62  ;;  %v10434_v33 = vsel %vm9282_vm13, %v11315_v45, %v4615_v48  ;;  %v4282_v61 = vsel %vm9106_vm10, %v4277_v2, %v4281_v0  ;;  %v4332_v4 = vor.u32 %v4331_v1, %v4328_v29 }
 0x27c   : > { %v7247_v14 = vcombine.low %v10332_v37, %v10428_v59  ;;  %v4335_v63 = vshll.u32 %v10418_v47, 16  ;;  %v11316_v44 = vrot.slane %v10226_v40, 9  ;;  %v7206_v21 = vcombine.low %v4268_v52, %v4282_v61  ;;  %v8549_v37 = vld [vmem:[%s11254_s3 + $0x58] sm:$0xff]  }
 0x27d   : > { %v4346_v54 = vor.u32 %v4345_v25, %v4342_v58  ;;  %v4363_v15 = vshll.u32 %v10422_v32, 16  ;;  %v11317_v0 = vsel %vm9106_vm10, %v10311_v5, %v10313_v8  ;;  %v4319_v2 = vrot.slane %v4318_v42, 4  ;;  %v10466_v8 = vld [vmem:[#allocation3 + $0x84] sm:$0x1] }
 0x27e   : > { %7975 = vmatpush3.bf16.msra.mxu1 %v8547_v23  ;;  %v4620_v17 = vsel %vm9282_vm13, %v11316_v44, %v4619_v35  ;;  %v7207_v40 = vcombine.low %v11317_v0, %v4310_v46  ;;  %v4370_v29 = vrot.slane %v4368_v56, 4  ;;  %v4373_v1 = vrot.slane %v4371_v9, 5  ;;  %v8550_v56 = vld [vmem:[%s11254_s3 + $0x60] sm:$0xff]  }
 0x27f   : > { %7976 = vmatprep.subr.bf16.mxu1 %v8548_v28  ;;  %v7248_v23 = vcombine.low %v10434_v33, %v4620_v17  ;;  %v4349_v62 = vshll.u32 %v10445_v43, 16  ;;  %v4361_v48 = vrot.slane %v4360_v13, 4  ;;  %v4323_v52 = vrot.slane %v4321_v24, 5  ;;  %v10475_v33 = vld [vmem:[#allocation3 + $0x8c] sm:$0x1] }
 0x280   : > { %v4333_v16 = vrot.slane %v4332_v4, 4  ;;  %v11318_v26 = vshrl.u32 %v10360_v51, 16  ;;  %v4387_v25 = vrot.slane %v4385_v12, 5  ;;  %v4347_v53 = vrot.slane %v4346_v54, 4 }
 0x281   : > { %7961 = vmatmul.mubr.msk.bf16.gmra.mrb[4].mxu1 %vm881_vm6, %v7206_v21  ;;  %v4365_v5 = vrot.slane %v4363_v15, 5  ;;  %v4324_v9 = vsel %vm9106_vm10, %v4319_v2, %v4323_v52  ;;  %v4337_v42 = vrot.slane %v4335_v63, 5  ;;  %v4374_v59 = vor.u32 %v4373_v1, %v4370_v29 }
 0x282   : > { %7964 = vmatprep.mubr.msk.bf16.mxu1 %vm881_vm6, %v7207_v40  ;;  %7977 = vmatpush3.bf16.msra.mxu1 %v8548_v28  ;;  %v4384_v58 = vrot.slane %v11318_v26, 4  ;;  %v4351_v45 = vrot.slane %v4349_v62, 5  ;;  %v4377_v35 = vshll.u32 %v10466_v8, 16  ;;  %v4391_v63 = vshll.u32 %v10475_v33, 16 }
 0x283   : > { %7978 = vmatprep.subr.bf16.mxu1 %v8549_v37  ;;  %v4366_v28 = vsel %vm9106_vm10, %v4361_v48, %v4365_v5  ;;  %v4338_v12 = vsel %vm9106_vm10, %v4333_v16, %v4337_v42  ;;  %v4375_v4 = vrot.slane %v4374_v59, 4  ;;  %v7228_v0 = vrot.slane %v10253_v10, 9  ;;  %v8551_v48 = vld [vmem:[%s11254_s3 + $0x68] sm:$0xff]  }
 0x284   : > { %v4388_v46 = vor.u32 %v4387_v25, %v4384_v58  ;;  %v7208_v24 = vcombine.low %v4324_v9, %v4338_v12  ;;  %v4352_v13 = vsel %vm9106_vm10, %v4347_v53, %v4351_v45  ;;  %v4379_v44 = vrot.slane %v4377_v35, 5 }
 0x285   : > { %v7209_v61 = vcombine.low %v4352_v13, %v4366_v28  ;;  %v4393_v54 = vrot.slane %v4391_v63, 5  ;;  %v4627_v40 = vrot.slane %v10355_v34, 5  ;;  %v7227_v2 = vrot.slane %v10256_v3, 9  ;;  %v10573_v63 = vld [vmem:[#allocation3 + $0x28] sm:$0xf] }
 0x286   : > { %7979 = vmatpush3.bf16.msra.mxu1 %v8549_v37  ;;  %v4389_v17 = vrot.slane %v4388_v46, 4  ;;  %v4380_v21 = vsel %vm9106_vm10, %v4375_v4, %v4379_v44  ;;  %v4623_v29 = vrot.slane %v10368_v11, 5  ;;  %v7229_v10 = vrot.slane %v10266_v7, 9  ;;  %v8552_v7 = vld [vmem:[%s11254_s3 + $0x70] sm:$0xff]   ;;  %v8558_v44 = vld [vmem:[%s11254_s3 + $0x88] sm:$0xff]  }
 0x287   : > { %7996 = vmatprep.subr.bf16.mxu1 %v8550_v56  ;;  %v4628_v1 = vsel %vm9282_vm13, %v7228_v0, %v4627_v40  ;;  %v4631_v34 = vrot.slane %v10376_v57, 5  ;;  %v7231_v3 = vrot.slane %v10228_v55, 9  ;;  %v4639_v11 = vrot.slane %v10290_v19, 5  ;;  %v10555_v46 = vld [vmem:[#allocation3 + $0x10] sm:$0xf] }
 0x288   : > { %v4394_v15 = vsel %vm9106_vm10, %v4389_v17, %v4393_v54  ;;  %v4624_v62 = vsel %vm9282_vm13, %v7227_v2, %v4623_v29  ;;  %v4643_v16 = vrot.slane %v10391_v31, 5  ;;  %v7230_v26 = vrot.slane %v10281_v60, 9  ;;  %v10585_v54 = vld [vmem:[#allocation3 + $0x40] sm:$0xf]  ;;  %v10591_v40 = vld [vmem:[#allocation3 + $0x38] sm:$0xf] }
 0x289   : > { %7965 = vmatmul.mubr.msk.bf16.gmra.mrb[8].mxu1 %vm881_vm6, %v7208_v24  ;;  %v7210_v37 = vcombine.low %v4380_v21, %v4394_v15  ;;  %v7249_v52 = vcombine.low %v4624_v62, %v4628_v1  ;;  %v4635_v58 = vrot.slane %v10379_v18, 5  ;;  %v4632_v55 = vsel %vm9282_vm13, %v7229_v10, %v4631_v34  ;;  %v8553_v18 = vld [vmem:[%s11254_s3 + $0x78] sm:$0xff]   ;;  %v8561_v21 = vld [vmem:[%s11254_s3 + $0x90] sm:$0xff]   ;;  %v10589_v0 = vld [vmem:[#allocation3 + $0x60] sm:$0xf] }
 0x28a   : > { %7968 = vmatprep.mubr.msk.bf16.mxu1 %vm881_vm6, %v7209_v61  ;;  %v4647_v25 = vrot.slane %v10409_v20, 5  ;;  %v7236_v53 = vrot.slane %v10304_v50, 9  ;;  %v4659_v5 = vrot.slane %v10422_v32, 5  ;;  %v4651_v9 = vrot.slane %v10418_v47, 5  ;;  %v10569_v61 = vld [vmem:[#allocation3 + $0x18] sm:$0xf] }
 0x28b   : > { %v4636_v57 = vsel %vm9282_vm13, %v7230_v26, %v4635_v58  ;;  %v7235_v42 = vrot.slane %v10319_v39, 9  ;;  %v4655_v59 = vrot.slane %v10445_v43, 5  ;;  %v7237_v43 = vrot.slane %v10352_v38, 9  ;;  %v10559_v38 = vld [vmem:[#allocation3 + $0x8] sm:$0xf]  ;;  %v8564_v2 = vld [vmem:[%s11254_s3 + $0x98] sm:$0xff]  }
 0x28c   : > { %v7250_v60 = vcombine.low %v4632_v55, %v4636_v57  ;;  %v4660_v20 = vsel %vm9282_vm13, %v7236_v53, %v4659_v5  ;;  %v4663_v45 = vrot.slane %v10466_v8, 5  ;;  %v7238_v28 = vrot.slane %v10360_v51, 9  ;;  %v10565_v51 = vld [vmem:[#allocation3 + $0x20] sm:$0xf]  ;;  %v10625_v5 = vld [vmem:[#allocation3 + $0x70] sm:$0xf] }
 0x28d   : > { %v4656_v39 = vsel %vm9282_vm13, %v7235_v42, %v4655_v59  ;;  %v4667_v12 = vrot.slane %v10475_v33, 5  ;;  %v7275_v8 = vcombine.low %v10559_v38, %v10555_v46  ;;  %v10567_v33 = vld [vmem:[#allocation3 + $0x30] sm:$0xf]  ;;  %v7276_v4 = vcombine.low %v10569_v61, %v10565_v51 }
 0x28e   : > { %v7253_v32 = vcombine.low %v4656_v39, %v4660_v20  ;;  %v4664_v35 = vsel %vm9282_vm13, %v7237_v43, %v4663_v45  ;;  %v7277_v17 = vcombine.low %v10573_v63, %v10567_v33  ;;  %v5120_v15 = vshrl.u32 %v10555_v46, 16  ;;  %v10643_v45 = vld [vmem:[#allocation3 + $0x78] sm:$0xf] }
 0x28f   : > { %v4668_v24 = vsel %vm9282_vm13, %v7238_v28, %v4667_v12  ;;  %v5106_v29 = vshrl.u32 %v10559_v38, 16  ;;  %v5109_v1 = vshll.u32 %v10559_v38, 16  ;;  %v7278_v62 = vcombine.low %v10591_v40, %v10585_v54 }
 0x290   : > { %v7254_v13 = vcombine.low %v4664_v35, %v4668_v24  ;;  %v5134_v34 = vshrl.u32 %v10569_v61, 16  ;;  %v5148_v26 = vshrl.u32 %v10565_v51, 16  ;;  %v5151_v58 = vshll.u32 %v10565_v51, 16 }
 0x291   : > { %7969 = vmatmul.mubr.msk.bf16.gmra.mrb[12].mxu1 %vm881_vm6, %v7210_v37  ;;  %v5123_v37 = vshll.u32 %v10555_v46, 16  ;;  %v5108_v57 = vrot.slane %v5106_v29, 4  ;;  %v5193_v53 = vshll.u32 %v10591_v40, 16  ;;  %v5207_v42 = vshll.u32 %v10585_v54, 16 }
 0x292   : > { %7980 = vmatprep.mubr.msk.bf16.mxu1 %vm881_vm6, %v7247_v14  ;;  %v7232_v14 = vrot.slane %v10276_v6, 9  ;;  %v4640_v6 = vsel %vm9282_vm13, %v7231_v3, %v4639_v11  ;;  %v10606_v3 = vld [vmem:[#allocation3 + $0x14] sm:$0x1]  ;;  %v5122_v11 = vrot.slane %v5120_v15, 4  ;;  %v5136_v12 = vrot.slane %v5134_v34, 4 }
 0x293   : > { %v5129_v39 = vshll.u32 %v10606_v3, 16  ;;  %v5235_v24 = vshll.u32 %v10589_v0, 16  ;;  %v5260_v29 = vshrl.u32 %v10625_v5, 16 }
 0x294   : > { %v4644_v19 = vsel %vm9282_vm13, %v7232_v14, %v4643_v16  ;;  %v5125_v14 = vrot.slane %v5123_v37, 5  ;;  %v5137_v16 = vshll.u32 %v10569_v61, 16 }
 0x295   : > { %v7251_v31 = vcombine.low %v4640_v6, %v4644_v19  ;;  %v5162_v6 = vshrl.u32 %v10573_v63, 16  ;;  %v5165_v19 = vshll.u32 %v10573_v63, 16 }
 0x296   : > { %v5139_v35 = vrot.slane %v5137_v16, 5  ;;  %v5263_v16 = vshll.u32 %v10625_v5, 16 }
 0x298   : > { %v5140_v34 = vor.u32 %v5139_v35, %v5136_v12 }
 0x299   : > { %7981 = vmatmul.mubr.msk.bf16.vlgmr.msra.gmra.mrb[0].mxu1 %vm881_vm6, %v7248_v23  ;;  %v7233_v23 = vrot.slane %v10299_v49, 9  ;;  %v8555_v49 = vld [vmem:[%s11254_s3 + $0x80] sm:$0xff]  }
 0x29a   : > { %7997 = vmatpush3.bf16.msra.mxu1 %v8550_v56  ;;  %7984 = vmatprep.mubr.msk.bf16.mxu1 %vm881_vm6, %v7249_v52  ;;  %v7234_v56 = vrot.slane %v10307_v27, 9  ;;  %v402_v52 = vld [vmem:[#allocation3 + $0x48] sm:$0x1]  ;;  %v5141_v12 = vrot.slane %v5140_v34, 4 }
 0x29b   : > { %7998 = vmatprep.subr.bf16.mxu1 %v8551_v48  ;;  %v4648_v50 = vsel %vm9282_vm13, %v7233_v23, %v4647_v25  ;;  %v403_v55 = vsel %vm8748_vm3, 0, %v402_v52  ;;  %v5179_v23 = vshll.u32 %v10567_v33, 16  ;;  %v5190_v25 = vshrl.u32 %v10591_v40, 16  ;;  %v10659_v52 = vld [vmem:[#allocation3 + $0x90] sm:$0xf] }
 0x29c   : > { %v4652_v27 = vsel %vm9282_vm13, %v7234_v56, %v4651_v9  ;;  %404 = vst [vmem:[#allocation3 + $0x48] sm:$0x1] %v403_v55  ;;  %v10627_v56 = vld [vmem:[#allocation3 + $0xc] sm:$0x1]  ;;  %v5204_v9 = vshrl.u32 %v10585_v54, 16 }
 0x29d   : > { %v7252_v47 = vcombine.low %v4648_v50, %v4652_v27  ;;  %v5126_v50 = vor.u32 %v5125_v14, %v5122_v11  ;;  %v5232_v27 = vshrl.u32 %v10589_v0, 16  ;;  %v5115_v22 = vshll.u32 %v10627_v56, 16 }
 0x29e   : > { %7999 = vmatpush3.bf16.msra.mxu1 %v8551_v48  ;;  %v10600_v48 = vld [vmem:[#allocation3 + $0x58] sm:$0xf]  ;;  %v5181_v15 = vrot.slane %v5179_v23, 5  ;;  %v5164_v11 = vrot.slane %v5162_v6, 4  ;;  %v5167_v14 = vrot.slane %v5165_v19, 5  ;;  %v5192_v34 = vrot.slane %v5190_v25, 4 }
 0x29f   : > { %8000 = vmatprep.subr.bf16.mxu1 %v8552_v7  ;;  %v7279_v10 = vcombine.low %v10600_v48, %v10589_v0  ;;  %v5218_v59 = vshrl.u32 %v10600_v48, 16  ;;  %v5221_v20 = vshll.u32 %v10600_v48, 16 }
 0x2a0   : > { %v5168_v35 = vor.u32 %v5167_v14, %v5164_v11  ;;  %v5195_v11 = vrot.slane %v5193_v53, 5 }
 0x2a1   : > { %7985 = vmatmul.mubr.msk.bf16.gmra.mrb[4].mxu1 %vm881_vm6, %v7250_v60  ;;  %v5111_v60 = vrot.slane %v5109_v1, 5  ;;  %v5131_v1 = vrot.slane %v5129_v39, 5 }
 0x2a2   : > { %7988 = vmatprep.mubr.msk.bf16.mxu1 %vm881_vm6, %v7251_v31  ;;  %8001 = vmatpush3.bf16.msra.mxu1 %v8552_v7  ;;  %v10615_v7 = vld [vmem:[%s11254_s3 + $0xa0] sm:$0xff]   ;;  %v5176_v31 = vshrl.u32 %v10567_v33, 16 }
 0x2a3   : > { %8002 = vmatprep.subr.bf16.mxu1 %v8553_v18  ;;  %v5112_v28 = vor.u32 %v5111_v60, %v5108_v57  ;;  %v10664_v57 = vld [vmem:[#allocation3 + $0x34] sm:$0x1] }
 0x2a6   : > { %8003 = vmatpush3.bf16.msra.mxu1 %v8553_v18  ;;  %v432_v18 = vld [vmem:[#allocation3 + $0x98] sm:$0x1] }
 0x2a7   : > { %8020 = vmatprep.subr.bf16.mxu1 %v8555_v49 }
 0x2a9   : > { %7989 = vmatmul.mubr.msk.bf16.gmra.mrb[8].mxu1 %vm881_vm6, %v7252_v47  ;;  %v10636_v47 = vld [vmem:[#allocation3 + $0x68] sm:$0xf] }
 0x2aa   : > { %7992 = vmatprep.mubr.msk.bf16.mxu1 %vm881_vm6, %v7253_v32  ;;  %v433_v32 = vsel %vm8748_vm3, 0, %v432_v18  ;;  %v7280_v43 = vcombine.low %v10636_v47, %v10625_v5  ;;  %v5246_v37 = vshrl.u32 %v10636_v47, 16  ;;  %v10667_v18 = vld [vmem:[#allocation3 + $0x88] sm:$0xf] }
 0x2ab   : > { %434 = vst [vmem:[#allocation3 + $0x98] sm:$0x1] %v433_v32  ;;  %v7282_v19 = vcombine.low %v10667_v18, %v10659_v52 }
 0x2b1   : > { %7993 = vmatmul.mubr.msk.bf16.gmra.mrb[12].mxu1 %vm881_vm6, %v7254_v13 }
 0x2b2   : > { %8004 = vmatprep.mubr.msk.bf16.mxu1 %vm881_vm6, %v7275_v8  ;;  %v5150_v8 = vrot.slane %v5148_v26, 4  ;;  %v5237_v26 = vrot.slane %v5235_v24, 5  ;;  %v5223_v24 = vrot.slane %v5221_v20, 5 }
 0x2b9   : > { %8005 = vmatmul.mubr.msk.bf16.vlgmr.msra.gmra.mrb[0].mxu1 %vm881_vm6, %v7276_v4  ;;  %v5153_v4 = vrot.slane %v5151_v58, 5  ;;  %v5234_v58 = vrot.slane %v5232_v27, 4  ;;  %v5220_v27 = vrot.slane %v5218_v59, 4 }
 0x2ba   : > { %8021 = vmatpush3.bf16.msra.mxu1 %v8555_v49  ;;  %8008 = vmatprep.mubr.msk.bf16.mxu1 %vm881_vm6, %v7277_v17  ;;  %v10632_v49 = vld [vmem:[#allocation3 + $0x80] sm:$0xf]  ;;  %v10651_v17 = vld [vmem:[#allocation3 + $0x1c] sm:$0x1] }
 0x2bb   : > { %8022 = vmatprep.subr.bf16.mxu1 %v8558_v44  ;;  %v7281_v13 = vcombine.low %v10643_v45, %v10632_v49  ;;  %v5154_v55 = vor.u32 %v5153_v4, %v5150_v8  ;;  %v5288_v60 = vshrl.u32 %v10632_v49, 16  ;;  %v5291_v6 = vshll.u32 %v10632_v49, 16  ;;  %v462_v8 = vld [vmem:[#allocation3 + $0x4c] sm:$0x1] }
 0x2bc   : > { %v5143_v39 = vshll.u32 %v10651_v17, 16  ;;  %v5238_v59 = vor.u32 %v5237_v26, %v5234_v58 }
 0x2be   : > { %8023 = vmatpush3.bf16.msra.mxu1 %v8558_v44  ;;  %v5127_v44 = vrot.slane %v5126_v50, 4  ;;  %v5145_v25 = vrot.slane %v5143_v39, 5 }
 0x2bf   : > { %8024 = vmatprep.subr.bf16.mxu1 %v8561_v21 }
 0x2c0   : > { %v5132_v23 = vsel %vm9106_vm10, %v5127_v44, %v5131_v1  ;;  %v5206_v44 = vrot.slane %v5204_v9, 4  ;;  %v463_v9 = vsel %vm8976_vm7, 0, %v462_v8  ;;  %v5146_v20 = vsel %vm9106_vm10, %v5141_v12, %v5145_v25  ;;  %v10710_v8 = vld [vmem:[#allocation3 + $0x5c] sm:$0x1] }
 0x2c1   : > { %8009 = vmatmul.mubr.msk.bf16.gmra.mrb[4].mxu1 %vm881_vm6, %v7278_v62  ;;  %v10657_v62 = vld [vmem:[#allocation3 + $0x24] sm:$0x1]  ;;  %464 = vst [vmem:[#allocation3 + $0x4c] sm:$0x1] %v463_v9  ;;  %v5290_v9 = vrot.slane %v5288_v60, 4  ;;  %v8568_v60 = vld [vmem:[%s11254_s3 + $0xb0] sm:$0xff]  }
 0x2c2   : > { %8012 = vmatprep.mubr.msk.bf16.mxu1 %vm881_vm6, %v7279_v10  ;;  %8025 = vmatpush3.bf16.msra.mxu1 %v8561_v21  ;;  %v5178_v21 = vrot.slane %v5176_v31, 4  ;;  %v5113_v10 = vrot.slane %v5112_v28, 4  ;;  %v5117_v31 = vrot.slane %v5115_v22, 5  ;;  %v5157_v32 = vshll.u32 %v10657_v62, 16 }
 0x2c3   : > { %8026 = vmatprep.subr.bf16.mxu1 %v8564_v2  ;;  %v5155_v22 = vrot.slane %v5154_v55, 4  ;;  %v10692_v55 = vld [vmem:[#allocation3 + $0x44] sm:$0x1] }
 0x2c4   : > { %v5182_v50 = vor.u32 %v5181_v15, %v5178_v21  ;;  %v5118_v28 = vsel %vm9106_vm10, %v5113_v10, %v5117_v31  ;;  %v5209_v21 = vrot.slane %v5207_v42, 5  ;;  %v10684_v10 = vld [vmem:[#allocation3 + $0x3c] sm:$0x1]  ;;  %v5169_v42 = vrot.slane %v5168_v35, 4 }
 0x2c5   : > { %v7303_v4 = vcombine.low %v5118_v28, %v5132_v23  ;;  %v5302_v31 = vshrl.u32 %v10667_v18, 16  ;;  %v5196_v35 = vor.u32 %v5195_v11, %v5192_v34  ;;  %v5213_v39 = vshll.u32 %v10692_v55, 16  ;;  %v10722_v11 = vld [vmem:[#allocation3 + $0x6c] sm:$0x1] }
 0x2c6   : > { %8027 = vmatpush3.bf16.msra.mxu1 %v8564_v2  ;;  %v5183_v1 = vrot.slane %v5182_v50, 4  ;;  %v5159_v2 = vrot.slane %v5157_v32, 5  ;;  %v5210_v23 = vor.u32 %v5209_v21, %v5206_v44  ;;  %v10701_v50 = vld [vmem:[#allocation3 + $0x64] sm:$0x1]  ;;  %v5224_v44 = vor.u32 %v5223_v24, %v5220_v27  ;;  %v10726_v24 = vld [vmem:[#allocation3 + $0x74] sm:$0x1] }
 0x2c7   : > { %8044 = vmatprep.subr.bf16.mxu1 %v10615_v7  ;;  %v5241_v26 = vshll.u32 %v10701_v50, 16  ;;  %v5262_v21 = vrot.slane %v5260_v29, 4  ;;  %v5239_v34 = vrot.slane %v5238_v59, 4  ;;  %v5215_v27 = vrot.slane %v5213_v39, 5  ;;  %v10742_v39 = vld [vmem:[#allocation3 + $0x84] sm:$0x1] }
 0x2c8   : > { %v5160_v53 = vsel %vm9106_vm10, %v5155_v22, %v5159_v2  ;;  %v8567_v22 = vld [vmem:[%s11254_s3 + $0xa8] sm:$0xff]   ;;  %v5211_v12 = vrot.slane %v5210_v23, 4  ;;  %v5248_v29 = vrot.slane %v5246_v37, 4  ;;  %v5319_v59 = vshll.u32 %v10659_v52, 16 }
 0x2c9   : > { %8013 = vmatmul.mubr.msk.bf16.gmra.mrb[8].mxu1 %vm881_vm6, %v7280_v43  ;;  %v10676_v43 = vld [vmem:[#allocation3 + $0x2c] sm:$0x1]  ;;  %v7304_v2 = vcombine.low %v5146_v20, %v5160_v53  ;;  %v5225_v53 = vrot.slane %v5224_v44, 4  ;;  %v5243_v23 = vrot.slane %v5241_v26, 5 }
 0x2ca   : > { %8016 = vmatprep.mubr.msk.bf16.mxu1 %vm881_vm6, %v7281_v13  ;;  %v5185_v13 = vshll.u32 %v10664_v57, 16  ;;  %v5171_v15 = vshll.u32 %v10676_v43, 16  ;;  %v5216_v37 = vsel %vm9106_vm10, %v5211_v12, %v5215_v27  ;;  %v10751_v12 = vld [vmem:[#allocation3 + $0x7c] sm:$0x1] }
 0x2cb   : > { %v5244_v44 = vsel %vm9106_vm10, %v5239_v34, %v5243_v23  ;;  %v5297_v34 = vshll.u32 %v10742_v39, 16 }
 0x2cc   : > { %v5187_v14 = vrot.slane %v5185_v13, 5  ;;  %v5173_v32 = vrot.slane %v5171_v15, 5  ;;  %v5199_v13 = vshll.u32 %v10684_v10, 16  ;;  %v5265_v15 = vrot.slane %v5263_v16, 5 }
 0x2cd   : > { %v11319_v16 = vshll.u32 %v10636_v47, 16 }
 0x2ce   : > { %v5188_v28 = vsel %vm9106_vm10, %v5183_v1, %v5187_v14  ;;  %v5227_v1 = vshll.u32 %v10710_v8, 16  ;;  %v5197_v14 = vrot.slane %v5196_v35, 4  ;;  %v5201_v20 = vrot.slane %v5199_v13, 5 }
 0x2cf   : > { %v5251_v25 = vrot.slane %v11319_v16, 5  ;;  %v5266_v35 = vor.u32 %v5265_v15, %v5262_v21  ;;  %v5255_v13 = vshll.u32 %v10722_v11, 16  ;;  %v492_v21 = vld [vmem:[#allocation3 + $0x9c] sm:$0x1] }
 0x2d1   : > { %8017 = vmatmul.mubr.msk.bf16.gmra.mrb[12].mxu1 %vm881_vm6, %v7282_v19  ;;  %v5316_v19 = vshrl.u32 %v10659_v52, 16  ;;  %v5252_v16 = vor.u32 %v5251_v25, %v5248_v29  ;;  %v5321_v29 = vrot.slane %v5319_v59, 5  ;;  %v5283_v25 = vshll.u32 %v10751_v12, 16 }
 0x2d2   : > { %8028 = vmatprep.mubr.msk.bf16.mxu1 %vm881_vm6, %v7303_v4  ;;  %v5174_v4 = vsel %vm9106_vm10, %v5169_v42, %v5173_v32  ;;  %v5293_v42 = vrot.slane %v5291_v6, 5  ;;  %v11321_v32 = vshll.u32 %v10643_v45, 16  ;;  %v5299_v59 = vrot.slane %v5297_v34, 5 }
 0x2d3   : > { %v7305_v58 = vcombine.low %v5174_v4, %v5188_v28  ;;  %v5229_v4 = vrot.slane %v5227_v1, 5  ;;  %v5545_v34 = vrot.slane %v10606_v3, 5 }
 0x2d4   : > { %v5279_v28 = vrot.slane %v11321_v32, 5  ;;  %v5294_v26 = vor.u32 %v5293_v42, %v5290_v9  ;;  %v5267_v42 = vrot.slane %v5266_v35, 4  ;;  %v5257_v35 = vrot.slane %v5255_v13, 5 }
 0x2d5   : > { %v5230_v1 = vsel %vm9106_vm10, %v5225_v53, %v5229_v4  ;;  %v493_v53 = vsel %vm8976_vm7, 0, %v492_v21 }
 0x2d6   : > { %v7307_v9 = vcombine.low %v5230_v1, %v5244_v44  ;;  %v5295_v23 = vrot.slane %v5294_v26, 4  ;;  %494 = vst [vmem:[#allocation3 + $0x9c] sm:$0x1] %v493_v53 }
 0x2d9   : > { %8029 = vmatmul.mubr.msk.bf16.vlgmr.msra.gmra.mrb[0].mxu1 %vm881_vm6, %v7304_v2  ;;  %v5305_v2 = vshll.u32 %v10667_v18, 16 }
 0x2da   : > { %8045 = vmatpush3.bf16.msra.mxu1 %v10615_v7  ;;  %8032 = vmatprep.mubr.msk.bf16.mxu1 %vm881_vm6, %v7305_v58  ;;  %v11320_v7 = vshrl.u32 %v10643_v45, 16  ;;  %v5202_v58 = vsel %vm9106_vm10, %v5197_v14, %v5201_v20  ;;  %v5318_v14 = vrot.slane %v5316_v19, 4 }
 0x2db   : > { %8046 = vmatprep.subr.bf16.mxu1 %v8567_v22  ;;  %v7306_v15 = vcombine.low %v5202_v58, %v5216_v37  ;;  %v5307_v20 = vrot.slane %v5305_v2, 5  ;;  %v10766_v37 = vld [vmem:[#allocation3 + $0x94] sm:$0x1]  ;;  %v10775_v2 = vld [vmem:[#allocation3 + $0x8c] sm:$0x1] }
 0x2dc   : > { %v5276_v6 = vrot.slane %v11320_v7, 4  ;;  %v5269_v7 = vshll.u32 %v10726_v24, 16  ;;  %v5322_v44 = vor.u32 %v5321_v29, %v5318_v14  ;;  %v5541_v14 = vrot.slane %v10627_v56, 5 }
 0x2dd   : > { %v7328_v56 = vrot.slane %v10567_v33, 9 }
 0x2de   : > { %8047 = vmatpush3.bf16.msra.mxu1 %v8567_v22  ;;  %v5280_v27 = vor.u32 %v5279_v28, %v5276_v6  ;;  %v8569_v22 = vld [vmem:[%s11254_s3 + $0xb8] sm:$0xff]   ;;  %v5253_v6 = vrot.slane %v5252_v16, 4  ;;  %v5271_v32 = vrot.slane %v5269_v7, 5  ;;  %v5304_v28 = vrot.slane %v5302_v31, 4 }
 0x2df   : > { %8048 = vmatprep.subr.bf16.mxu1 %v8568_v60  ;;  %v5300_v31 = vsel %vm9106_vm10, %v5295_v23, %v5299_v59  ;;  %v5325_v16 = vshll.u32 %v10766_v37, 16  ;;  %v5323_v1 = vrot.slane %v5322_v44, 4  ;;  %v7327_v59 = vrot.slane %v10573_v63, 9 }
 0x2e0   : > { %v5281_v19 = vrot.slane %v5280_v27, 4  ;;  %v5272_v4 = vsel %vm9106_vm10, %v5267_v42, %v5271_v32  ;;  %v5258_v26 = vsel %vm9106_vm10, %v5253_v6, %v5257_v35  ;;  %v5308_v58 = vor.u32 %v5307_v20, %v5304_v28 }
 0x2e1   : > { %8033 = vmatmul.mubr.msk.bf16.gmra.mrb[4].mxu1 %vm881_vm6, %v7306_v15  ;;  %v7308_v7 = vcombine.low %v5258_v26, %v5272_v4  ;;  %v5311_v15 = vshll.u32 %v10775_v2, 16  ;;  %v7324_v27 = vrot.slane %v10555_v46, 9  ;;  %v5327_v42 = vrot.slane %v5325_v16, 5 }
 0x2e2   : > { %8036 = vmatprep.mubr.msk.bf16.mxu1 %vm881_vm6, %v7307_v9  ;;  %8049 = vmatpush3.bf16.msra.mxu1 %v8568_v60  ;;  %v5285_v60 = vrot.slane %v5283_v25, 5  ;;  %v5309_v9 = vrot.slane %v5308_v58, 4  ;;  %v7326_v32 = vrot.slane %v10565_v51, 9  ;;  %v5561_v28 = vrot.slane %v10664_v57, 5 }
 0x2e3   : > { %8050 = vmatprep.subr.bf16.mxu1 %v8569_v22  ;;  %v5313_v29 = vrot.slane %v5311_v15, 5  ;;  %v5328_v25 = vsel %vm9106_vm10, %v5323_v1, %v5327_v42  ;;  %v5546_v23 = vsel %vm9282_vm13, %v7324_v27, %v5545_v34  ;;  %v7325_v20 = vrot.slane %v10569_v61, 9  ;;  %v8571_v61 = vld [vmem:[%s11254_s3 + $0xc8] sm:$0xff]  }
 0x2e4   : > { %v5286_v13 = vsel %vm9106_vm10, %v5281_v19, %v5285_v60  ;;  %v5549_v19 = vrot.slane %v10651_v17, 5  ;;  %v5557_v35 = vrot.slane %v10676_v43, 5  ;;  %v7330_v17 = vrot.slane %v10585_v54, 9 }
 0x2e5   : > { %v7309_v21 = vcombine.low %v5286_v13, %v5300_v31  ;;  %v5314_v46 = vsel %vm9106_vm10, %v5309_v9, %v5313_v29  ;;  %v5569_v43 = vrot.slane %v10692_v55, 5  ;;  %v7332_v44 = vrot.slane %v10589_v0, 9  ;;  %v8572_v55 = vld [vmem:[%s11254_s3 + $0xd0] sm:$0xff]  }
 0x2e6   : > { %8051 = vmatpush3.bf16.msra.mxu1 %v8569_v22  ;;  %v7323_v22 = vrot.slane %v10559_v38, 9  ;;  %v7310_v53 = vcombine.low %v5314_v46, %v5328_v25  ;;  %v5553_v38 = vrot.slane %v10657_v62, 5  ;;  %v5562_v62 = vsel %vm9282_vm13, %v7328_v56, %v5561_v28  ;;  %v10871_v29 = vld [vmem:[#allocation3 + $0x10] sm:$0xf]  ;;  %v10885_v46 = vld [vmem:[#allocation3 + $0x20] sm:$0xf] }
 0x2e7   : > { %8068 = vmatprep.subr.bf16.mxu1 %v8570_v41  ;;  %v5550_v33 = vsel %vm9282_vm13, %v7325_v20, %v5549_v19  ;;  %v5558_v4 = vsel %vm9282_vm13, %v7327_v59, %v5557_v35  ;;  %v5577_v60 = vrot.slane %v10701_v50, 5  ;;  %v7329_v31 = vrot.slane %v10591_v40, 9  ;;  %v8581_v28 = vld [vmem:[%s11254_s3 + $0xf0] sm:$0xff]   ;;  %v10903_v20 = vld [vmem:[#allocation3 + $0x40] sm:$0xf] }
 0x2e8   : > { %v5542_v3 = vsel %vm9282_vm13, %v7323_v22, %v5541_v14  ;;  %v5554_v51 = vsel %vm9282_vm13, %v7326_v32, %v5553_v38  ;;  %v7349_v63 = vcombine.low %v5558_v4, %v5562_v62  ;;  %v5565_v26 = vrot.slane %v10684_v10, 5  ;;  %v10905_v19 = vld [vmem:[#allocation3 + $0x48] sm:$0xf] }
 0x2e9   : > { %8037 = vmatmul.mubr.msk.bf16.gmra.mrb[8].mxu1 %vm881_vm6, %v7308_v7  ;;  %v7347_v6 = vcombine.low %v5542_v3, %v5546_v23  ;;  %v7348_v57 = vcombine.low %v5550_v33, %v5554_v51  ;;  %v7331_v58 = vrot.slane %v10600_v48, 9  ;;  %v5573_v54 = vrot.slane %v10710_v8, 5  ;;  %v8573_v8 = vld [vmem:[%s11254_s3 + $0xd8] sm:$0xff]   ;;  %v10909_v51 = vld [vmem:[#allocation3 + $0x60] sm:$0xf] }
 0x2ea   : > { %8040 = vmatprep.mubr.msk.bf16.mxu1 %vm881_vm6, %v7309_v21  ;;  %v5570_v0 = vsel %vm9282_vm13, %v7330_v17, %v5569_v43  ;;  %v5578_v50 = vsel %vm9282_vm13, %v7332_v44, %v5577_v60  ;;  %v5566_v40 = vsel %vm9282_vm13, %v7329_v31, %v5565_v26  ;;  %v7334_v16 = vrot.slane %v10625_v5, 9  ;;  %v8575_v5 = vld [vmem:[%s11254_s3 + $0xe0] sm:$0xff]   ;;  %v10889_v3 = vld [vmem:[#allocation3 + $0x38] sm:$0xf]  ;;  %v10913_v33 = vld [vmem:[#allocation3 + $0x68] sm:$0xf] }
 0x2eb   : > { %v7350_v10 = vcombine.low %v5566_v40, %v5570_v0  ;;  %v5574_v48 = vsel %vm9282_vm13, %v7331_v58, %v5573_v54  ;;  %v5585_v7 = vrot.slane %v10726_v24, 5  ;;  %v7336_v13 = vrot.slane %v10632_v49, 9  ;;  %v10923_v44 = vld [vmem:[#allocation3 + $0x14] sm:$0x1]  ;;  %v10933_v40 = vld [vmem:[#allocation3 + $0x1c] sm:$0x1] }
 0x2ec   : > { %v5593_v21 = vrot.slane %v10742_v39, 5  ;;  %v7333_v15 = vrot.slane %v10636_v47, 9  ;;  %v5581_v1 = vrot.slane %v10722_v11, 5  ;;  %v7335_v27 = vrot.slane %v10643_v45, 9 }
 0x2ed   : > { %v5589_v34 = vrot.slane %v10751_v12, 5  ;;  %v5586_v49 = vsel %vm9282_vm13, %v7334_v16, %v5585_v7  ;;  %v7338_v12 = vrot.slane %v10659_v52, 9  ;;  %v5601_v9 = vrot.slane %v10766_v37, 5  ;;  %v10875_v52 = vld [vmem:[#allocation3 + $0x18] sm:$0xf] }
 0x2ee   : > { %v5594_v24 = vsel %vm9282_vm13, %v7336_v13, %v5593_v21  ;;  %v5582_v47 = vsel %vm9282_vm13, %v7333_v15, %v5581_v1  ;;  %v7337_v42 = vrot.slane %v10667_v18, 9  ;;  %v5597_v22 = vrot.slane %v10775_v2, 5  ;;  %v10881_v18 = vld [vmem:[#allocation3 + $0x28] sm:$0xf]  ;;  %v10883_v2 = vld [vmem:[#allocation3 + $0x30] sm:$0xf] }
 0x2ef   : > { %v7352_v11 = vcombine.low %v5582_v47, %v5586_v49  ;;  %v5590_v45 = vsel %vm9282_vm13, %v7335_v27, %v5589_v34  ;;  %v5602_v14 = vsel %vm9282_vm13, %v7338_v12, %v5601_v9  ;;  %v7375_v37 = vcombine.low %v10871_v29, %v10875_v52  ;;  %v10943_v7 = vld [vmem:[#allocation3 + $0x78] sm:$0xf]  ;;  %v10947_v15 = vld [vmem:[#allocation3 + $0x80] sm:$0xf]  ;;  %v10955_v12 = vld [vmem:[#allocation3 + $0x88] sm:$0xf] }
 0x2f0   : > { %v7353_v39 = vcombine.low %v5590_v45, %v5594_v24  ;;  %v5598_v25 = vsel %vm9282_vm13, %v7337_v42, %v5597_v22  ;;  %v7377_v32 = vcombine.low %v10883_v2, %v10889_v3  ;;  %v6041_v38 = vshrl.u32 %v10871_v29, 16 }
 0x2f1   : > { %8041 = vmatmul.mubr.msk.bf16.gmra.mrb[12].mxu1 %vm881_vm6, %v7310_v53  ;;  %v7354_v23 = vcombine.low %v5598_v25, %v5602_v14  ;;  %v7376_v53 = vcombine.low %v10885_v46, %v10881_v18  ;;  %v6044_v56 = vshll.u32 %v10871_v29, 16  ;;  %v6055_v59 = vshrl.u32 %v10875_v52, 16 }
 0x2f2   : > { %8052 = vmatprep.mubr.msk.bf16.mxu1 %vm881_vm6, %v7347_v6  ;;  %v8578_v6 = vld [vmem:[%s11254_s3 + $0xe8] sm:$0xff]   ;;  %v6058_v35 = vshll.u32 %v10875_v52, 16  ;;  %v7378_v62 = vcombine.low %v10903_v20, %v10905_v19  ;;  %v6043_v4 = vrot.slane %v6041_v38, 4  ;;  %v6069_v17 = vshrl.u32 %v10885_v46, 16 }
 0x2f3   : > { %v6072_v43 = vshll.u32 %v10885_v46, 16  ;;  %v6057_v60 = vrot.slane %v6055_v59, 4  ;;  %v6083_v26 = vshrl.u32 %v10881_v18, 16  ;;  %v6086_v58 = vshll.u32 %v10881_v18, 16 }
 0x2f4   : > { %v6060_v31 = vrot.slane %v6058_v35, 5  ;;  %v6097_v54 = vshrl.u32 %v10883_v2, 16  ;;  %v6111_v0 = vshrl.u32 %v10889_v3, 16  ;;  %v6128_v16 = vshll.u32 %v10903_v20, 16 }
 0x2f5   : > { %v6050_v13 = vshll.u32 %v10923_v44, 16  ;;  %v6153_v21 = vshrl.u32 %v10909_v51, 16  ;;  %v6071_v27 = vrot.slane %v6069_v17, 4  ;;  %v6074_v34 = vrot.slane %v6072_v43, 5 }
 0x2f6   : > { %v6061_v1 = vor.u32 %v6060_v31, %v6057_v60  ;;  %v6064_v49 = vshll.u32 %v10933_v40, 16  ;;  %v6085_v24 = vrot.slane %v6083_v26, 4  ;;  %v6088_v47 = vrot.slane %v6086_v58, 5 }
 0x2f7   : > { %v6170_v45 = vshll.u32 %v10913_v33, 16  ;;  %v7381_v14 = vcombine.low %v10947_v15, %v10955_v12  ;;  %v6052_v25 = vrot.slane %v6050_v13, 5  ;;  %v6099_v38 = vrot.slane %v6097_v54, 4 }
 0x2f8   : > { %v6198_v59 = vshll.u32 %v10943_v7, 16  ;;  %v6066_v35 = vrot.slane %v6064_v49, 5  ;;  %v6113_v17 = vrot.slane %v6111_v0, 4  ;;  %v6139_v60 = vshrl.u32 %v10905_v19, 16 }
 0x2f9   : > { %8053 = vmatmul.mubr.msk.bf16.vlgmr.msra.gmra.mrb[0].mxu1 %vm881_vm6, %v7348_v57  ;;  %v8584_v57 = vld [vmem:[%s11254_s3 + $0xf8] sm:$0xff]   ;;  %v6142_v31 = vshll.u32 %v10905_v19, 16  ;;  %v6209_v26 = vshrl.u32 %v10947_v15, 16  ;;  %v6212_v58 = vshll.u32 %v10947_v15, 16  ;;  %v7425_v36 = vrot.slane %v10885_v46, 9 }
 0x2fa   : > { %8069 = vmatpush3.bf16.msra.mxu1 %v8570_v41  ;;  %8056 = vmatprep.mubr.msk.bf16.mxu1 %vm881_vm6, %v7349_v63  ;;  %v7351_v41 = vcombine.low %v5574_v48, %v5578_v50  ;;  %v7379_v63 = vcombine.low %v10909_v51, %v10913_v33  ;;  %v10931_v50 = vld [vmem:[#allocation3 + $0x70] sm:$0xf]  ;;  %v10938_v48 = vld [vmem:[%s11254_s3 + $0x100] sm:$0xff]   ;;  %v7429_v46 = vrot.slane %v10903_v20, 9 }
 0x2fb   : > { %8070 = vmatprep.subr.bf16.mxu1 %v8571_v61  ;;  %v6181_v42 = vshrl.u32 %v10931_v50, 16  ;;  %v6184_v22 = vshll.u32 %v10931_v50, 16 }
 0x2fe   : > { %8071 = vmatpush3.bf16.msra.mxu1 %v8571_v61  ;;  %v6046_v61 = vrot.slane %v6044_v56, 5 }
 0x2ff   : > { %8072 = vmatprep.subr.bf16.mxu1 %v8572_v55 }
 0x301   : > { %8057 = vmatmul.mubr.msk.bf16.gmra.mrb[4].mxu1 %vm881_vm6, %v7350_v10  ;;  %v6047_v10 = vor.u32 %v6046_v61, %v6043_v4  ;;  %v10974_v4 = vld [vmem:[#allocation3 + $0x98] sm:$0xf] }
 0x302   : > { %8060 = vmatprep.mubr.msk.bf16.mxu1 %vm881_vm6, %v7351_v41  ;;  %8073 = vmatpush3.bf16.msra.mxu1 %v8572_v55  ;;  %v6100_v55 = vshll.u32 %v10883_v2, 16  ;;  %v6125_v41 = vshrl.u32 %v10903_v20, 16 }
 0x303   : > { %8074 = vmatprep.subr.bf16.mxu1 %v8573_v8  ;;  %v6048_v9 = vrot.slane %v6047_v10, 4 }
 0x304   : > { %v6102_v56 = vrot.slane %v6100_v55, 5 }
 0x305   : > { %v6053_v61 = vsel %vm9106_vm10, %v6048_v9, %v6052_v25  ;;  %v6127_v9 = vrot.slane %v6125_v41, 4  ;;  %v6141_v25 = vrot.slane %v6139_v60, 4  ;;  %v11003_v60 = vld [vmem:[#allocation3 + $0x4c] sm:$0x1] }
 0x306   : > { %8075 = vmatpush3.bf16.msra.mxu1 %v8573_v8  ;;  %v6114_v8 = vshll.u32 %v10889_v3, 16  ;;  %v6103_v13 = vor.u32 %v6102_v56, %v6099_v38  ;;  %v10993_v56 = vld [vmem:[#allocation3 + $0x44] sm:$0x1] }
 0x307   : > { %8092 = vmatprep.subr.bf16.mxu1 %v8575_v5 }
 0x308   : > { %v6116_v43 = vrot.slane %v6114_v8, 5 }
 0x309   : > { %8061 = vmatmul.mubr.msk.bf16.gmra.mrb[8].mxu1 %vm881_vm6, %v7352_v11  ;;  %v6167_v11 = vshrl.u32 %v10913_v33, 16 }
 0x30a   : > { %8064 = vmatprep.mubr.msk.bf16.mxu1 %vm881_vm6, %v7353_v39  ;;  %v7380_v39 = vcombine.low %v10931_v50, %v10943_v7 }
 0x311   : > { %8065 = vmatmul.mubr.msk.bf16.gmra.mrb[12].mxu1 %vm881_vm6, %v7354_v23  ;;  %v10962_v23 = vld [vmem:[#allocation3 + $0x2c] sm:$0x1] }
 0x312   : > { %8076 = vmatprep.mubr.msk.bf16.mxu1 %vm881_vm6, %v7375_v37  ;;  %v10965_v37 = vld [vmem:[#allocation3 + $0x90] sm:$0xf] }
 0x319   : > { %8077 = vmatmul.mubr.msk.bf16.vlgmr.msra.gmra.mrb[0].mxu1 %vm881_vm6, %v7376_v53  ;;  %v6062_v53 = vrot.slane %v6061_v1, 4  ;;  %v7382_v1 = vcombine.low %v10965_v37, %v10974_v4 }
 0x31a   : > { %8093 = vmatpush3.bf16.msra.mxu1 %v8575_v5  ;;  %8080 = vmatprep.mubr.msk.bf16.mxu1 %vm881_vm6, %v7377_v32  ;;  %v6156_v5 = vshll.u32 %v10909_v51, 16  ;;  %v6075_v32 = vor.u32 %v6074_v34, %v6071_v27  ;;  %v10988_v27 = vld [vmem:[#allocation3 + $0x3c] sm:$0x1] }
 0x31b   : > { %8094 = vmatprep.subr.bf16.mxu1 %v8578_v6  ;;  %v6067_v54 = vsel %vm9106_vm10, %v6062_v53, %v6066_v35  ;;  %v6144_v53 = vrot.slane %v6142_v31, 5  ;;  %v6120_v38 = vshll.u32 %v10988_v27, 16  ;;  %v6169_v35 = vrot.slane %v6167_v11, 4  ;;  %v11005_v11 = vld [vmem:[#allocation3 + $0x6c] sm:$0x1] }
 0x31c   : > { %v6076_v55 = vrot.slane %v6075_v32, 4  ;;  %v7403_v0 = vcombine.low %v6053_v61, %v6067_v54  ;;  %v6104_v32 = vrot.slane %v6103_v13, 4  ;;  %v6223_v61 = vshrl.u32 %v10955_v12, 16 }
 0x31d   : > { %v6145_v13 = vor.u32 %v6144_v53, %v6141_v25  ;;  %v6200_v25 = vrot.slane %v6198_v59, 5  ;;  %v6183_v59 = vrot.slane %v6181_v42, 4  ;;  %v6254_v42 = vshll.u32 %v10974_v4, 16 }
 0x31e   : > { %8095 = vmatpush3.bf16.msra.mxu1 %v8578_v6  ;;  %v10967_v6 = vld [vmem:[#allocation3 + $0x24] sm:$0x1] }
 0x31f   : > { %8096 = vmatprep.subr.bf16.mxu1 %v8581_v28  ;;  %v6078_v10 = vshll.u32 %v10967_v6, 16 }
 0x321   : > { %8081 = vmatmul.mubr.msk.bf16.gmra.mrb[4].mxu1 %vm881_vm6, %v7378_v62  ;;  %v6089_v62 = vor.u32 %v6088_v47, %v6085_v24  ;;  %v6117_v24 = vor.u32 %v6116_v43, %v6113_v17  ;;  %v6155_v47 = vrot.slane %v6153_v21, 4  ;;  %v6080_v41 = vrot.slane %v6078_v10, 5 }
 0x322   : > { %8084 = vmatprep.mubr.msk.bf16.mxu1 %vm881_vm6, %v7379_v63  ;;  %8097 = vmatpush3.bf16.msra.mxu1 %v8581_v28  ;;  %v6195_v28 = vshrl.u32 %v10943_v7, 16  ;;  %v6092_v63 = vshll.u32 %v10962_v23, 16  ;;  %v6134_v21 = vshll.u32 %v10993_v56, 16 }
 0x323   : > { %8098 = vmatprep.subr.bf16.mxu1 %v8584_v57  ;;  %v6090_v8 = vrot.slane %v6089_v62, 4  ;;  %v6172_v62 = vrot.slane %v6170_v45, 5  ;;  %v6118_v43 = vrot.slane %v6117_v24, 4  ;;  %v6081_v31 = vsel %vm9106_vm10, %v6076_v55, %v6080_v41 }
 0x324   : > { %v6094_v49 = vrot.slane %v6092_v63, 5  ;;  %v6226_v63 = vshll.u32 %v10955_v12, 16 }
 0x326   : > { %8099 = vmatpush3.bf16.msra.mxu1 %v8584_v57  ;;  %v10972_v57 = vld [vmem:[#allocation3 + $0x34] sm:$0x1] }
 0x327   : > { %8116 = vmatprep.subr.bf16.mxu1 %v10938_v48  ;;  %v6106_v34 = vshll.u32 %v10972_v57, 16 }
 0x329   : > { %8085 = vmatmul.mubr.msk.bf16.gmra.mrb[8].mxu1 %vm881_vm6, %v7380_v39  ;;  %v6158_v39 = vrot.slane %v6156_v5, 5  ;;  %v6095_v5 = vsel %vm9106_vm10, %v6090_v8, %v6094_v49  ;;  %v6108_v17 = vrot.slane %v6106_v34, 5  ;;  %v6173_v34 = vor.u32 %v6172_v62, %v6169_v35 }
 0x32a   : > { %8088 = vmatprep.mubr.msk.bf16.mxu1 %vm881_vm6, %v7381_v14  ;;  %v6130_v14 = vrot.slane %v6128_v16, 5  ;;  %v10999_v16 = vld [vmem:[#allocation3 + $0x64] sm:$0x1]  ;;  %v6240_v49 = vshll.u32 %v10965_v37, 16  ;;  %v7404_v24 = vcombine.low %v6081_v31, %v6095_v5  ;;  %v6211_v5 = vrot.slane %v6209_v26, 4 }
 0x32b   : > { %v6159_v45 = vor.u32 %v6158_v39, %v6155_v47  ;;  %v6109_v10 = vsel %vm9106_vm10, %v6104_v32, %v6108_v17  ;;  %v6162_v8 = vshll.u32 %v10999_v16, 16  ;;  %v6176_v47 = vshll.u32 %v11005_v11, 16  ;;  %v8587_v39 = vld [vmem:[%s11254_s3 + $0x108] sm:$0xff]   ;;  %v11039_v26 = vld [vmem:[#allocation3 + $0x7c] sm:$0x1] }
 0x32c   : > { %v6131_v54 = vor.u32 %v6130_v14, %v6127_v9  ;;  %v6197_v14 = vrot.slane %v6195_v28, 4  ;;  %v6174_v41 = vrot.slane %v6173_v34, 4  ;;  %v6214_v17 = vrot.slane %v6212_v58, 5  ;;  %v11028_v28 = vld [vmem:[#allocation3 + $0x74] sm:$0x1] }
 0x32d   : > { %v6160_v9 = vrot.slane %v6159_v45, 4  ;;  %v6164_v62 = vrot.slane %v6162_v8, 5  ;;  %v6178_v45 = vrot.slane %v6176_v47, 5  ;;  %v6186_v31 = vrot.slane %v6184_v22, 5 }
 0x32e   : > { %v6132_v32 = vrot.slane %v6131_v54, 4  ;;  %v6201_v58 = vor.u32 %v6200_v25, %v6197_v14  ;;  %v6215_v34 = vor.u32 %v6214_v17, %v6211_v5  ;;  %v6204_v47 = vshll.u32 %v11039_v26, 16 }
 0x32f   : > { %v6165_v54 = vsel %vm9106_vm10, %v6160_v9, %v6164_v62  ;;  %v6179_v8 = vsel %vm9106_vm10, %v6174_v41, %v6178_v45  ;;  %v6256_v41 = vrot.slane %v6254_v42, 5 }
 0x330   : > { %v6202_v14 = vrot.slane %v6201_v58, 4  ;;  %v6216_v5 = vrot.slane %v6215_v34, 4  ;;  %v6206_v45 = vrot.slane %v6204_v47, 5 }
 0x331   : > { %8089 = vmatmul.mubr.msk.bf16.gmra.mrb[12].mxu1 %vm881_vm6, %v7382_v1  ;;  %v6148_v1 = vshll.u32 %v11003_v60, 16 }
 0x332   : > { %8100 = vmatprep.mubr.msk.bf16.mxu1 %vm881_vm6, %v7403_v0  ;;  %v6122_v0 = vrot.slane %v6120_v38, 5  ;;  %v6146_v38 = vrot.slane %v6145_v13, 4  ;;  %v6228_v13 = vrot.slane %v6226_v63, 5  ;;  %v6190_v63 = vshll.u32 %v11028_v28, 16 }
 0x333   : > { %v6150_v35 = vrot.slane %v6148_v1, 5  ;;  %v6251_v1 = vshrl.u32 %v10974_v4, 16 }
 0x334   : > { %v6123_v55 = vsel %vm9106_vm10, %v6118_v43, %v6122_v0  ;;  %v6136_v43 = vrot.slane %v6134_v21, 5  ;;  %v6225_v21 = vrot.slane %v6223_v61, 4  ;;  %v11047_v0 = vld [vmem:[#allocation3 + $0x84] sm:$0x1]  ;;  %v6187_v61 = vor.u32 %v6186_v31, %v6183_v59  ;;  %v11064_v59 = vld [vmem:[#allocation3 + $0x94] sm:$0x1] }
 0x335   : > { %v7405_v53 = vcombine.low %v6109_v10, %v6123_v55  ;;  %v6151_v10 = vsel %vm9106_vm10, %v6146_v38, %v6150_v35  ;;  %v11053_v55 = vld [vmem:[#allocation3 + $0x8c] sm:$0x1]  ;;  %v6218_v25 = vshll.u32 %v11047_v0, 16  ;;  %v6242_v35 = vrot.slane %v6240_v49, 5 }
 0x336   : > { %v6137_v22 = vsel %vm9106_vm10, %v6132_v32, %v6136_v43  ;;  %v8589_v32 = vld [vmem:[%s11254_s3 + $0x118] sm:$0xff]   ;;  %v6253_v62 = vrot.slane %v6251_v1, 4  ;;  %v6232_v17 = vshll.u32 %v11053_v55, 16  ;;  %v6188_v43 = vrot.slane %v6187_v61, 4 }
 0x337   : > { %v7406_v9 = vcombine.low %v6137_v22, %v6151_v10  ;;  %v6192_v31 = vrot.slane %v6190_v63, 5  ;;  %v6207_v49 = vsel %vm9106_vm10, %v6202_v14, %v6206_v45  ;;  %v7423_v14 = vrot.slane %v10871_v29, 9 }
 0x338   : > { %v6257_v1 = vor.u32 %v6256_v41, %v6253_v62  ;;  %v6234_v10 = vrot.slane %v6232_v17, 5  ;;  %v6492_v17 = vrot.slane %v10972_v57, 5  ;;  %v7428_v45 = vrot.slane %v10889_v3, 9 }
 0x339   : > { %8101 = vmatmul.mubr.msk.bf16.vlgmr.msra.gmra.mrb[0].mxu1 %vm881_vm6, %v7404_v24  ;;  %v7407_v24 = vcombine.low %v6165_v54, %v6179_v8  ;;  %v6220_v54 = vrot.slane %v6218_v25, 5  ;;  %v6246_v8 = vshll.u32 %v11064_v59, 16  ;;  %v6476_v25 = vrot.slane %v10923_v44, 5 }
 0x33a   : > { %8117 = vmatpush3.bf16.msra.mxu1 %v10938_v48  ;;  %8104 = vmatprep.mubr.msk.bf16.mxu1 %vm881_vm6, %v7405_v53  ;;  %v8588_v48 = vld [vmem:[%s11254_s3 + $0x110] sm:$0xff]   ;;  %v6229_v53 = vor.u32 %v6228_v13, %v6225_v21  ;;  %v11066_v21 = vld [vmem:[#allocation3 + $0x9c] sm:$0x1]  ;;  %v6258_v47 = vrot.slane %v6257_v1, 4  ;;  %v6500_v3 = vrot.slane %v10993_v56, 5  ;;  %v7432_v1 = vrot.slane %v10913_v33, 9 }
 0x33b   : > { %8118 = vmatprep.subr.bf16.mxu1 %v8587_v39  ;;  %v6260_v42 = vshll.u32 %v11066_v21, 16  ;;  %v6221_v22 = vsel %vm9106_vm10, %v6216_v5, %v6220_v54  ;;  %v6477_v62 = vsel %vm9282_vm13, %v7423_v14, %v6476_v25  ;;  %v7426_v5 = vrot.slane %v10881_v18, 9 }
 0x33c   : > { %v6230_v58 = vrot.slane %v6229_v53, 4  ;;  %v6248_v53 = vrot.slane %v6246_v8, 5  ;;  %v6501_v20 = vsel %vm9282_vm13, %v7429_v46, %v6500_v3  ;;  %v6520_v33 = vrot.slane %v11039_v26, 5 }
 0x33d   : > { %v6516_v8 = vrot.slane %v11028_v28, 5  ;;  %v7437_v28 = vrot.slane %v10965_v37, 9 }
 0x33e   : > { %8119 = vmatpush3.bf16.msra.mxu1 %v8587_v39  ;;  %v11322_v39 = vshrl.u32 %v10965_v37, 16  ;;  %v11161_v37 = vld [vmem:[%s11255_s4] ss:$0 sm:$0xff] }
 0x33f   : > { %8120 = vmatprep.subr.bf16.mxu1 %v8588_v48 }
 0x340   : > { %v6239_v38 = vrot.slane %v11322_v39, 4  ;;  %v7424_v39 = vrot.slane %v10875_v52, 9  ;;  %v6488_v52 = vrot.slane %v10962_v23, 5 }
 0x341   : > { %8105 = vmatmul.mubr.msk.bf16.gmra.mrb[4].mxu1 %vm881_vm6, %v7406_v9  ;;  %v6262_v9 = vrot.slane %v6260_v42, 5  ;;  %v6512_v42 = vrot.slane %v11005_v11, 5  ;;  %v7435_v11 = vrot.slane %v10947_v15, 9 }
 0x342   : > { %8108 = vmatprep.mubr.msk.bf16.mxu1 %vm881_vm6, %v7407_v24  ;;  %8121 = vmatpush3.bf16.msra.mxu1 %v8588_v48  ;;  %v6243_v13 = vor.u32 %v6242_v35, %v6239_v38  ;;  %v6193_v48 = vsel %vm9106_vm10, %v6188_v43, %v6192_v31  ;;  %v6235_v24 = vsel %vm9106_vm10, %v6230_v58, %v6234_v10  ;;  %v6484_v43 = vrot.slane %v10967_v6, 5 }
 0x343   : > { %8122 = vmatprep.subr.bf16.mxu1 %v8589_v32  ;;  %v7408_v34 = vcombine.low %v6193_v48, %v6207_v49  ;;  %v7409_v61 = vcombine.low %v6221_v22, %v6235_v24  ;;  %v6263_v35 = vsel %vm9106_vm10, %v6258_v47, %v6262_v9  ;;  %v6496_v31 = vrot.slane %v10988_v27, 5 }
 0x344   : > { %v6244_v63 = vrot.slane %v6243_v13, 4  ;;  %v6489_v18 = vsel %vm9282_vm13, %v7426_v5, %v6488_v52  ;;  %v7430_v27 = vrot.slane %v10905_v19, 9  ;;  %v6504_v58 = vrot.slane %v11003_v60, 5 }
 0x345   : > { %v6497_v54 = vsel %vm9282_vm13, %v7428_v45, %v6496_v31  ;;  %v7431_v49 = vrot.slane %v10909_v51, 9  ;;  %v6508_v13 = vrot.slane %v10999_v16, 5  ;;  %v6513_v51 = vsel %vm9282_vm13, %v7432_v1, %v6512_v42 }
 0x346   : > { %8123 = vmatpush3.bf16.msra.mxu1 %v8589_v32  ;;  %v6480_v32 = vrot.slane %v10933_v40, 5  ;;  %v6249_v38 = vsel %vm9106_vm10, %v6244_v63, %v6248_v53  ;;  %v7427_v40 = vrot.slane %v10883_v2, 9  ;;  %v6485_v2 = vsel %vm9282_vm13, %v7425_v36, %v6484_v43 }
 0x347   : > { %v7410_v41 = vcombine.low %v6249_v38, %v6263_v35  ;;  %v7448_v57 = vcombine.low %v6485_v2, %v6489_v18  ;;  %v6505_v19 = vsel %vm9282_vm13, %v7430_v27, %v6504_v58  ;;  %v6509_v56 = vsel %vm9282_vm13, %v7431_v49, %v6508_v13 }
 0x348   : > { %v6481_v29 = vsel %vm9282_vm13, %v7424_v39, %v6480_v32  ;;  %v6493_v23 = vsel %vm9282_vm13, %v7427_v40, %v6492_v17  ;;  %v7450_v60 = vcombine.low %v6501_v20, %v6505_v19  ;;  %v7451_v16 = vcombine.low %v6509_v56, %v6513_v51 }
 0x349   : > { %8109 = vmatmul.mubr.msk.bf16.gmra.mrb[8].mxu1 %vm881_vm6, %v7408_v34  ;;  %v7447_v44 = vcombine.low %v6477_v62, %v6481_v29  ;;  %v7449_v6 = vcombine.low %v6493_v23, %v6497_v54  ;;  %v7434_v22 = vrot.slane %v10943_v7, 9  ;;  %v6524_v10 = vrot.slane %v11047_v0, 5 }
 0x34a   : > { %8112 = vmatprep.mubr.msk.bf16.mxu1 %vm881_vm6, %v7409_v61  ;;  %v7433_v48 = vrot.slane %v10931_v50, 9  ;;  %v7436_v34 = vrot.slane %v10955_v12, 9  ;;  %v6528_v24 = vrot.slane %v11053_v55, 5  ;;  %v6532_v55 = vrot.slane %v11064_v59, 5 }
 0x34b   : > { %v6521_v7 = vsel %vm9282_vm13, %v7434_v22, %v6520_v33  ;;  %v6525_v26 = vsel %vm9282_vm13, %v7435_v11, %v6524_v10  ;;  %v7438_v61 = vrot.slane %v10974_v4, 9  ;;  %v6536_v63 = vrot.slane %v11066_v21, 5 }
 0x34c   : > { %v6517_v15 = vsel %vm9282_vm13, %v7433_v48, %v6516_v8  ;;  %v6529_v50 = vsel %vm9282_vm13, %v7436_v34, %v6528_v24  ;;  %v6533_v47 = vsel %vm9282_vm13, %v7437_v28, %v6532_v55 }
 0x34d   : > { %v7452_v0 = vcombine.low %v6517_v15, %v6521_v7  ;;  %v7453_v12 = vcombine.low %v6525_v26, %v6529_v50  ;;  %v6537_v9 = vsel %vm9282_vm13, %v7438_v61, %v6536_v63 }
 0x34e   : > { %v7454_v14 = vcombine.low %v6533_v47, %v6537_v9 }
 0x351   : > { %8113 = vmatmul.mubr.msk.bf16.gmra.mrb[12].mxu1 %vm881_vm6, %v7410_v41 }
 0x352   : > { %8124 = vmatprep.mubr.msk.bf16.mxu1 %vm881_vm6, %v7447_v44 }
 0x359   : > { %8125 = vmatmul.mubr.msk.bf16.vlgmr.msra.gmra.mrb[0].mxu1 %vm881_vm6, %v7448_v57 }
 0x35a   : > { %8128 = vmatprep.mubr.msk.bf16.mxu1 %vm881_vm6, %v7449_v6 }
 0x361   : > { %8129 = vmatmul.mubr.msk.bf16.gmra.mrb[4].mxu1 %vm881_vm6, %v7450_v60 }
 0x362   : > { %8132 = vmatprep.mubr.msk.bf16.mxu1 %vm881_vm6, %v7451_v16 }
 0x369   : > { %8133 = vmatmul.mubr.msk.bf16.gmra.mrb[8].mxu1 %vm881_vm6, %v7452_v0 }
 0x36a   : > { %8136 = vmatprep.mubr.msk.bf16.mxu1 %vm881_vm6, %v7453_v12 }
 0x371   : > { %8137 = vmatmul.mubr.msk.bf16.gmra.mrb[12].mxu1 %vm881_vm6, %v7454_v14 }
 0x42c   : > { %v8126_v4 = vpop.f32.mrb[0].mxu1 }
 0x42d   : > { %v8156_v59 = vadd.f32 %v8126_v4, %v11161_v37  ;;  %v6653_v21 = vpop.f32.mrb[1].mxu1 }
 0x42e   : > { %v8157_v25 = vadd.f32 %v11161_v37, %v6653_v21  ;;  %v8127_v53 = vpop.f32.mrb[2].mxu1 }
 0x42f   : > { %v6734_v30 = vmul.f32 0.01, %v8156_v59  ;;  %v8158_v39 = vadd.f32 %v8127_v53, %v11161_v37  ;;  %v6656_v32 = vpop.f32.mrb[3].mxu1 }
 0x430   : > { %v6732_v38 = vmul.f32 0.01, %v8157_v25  ;;  %v8159_v35 = vadd.f32 %v11161_v37, %v6656_v32 }
 0x431   : > { %v6750_v62 = vmax.f32 %v8156_v59, %v6734_v30  ;;  %v6735_v41 = vmul.f32 0.01, %v8158_v39 }
 0x432   : > { %v6748_v29 = vmax.f32 %v8157_v25, %v6732_v38  ;;  %v6733_v44 = vmul.f32 0.01, %v8159_v35 }
 0x433   : > { %6766 = vst [vmem:[%s11169_s17 + $0x10] sm:$0xff] %v6750_v62  ;;  %v6751_v5 = vmax.f32 %v8158_v39, %v6735_v41 }
 0x434   : > { %6764 = vst [vmem:[%s11169_s17] sm:$0xff] %v6748_v29  ;;  %v6749_v52 = vmax.f32 %v8159_v35, %v6733_v44  ;;  %v8130_v40 = vpop.f32.mrb[4].mxu1 }
 0x435   : > { %6767 = vst [vmem:[%s11169_s17 + $0x18] sm:$0xff] %v6751_v5  ;;  %v8160_v17 = vadd.f32 %v8130_v40, %v11161_v37  ;;  %v6669_v36 = vpop.f32.mrb[5].mxu1 }
 0x436   : > { %6765 = vst [vmem:[%s11169_s17 + $0x8] sm:$0xff] %v6749_v52  ;;  %v8161_v43 = vadd.f32 %v11161_v37, %v6669_v36  ;;  %v8131_v45 = vpop.f32.mrb[6].mxu1 }
 0x437   : > { %v6738_v31 = vmul.f32 0.01, %v8160_v17  ;;  %v8162_v18 = vadd.f32 %v8131_v45, %v11161_v37  ;;  %v6672_v23 = vpop.f32.mrb[7].mxu1 }
 0x438   : > { %v6736_v2 = vmul.f32 0.01, %v8161_v43  ;;  %v8163_v57 = vadd.f32 %v11161_v37, %v6672_v23 }
 0x439   : > { %v6754_v54 = vmax.f32 %v8160_v17, %v6738_v31  ;;  %v6739_v46 = vmul.f32 0.01, %v8162_v18 }
 0x43a   : > { %v6752_v6 = vmax.f32 %v8161_v43, %v6736_v2  ;;  %v6737_v3 = vmul.f32 0.01, %v8163_v57 }
 0x43b   : > { %6770 = vst [vmem:[%s11169_s17 + $0x30] sm:$0xff] %v6754_v54  ;;  %v6755_v27 = vmax.f32 %v8162_v18, %v6739_v46 }
 0x43c   : > { %6768 = vst [vmem:[%s11169_s17 + $0x20] sm:$0xff] %v6752_v6  ;;  %v6753_v58 = vmax.f32 %v8163_v57, %v6737_v3  ;;  %v8134_v49 = vpop.f32.mrb[8].mxu1 }
 0x43d   : > { %6771 = vst [vmem:[%s11169_s17 + $0x38] sm:$0xff] %v6755_v27  ;;  %v8164_v13 = vadd.f32 %v8134_v49, %v11161_v37  ;;  %v6685_v1 = vpop.f32.mrb[9].mxu1 }
 0x43e   : > { %6769 = vst [vmem:[%s11169_s17 + $0x28] sm:$0xff] %v6753_v58  ;;  %v8165_v42 = vadd.f32 %v11161_v37, %v6685_v1  ;;  %v8135_v20 = vpop.f32.mrb[10].mxu1 }
 0x43f   : > { %v6742_v19 = vmul.f32 0.01, %v8164_v13  ;;  %v8166_v56 = vadd.f32 %v8135_v20, %v11161_v37  ;;  %v6688_v60 = vpop.f32.mrb[11].mxu1 }
 0x440   : > { %v6740_v51 = vmul.f32 0.01, %v8165_v42  ;;  %v8167_v16 = vadd.f32 %v11161_v37, %v6688_v60 }
 0x441   : > { %v6758_v22 = vmax.f32 %v8164_v13, %v6742_v19  ;;  %v6743_v33 = vmul.f32 0.01, %v8166_v56 }
 0x442   : > { %v6756_v11 = vmax.f32 %v8165_v42, %v6740_v51  ;;  %v6741_v10 = vmul.f32 0.01, %v8167_v16 }
 0x443   : > { %6774 = vst [vmem:[%s11169_s17 + $0x50] sm:$0xff] %v6758_v22  ;;  %v6759_v48 = vmax.f32 %v8166_v56, %v6743_v33 }
 0x444   : > { %6772 = vst [vmem:[%s11169_s17 + $0x40] sm:$0xff] %v6756_v11  ;;  %v6757_v8 = vmax.f32 %v8167_v16, %v6741_v10  ;;  %v8138_v34 = vpop.f32.mrb[12].mxu1 }
 0x445   : > { %6775 = vst [vmem:[%s11169_s17 + $0x58] sm:$0xff] %v6759_v48  ;;  %v8168_v24 = vadd.f32 %v8138_v34, %v11161_v37  ;;  %v6701_v7 = vpop.f32.mrb[13].mxu1 }
 0x446   : > { %6773 = vst [vmem:[%s11169_s17 + $0x48] sm:$0xff] %v6757_v8  ;;  %v8169_v26 = vadd.f32 %v11161_v37, %v6701_v7  ;;  %v8139_v15 = vpop.f32.mrb[14].mxu1 }
 0x447   : > { %v6746_v0 = vmul.f32 0.01, %v8168_v24  ;;  %v8170_v50 = vadd.f32 %v8139_v15, %v11161_v37  ;;  %v6704_v28 = vpop.f32.mrb[15].mxu1 }
 0x448   : > { %v6744_v12 = vmul.f32 0.01, %v8169_v26  ;;  %v8171_v55 = vadd.f32 %v11161_v37, %v6704_v28 }
 0x449   : > { %v6762_v61 = vmax.f32 %v8168_v24, %v6746_v0  ;;  %v6747_v63 = vmul.f32 0.01, %v8170_v50 }
 0x44a   : > { %v6760_v47 = vmax.f32 %v8169_v26, %v6744_v12  ;;  %v6745_v9 = vmul.f32 0.01, %v8171_v55 }
 0x44b   : > { %6778 = vst [vmem:[%s11169_s17 + $0x70] sm:$0xff] %v6762_v61  ;;  %v6763_v14 = vmax.f32 %v8170_v50, %v6747_v63 }
 0x44c   : > { %6776 = vst [vmem:[%s11169_s17 + $0x60] sm:$0xff] %v6760_v47  ;;  %v6761_v37 = vmax.f32 %v8171_v55, %v6745_v9 }
 0x44d   : > { %6779 = vst [vmem:[%s11169_s17 + $0x78] sm:$0xff] %v6763_v14 }
 0x44e   : > { %6777 = vst [vmem:[%s11169_s17 + $0x68] sm:$0xff] %v6761_v37 }
 0x44f   : > { %8603 = shalt.err (!%p8600_p3)
}
 0x450   : > { %s8604_s10 = scalar_lea.hbm %s11201_s6, 2048  ;;  %s8608_s13 = scalar_lea.hbm %s11256_s5, 8192 }
 0x451   : > { %p8605_p4 = scmp.ne.s32.totalorder %s11201_s6, %s8604_s10  ;;  %p8609_p9 = scmp.lt.u32.totalorder %s11201_s6, %s11256_s5 }
 0x452   : > { %p8610_p10 = scmp.lt.u32.totalorder %s8608_s13, %s8604_s10  ;;  %p8612_p12 = scmp.lt.u32.totalorder %s8604_s10, %s11201_s6 }
 0x453   : > { %p8606_p7 = pnand %p8605_p4, %p8726_p5 }
 0x454   : > { %p8611_p11 = por %p8610_p10, %p8609_p9 }
 0x455   : > { %p8607_p8 = pneg %p8606_p7 }
 0x456   : > { %p8613_p13 = por %p8612_p12, %p8611_p11 }
 0x458   : > { %p8614_p0 = pnand %p8613_p13, %p8607_p8 }
 0x45a   : > { %8617 = shalt.err (!%p8614_p0)
}
 0x45b   : > { %s8656_s17 = smov 128   ;;  %s8657_s23 = smov 8  }
 0x45c   : > { %8428 = dma.vmem_to_hbm [thread:$0]  (%p8726_p5), %s11203_s25, 2048, %s11201_s6, %s11210_s22, %s8656_s17, %s8656_s17, %s8657_s23  }
 0x45d PF: > { %p8434_p1 = scmp.ge.s32.totalorder %s8652_s21, 2  ;;  %s6810_s26 = sand.u32 1, %s8640_s18  }
 0x45e   : > { %s6811_s30 = scalar_lea.sflag [#allocation5], %s6810_s26 }
 0x45f   : > { %p8431_p2 = pnand %p8434_p1, %p8730_p6 }
 0x461   : > { %8635 = dma.done.wait (!%p8431_p2), %s6811_s30, 2048  }
 0x462   : > { %8637 = vsyncadd (!%p8431_p2), %s6811_s30, 4294965248  ;;  %p15_p3 = scmp.ge.s32.totalorder %s8713_s24, 6   ;;  %s11323_s18 = smov %s8644_s19 }
 0x463   : > { %s11324_s19 = smov %s8648_s20  ;;  %s11325_s20 = smov %s8724_s27 }
 0x464   : > { %s11326_s21 = smov %s8713_s24  ;;  %17 = sbr.rel (!%p15_p3) target bundleno = 3 (0x3), region = 97 }
 0x46b   :  { %6816 = vsyncpa [#allocation5], 1 }
 0x46c   :  { %6818 = vsyncpa [#allocation5 + $0x1], 1 }

</bundles_post_ra>
